<compile_context>
chip_gen: v7x
topology: tpu7x:2x2x1
jax: 0.10.0
libtpu: 0.0.40
codegen_flags: <defaults>
</compile_context>

<pallas_src>
import functools

import jax
import jax.numpy as jnp
from jax.experimental import pallas as pl
from jax.experimental.pallas import tpu as pltpu

MASK = 3  # mask_size (3x3 edge kernels, dilation=1, stride=1)


def _nehd_kernel(x_ref, ew_ref, nw_ref, ctr_ref, wid_ref, mask_ref, out_ref,
                 feats_ref, *, C, NB, H, W, HWp, P):
    """One batch sample per grid step; pixels lane-dense, channels on sublanes.

    x_ref    : VMEM (1, C*NB, P+HWp+P) image, spatial dims flattened onto lanes,
               each channel repeated NB times (one row per edge out-channel),
               zero wings of width P on both sides.
    ew_ref   : VMEM (C*NB, 9)  edge_responses weights, row = out channel c*NB+b.
    nw_ref   : VMEM (C*NB, 9)  no_edge_conv weights,  row = c*NB+b.
    ctr_ref  : VMEM (BN, 1)    histogram bin centers (bin_centers_conv bias).
    wid_ref  : VMEM (BN, 1)    histogram bin widths  (bin_widths_conv weight).
    mask_ref : VMEM (1, HWp)   1.0 on valid (Ho x Wo interior) pixels, else 0.
    out_ref  : VMEM (1, NB+1, C) per-sample GAP histogram, column g = group g.
    feats_ref: VMEM scratch (BN, P+HWp+P): concatenated [edge, no-edge] maps
               with zeroed wings (the wings provide the SAME zero padding).
    """
    NBp1 = NB + 1
    CN = C * NB
    BN = C * NBp1
    Ho = H - (MASK - 1)
    Wo = W - (MASK - 1)
    inv_area = 1.0 / float(Ho * Wo)

    mask = mask_ref[...]                                   # (1, HWp)

    # Flat-pixel offsets of the 9 taps of a 3x3 window anchored at (-1, -1)
    # relative to the (padded-by-one) output pixel.
    offsets = [(ky - 1) * W + (kx - 1)
               for ky in range(MASK) for kx in range(MASK)]

    # ---- edge_responses: grouped 3x3 VALID conv as 9 shifted full-slab FMAs --
    # The response for output pixel (oy, ox) lands at flat position
    # (oy+1)*W + (ox+1); the 1-px border / lane tail hold junk that the mask
    # zeroes (those zeros then act as the SAME padding of no_edge_conv).
    acc = jnp.zeros((CN, HWp), jnp.float32)
    for o, off in enumerate(offsets):
        xs = x_ref[0, :, P + off:P + off + HWp]            # (CN, HWp)
        acc = acc + ew_ref[:, o:o + 1] * xs
    edge = acc * mask                                      # (CN, HWp)

    # Stage the concatenated feature maps in VMEM; zero only the thin wings.
    feats_ref[:, 0:P] = jnp.zeros((BN, P), jnp.float32)
    feats_ref[:, P + HWp:P + HWp + P] = jnp.zeros((BN, P), jnp.float32)
    feats_ref[0:CN, P:P + HWp] = edge                      # aligned chunk store

    # ---- no_edge_conv: grouped 3x3 'same' conv over edge maps + sigmoid ------
    for c in range(C):
        r0, r1 = c * NB, (c + 1) * NB
        acc_c = jnp.zeros((NB, HWp), jnp.float32)
        for o, off in enumerate(offsets):
            es = feats_ref[r0:r1, P + off:P + off + HWp]   # (NB, HWp)
            acc_c = acc_c + nw_ref[r0:r1, o:o + 1] * es
        ne_c = jax.nn.sigmoid(jnp.sum(acc_c, axis=0, keepdims=True))
        feats_ref[CN + c:CN + c + 1, P:P + HWp] = ne_c

    # ---- histogram layer: RBF bins, per-group normalization, masked GAP ------
    # Streamed one normalization group (NB+1 consecutive concat channels) at a
    # time to keep the live working set small; one reciprocal per group.
    for g in range(C):
        k0, k1 = g * NBp1, (g + 1) * NBp1
        grp = feats_ref[k0:k1, P:P + HWp]                  # (NB+1, HWp)
        z = (grp + ctr_ref[k0:k1, :]) * wid_ref[k0:k1, :]
        rbf = jnp.exp(-(z * z))                            # (NB+1, HWp)
        den = jnp.sum(rbf, axis=0, keepdims=True) + 1e-5   # (1, HWp)
        inv = pl.reciprocal(den, approx=False)             # 1 recip per group
        pooled = jnp.sum(rbf * (inv * mask), axis=1, keepdims=True) * inv_area
        out_ref[0, :, g:g + 1] = pooled                    # (NB+1, 1)


def nehd_forward(x, edge_w, noedge_w, centers, widths, *, num_bins):
    """NEHDLayer forward. Returns (N, C*(num_bins+1), 1, 1) like the PyTorch module."""
    N, C, H, W = x.shape
    NB = num_bins
    NBp1 = NB + 1
    BN = C * NBp1
    CN = C * NB
    HW = H * W
    HWp = ((HW + 127) // 128) * 128      # flattened spatial dim, lane-padded
    P = ((W + 1 + 127) // 128) * 128     # aligned wing >= W+1 for shifted reads
    PW = P + HWp + P
    Ho, Wo = H - (MASK - 1), W - (MASK - 1)

    # Layout plumbing: flatten spatial dims onto lanes, repeat each channel NB
    # times (one row per edge_responses output channel), add zero wings.
    xf = x.reshape(N, C, HW).astype(jnp.float32)
    xf = jnp.repeat(xf, NB, axis=1)                              # (N, C*NB, HW)
    xf = jnp.pad(xf, ((0, 0), (0, 0), (P, (HWp - HW) + P)))      # (N, C*NB, PW)

    ew = edge_w.reshape(CN, MASK * MASK).astype(jnp.float32)
    nw = noedge_w.reshape(CN, MASK * MASK).astype(jnp.float32)
    ctr = centers.reshape(BN, 1).astype(jnp.float32)
    wid = widths.reshape(BN, 1).astype(jnp.float32)

    # Validity mask over the flattened spatial axis: 1 on the Ho x Wo interior
    # written by the VALID conv, 0 on the 1-px border and the lane-pad tail.
    py = jnp.arange(H)[:, None]
    px = jnp.arange(W)[None, :]
    m2d = ((py >= 1) & (py <= Ho) & (px >= 1) & (px <= Wo)).astype(jnp.float32)
    mask = jnp.zeros((1, HWp), jnp.float32).at[:, :HW].set(m2d.reshape(1, HW))

    kernel = functools.partial(_nehd_kernel, C=C, NB=NB, H=H, W=W, HWp=HWp, P=P)
    out = pl.pallas_call(
        kernel,
        out_shape=jax.ShapeDtypeStruct((N, NBp1, C), jnp.float32),
        grid=(N,),
        in_specs=[
            pl.BlockSpec((1, CN, PW), lambda n: (n, 0, 0)),
            pl.BlockSpec((CN, MASK * MASK), lambda n: (0, 0)),
            pl.BlockSpec((CN, MASK * MASK), lambda n: (0, 0)),
            pl.BlockSpec((BN, 1), lambda n: (0, 0)),
            pl.BlockSpec((BN, 1), lambda n: (0, 0)),
            pl.BlockSpec((1, HWp), lambda n: (0, 0)),
        ],
        out_specs=pl.BlockSpec((1, NBp1, C), lambda n: (n, 0, 0)),
        scratch_shapes=[pltpu.VMEM((BN, PW), jnp.float32)],
        compiler_params=pltpu.CompilerParams(
            dimension_semantics=("parallel",),   # batch axis -> 2 TCs on v7x
            vmem_limit_bytes=32 * 1024 * 1024,
        ),
    )(xf, ew, nw, ctr, wid, mask)
    # (N, NB+1, C) -> concatenated-channel order (N, C*(NB+1), 1, 1)
    return jnp.transpose(out, (0, 2, 1)).reshape(N, BN, 1, 1)


def nehd_reference(x, edge_w, noedge_w, centers, widths, *, num_bins):
    """Pure-JAX reference mirroring the PyTorch forward (for verification)."""
    N, C, H, W = x.shape
    NB = num_bins
    edge = jax.lax.conv_general_dilated(
        x, edge_w, (1, 1), 'VALID',
        dimension_numbers=('NCHW', 'OIHW', 'NCHW'), feature_group_count=C)
    ne = jax.lax.conv_general_dilated(
        edge, noedge_w, (1, 1), 'SAME',
        dimension_numbers=('NCHW', 'OIHW', 'NCHW'), feature_group_count=C)
    ne = jax.nn.sigmoid(ne)
    xx = jnp.concatenate([edge, ne], axis=1)
    xx = (xx + centers[None, :, None, None]) * widths[None, :, None, None]
    xx = jnp.exp(-(xx ** 2))
    n, c, h, w = xx.shape
    xr = xx.reshape(n, c // (NB + 1), NB + 1, h, w)
    s = xr.sum(axis=2, keepdims=True) + 1e-5
    xx = (xr / s).reshape(n, c, h, w)
    return jnp.mean(xx, axis=(2, 3), keepdims=True)


if __name__ == "__main__":
    key = jax.random.PRNGKey(0)
    N, C, H, W = 2, 4, 16, 16
    NUM_BINS = 4  # one bin per EHD edge orientation (angle_res=45 over 180 deg)
    BN = C * (NUM_BINS + 1)

    # EHD_init-style deterministic 3x3 Sobel masks at 0/45/90/135 degrees,
    # repeated identically for every input channel (grouped conv, 1 in-ch/group).
    m0 = jnp.array([[1., 2., 1.], [0., 0., 0.], [-1., -2., -1.]], jnp.float32)
    m45 = jnp.array([[2., 1., 0.], [1., 0., -1.], [0., -1., -2.]], jnp.float32)
    m90 = m0.T
    m135 = jnp.array([[0., 1., 2.], [-1., 0., 1.], [-2., -1., 0.]], jnp.float32)
    masks = jnp.stack([m0, m45, m90, m135])                 # (NB, 3, 3)
    edge_w = jnp.tile(masks, (C, 1, 1))[:, None, :, :]      # (C*NB, 1, 3, 3)

    k1, k2 = jax.random.split(key)
    bound = 1.0 / float(jnp.sqrt(NUM_BINS * 9.0))
    noedge_w = jax.random.uniform(k1, (C, NUM_BINS, 3, 3), jnp.float32,
                                  minval=-bound, maxval=bound)

    # Histogram params (bin_centers_conv.bias / bin_widths_conv.weight). The
    # true EHD_init fills centers = -bin_init (= -8 for the 3x3 Sobel mask) and
    # widths = 1; we use spread deterministic values so outputs are non-degenerate.
    centers = -jnp.linspace(0.0, 2.0, BN, dtype=jnp.float32)
    widths = jnp.linspace(0.6, 1.4, BN, dtype=jnp.float32)

    x = jax.random.normal(k2, (N, C, H, W), jnp.float32)

    out = nehd_forward(x, edge_w, noedge_w, centers, widths, num_bins=NUM_BINS)
    out = jax.block_until_ready(out)

    ref = nehd_reference(x, edge_w, noedge_w, centers, widths, num_bins=NUM_BINS)
    ref = jax.block_until_ready(ref)

    assert out.shape == (N, BN, 1, 1), out.shape
    if not jnp.allclose(out, ref, rtol=1e-3, atol=1e-4):
        raise AssertionError(
            f"mismatch vs reference, max abs err = {float(jnp.max(jnp.abs(out - ref)))}")
    print("KERNEL_OK")
</pallas_src>

<mosaic_0001>
module attributes {stable_mosaic.version = 11 : i64} {
  func.func @_nehd_kernel(%arg0: i32, %arg1: memref<1x16x512xf32, #tpu.memory_space<vmem>>, %arg2: memref<16x9xf32, #tpu.memory_space<vmem>>, %arg3: memref<16x9xf32, #tpu.memory_space<vmem>>, %arg4: memref<20x1xf32, #tpu.memory_space<vmem>>, %arg5: memref<20x1xf32, #tpu.memory_space<vmem>>, %arg6: memref<1x256xf32, #tpu.memory_space<vmem>>, %arg7: memref<1x5x4xf32, #tpu.memory_space<vmem>>, %arg8: memref<20x512xf32, #tpu.memory_space<vmem>>) attributes {dimension_semantics = [#tpu.dimension_semantics<parallel>], iteration_bounds = array<i64: 2>, scalar_prefetch = 0 : i64, scratch_operands = 1 : i64, tpu.core_type = #tpu.core_type<tc>, window_params = [{transform_indices = @transform_0, window_bounds = array<i64: 1, 16, 512>}, {pipeline_mode = #tpu.pipeline_mode<synchronous>, transform_indices = @transform_1, window_bounds = array<i64: 16, 9>}, {pipeline_mode = #tpu.pipeline_mode<synchronous>, transform_indices = @transform_2, window_bounds = array<i64: 16, 9>}, {pipeline_mode = #tpu.pipeline_mode<synchronous>, transform_indices = @transform_3, window_bounds = array<i64: 20, 1>}, {pipeline_mode = #tpu.pipeline_mode<synchronous>, transform_indices = @transform_4, window_bounds = array<i64: 20, 1>}, {pipeline_mode = #tpu.pipeline_mode<synchronous>, transform_indices = @transform_5, window_bounds = array<i64: 1, 256>}, {transform_indices = @transform_6, window_bounds = array<i64: 1, 5, 4>}]} {
    %c0 = arith.constant 0 : index
    %c0_0 = arith.constant 0 : index
    %0 = vector.load %arg6[%c0, %c0_0] : memref<1x256xf32, #tpu.memory_space<vmem>>, vector<1x256xf32>
    %cst = arith.constant 0.000000e+00 : f32
    %1 = vector.broadcast %cst : f32 to vector<16x256xf32>
    %c0_1 = arith.constant 0 : index
    %c0_2 = arith.constant 0 : index
    %c111 = arith.constant 111 : index
    %2 = vector.load %arg1[%c0_1, %c0_2, %c111] : memref<1x16x512xf32, #tpu.memory_space<vmem>>, vector<1x16x256xf32>
    %3 = vector.shape_cast %2 : vector<1x16x256xf32> to vector<16x256xf32>
    %c0_3 = arith.constant 0 : index
    %c0_4 = arith.constant 0 : index
    %4 = vector.load %arg2[%c0_3, %c0_4] : memref<16x9xf32, #tpu.memory_space<vmem>>, vector<16x1xf32>
    %5 = vector.broadcast %4 : vector<16x1xf32> to vector<16x256xf32>
    %6 = arith.mulf %5, %3 : vector<16x256xf32>
    %7 = arith.addf %1, %6 : vector<16x256xf32>
    %c0_5 = arith.constant 0 : index
    %c0_6 = arith.constant 0 : index
    %c112 = arith.constant 112 : index
    %8 = vector.load %arg1[%c0_5, %c0_6, %c112] : memref<1x16x512xf32, #tpu.memory_space<vmem>>, vector<1x16x256xf32>
    %9 = vector.shape_cast %8 : vector<1x16x256xf32> to vector<16x256xf32>
    %c0_7 = arith.constant 0 : index
    %c1 = arith.constant 1 : index
    %10 = vector.load %arg2[%c0_7, %c1] : memref<16x9xf32, #tpu.memory_space<vmem>>, vector<16x1xf32>
    %11 = vector.broadcast %10 : vector<16x1xf32> to vector<16x256xf32>
    %12 = arith.mulf %11, %9 : vector<16x256xf32>
    %13 = arith.addf %7, %12 : vector<16x256xf32>
    %c0_8 = arith.constant 0 : index
    %c0_9 = arith.constant 0 : index
    %c113 = arith.constant 113 : index
    %14 = vector.load %arg1[%c0_8, %c0_9, %c113] : memref<1x16x512xf32, #tpu.memory_space<vmem>>, vector<1x16x256xf32>
    %15 = vector.shape_cast %14 : vector<1x16x256xf32> to vector<16x256xf32>
    %c0_10 = arith.constant 0 : index
    %c2 = arith.constant 2 : index
    %16 = vector.load %arg2[%c0_10, %c2] : memref<16x9xf32, #tpu.memory_space<vmem>>, vector<16x1xf32>
    %17 = vector.broadcast %16 : vector<16x1xf32> to vector<16x256xf32>
    %18 = arith.mulf %17, %15 : vector<16x256xf32>
    %19 = arith.addf %13, %18 : vector<16x256xf32>
    %c0_11 = arith.constant 0 : index
    %c0_12 = arith.constant 0 : index
    %c127 = arith.constant 127 : index
    %20 = vector.load %arg1[%c0_11, %c0_12, %c127] : memref<1x16x512xf32, #tpu.memory_space<vmem>>, vector<1x16x256xf32>
    %21 = vector.shape_cast %20 : vector<1x16x256xf32> to vector<16x256xf32>
    %c0_13 = arith.constant 0 : index
    %c3 = arith.constant 3 : index
    %22 = vector.load %arg2[%c0_13, %c3] : memref<16x9xf32, #tpu.memory_space<vmem>>, vector<16x1xf32>
    %23 = vector.broadcast %22 : vector<16x1xf32> to vector<16x256xf32>
    %24 = arith.mulf %23, %21 : vector<16x256xf32>
    %25 = arith.addf %19, %24 : vector<16x256xf32>
    %c0_14 = arith.constant 0 : index
    %c0_15 = arith.constant 0 : index
    %c128 = arith.constant 128 : index
    %26 = vector.load %arg1[%c0_14, %c0_15, %c128] : memref<1x16x512xf32, #tpu.memory_space<vmem>>, vector<1x16x256xf32>
    %27 = vector.shape_cast %26 : vector<1x16x256xf32> to vector<16x256xf32>
    %c0_16 = arith.constant 0 : index
    %c4 = arith.constant 4 : index
    %28 = vector.load %arg2[%c0_16, %c4] : memref<16x9xf32, #tpu.memory_space<vmem>>, vector<16x1xf32>
    %29 = vector.broadcast %28 : vector<16x1xf32> to vector<16x256xf32>
    %30 = arith.mulf %29, %27 : vector<16x256xf32>
    %31 = arith.addf %25, %30 : vector<16x256xf32>
    %c0_17 = arith.constant 0 : index
    %c0_18 = arith.constant 0 : index
    %c129 = arith.constant 129 : index
    %32 = vector.load %arg1[%c0_17, %c0_18, %c129] : memref<1x16x512xf32, #tpu.memory_space<vmem>>, vector<1x16x256xf32>
    %33 = vector.shape_cast %32 : vector<1x16x256xf32> to vector<16x256xf32>
    %c0_19 = arith.constant 0 : index
    %c5 = arith.constant 5 : index
    %34 = vector.load %arg2[%c0_19, %c5] : memref<16x9xf32, #tpu.memory_space<vmem>>, vector<16x1xf32>
    %35 = vector.broadcast %34 : vector<16x1xf32> to vector<16x256xf32>
    %36 = arith.mulf %35, %33 : vector<16x256xf32>
    %37 = arith.addf %31, %36 : vector<16x256xf32>
    %c0_20 = arith.constant 0 : index
    %c0_21 = arith.constant 0 : index
    %c143 = arith.constant 143 : index
    %38 = vector.load %arg1[%c0_20, %c0_21, %c143] : memref<1x16x512xf32, #tpu.memory_space<vmem>>, vector<1x16x256xf32>
    %39 = vector.shape_cast %38 : vector<1x16x256xf32> to vector<16x256xf32>
    %c0_22 = arith.constant 0 : index
    %c6 = arith.constant 6 : index
    %40 = vector.load %arg2[%c0_22, %c6] : memref<16x9xf32, #tpu.memory_space<vmem>>, vector<16x1xf32>
    %41 = vector.broadcast %40 : vector<16x1xf32> to vector<16x256xf32>
    %42 = arith.mulf %41, %39 : vector<16x256xf32>
    %43 = arith.addf %37, %42 : vector<16x256xf32>
    %c0_23 = arith.constant 0 : index
    %c0_24 = arith.constant 0 : index
    %c144 = arith.constant 144 : index
    %44 = vector.load %arg1[%c0_23, %c0_24, %c144] : memref<1x16x512xf32, #tpu.memory_space<vmem>>, vector<1x16x256xf32>
    %45 = vector.shape_cast %44 : vector<1x16x256xf32> to vector<16x256xf32>
    %c0_25 = arith.constant 0 : index
    %c7 = arith.constant 7 : index
    %46 = vector.load %arg2[%c0_25, %c7] : memref<16x9xf32, #tpu.memory_space<vmem>>, vector<16x1xf32>
    %47 = vector.broadcast %46 : vector<16x1xf32> to vector<16x256xf32>
    %48 = arith.mulf %47, %45 : vector<16x256xf32>
    %49 = arith.addf %43, %48 : vector<16x256xf32>
    %c0_26 = arith.constant 0 : index
    %c0_27 = arith.constant 0 : index
    %c145 = arith.constant 145 : index
    %50 = vector.load %arg1[%c0_26, %c0_27, %c145] : memref<1x16x512xf32, #tpu.memory_space<vmem>>, vector<1x16x256xf32>
    %51 = vector.shape_cast %50 : vector<1x16x256xf32> to vector<16x256xf32>
    %c0_28 = arith.constant 0 : index
    %c8 = arith.constant 8 : index
    %52 = vector.load %arg2[%c0_28, %c8] : memref<16x9xf32, #tpu.memory_space<vmem>>, vector<16x1xf32>
    %53 = vector.broadcast %52 : vector<16x1xf32> to vector<16x256xf32>
    %54 = arith.mulf %53, %51 : vector<16x256xf32>
    %55 = arith.addf %49, %54 : vector<16x256xf32>
    %56 = vector.broadcast %0 : vector<1x256xf32> to vector<16x256xf32>
    %57 = arith.mulf %55, %56 : vector<16x256xf32>
    %cst_29 = arith.constant 0.000000e+00 : f32
    %58 = vector.broadcast %cst_29 : f32 to vector<20x128xf32>
    %c0_30 = arith.constant 0 : index
    %c0_31 = arith.constant 0 : index
    %59 = vector.load %arg8[%c0_30, %c0_31] : memref<20x512xf32, #tpu.memory_space<vmem>>, vector<20x128xf32>
    tpu.vector_store %arg8[%c0_30, %c0_31], %58 {strides = array<i32>} : memref<20x512xf32, #tpu.memory_space<vmem>>, vector<20x128xf32>,
    %cst_32 = arith.constant 0.000000e+00 : f32
    %60 = vector.broadcast %cst_32 : f32 to vector<20x128xf32>
    %c0_33 = arith.constant 0 : index
    %c384 = arith.constant 384 : index
    %61 = vector.load %arg8[%c0_33, %c384] : memref<20x512xf32, #tpu.memory_space<vmem>>, vector<20x128xf32>
    tpu.vector_store %arg8[%c0_33, %c384], %60 {strides = array<i32>} : memref<20x512xf32, #tpu.memory_space<vmem>>, vector<20x128xf32>,
    %c0_34 = arith.constant 0 : index
    %c128_35 = arith.constant 128 : index
    %62 = vector.load %arg8[%c0_34, %c128_35] : memref<20x512xf32, #tpu.memory_space<vmem>>, vector<16x256xf32>
    tpu.vector_store %arg8[%c0_34, %c128_35], %57 {strides = array<i32>} : memref<20x512xf32, #tpu.memory_space<vmem>>, vector<16x256xf32>,
    %cst_36 = arith.constant 0.000000e+00 : f32
    %63 = vector.broadcast %cst_36 : f32 to vector<4x256xf32>
    %c0_37 = arith.constant 0 : index
    %c111_38 = arith.constant 111 : index
    %64 = vector.load %arg8[%c0_37, %c111_38] : memref<20x512xf32, #tpu.memory_space<vmem>>, vector<4x256xf32>
    %c0_39 = arith.constant 0 : index
    %c0_40 = arith.constant 0 : index
    %65 = vector.load %arg3[%c0_39, %c0_40] : memref<16x9xf32, #tpu.memory_space<vmem>>, vector<4x1xf32>
    %66 = vector.broadcast %65 : vector<4x1xf32> to vector<4x256xf32>
    %67 = arith.mulf %66, %64 : vector<4x256xf32>
    %68 = arith.addf %63, %67 : vector<4x256xf32>
    %c0_41 = arith.constant 0 : index
    %c112_42 = arith.constant 112 : index
    %69 = vector.load %arg8[%c0_41, %c112_42] : memref<20x512xf32, #tpu.memory_space<vmem>>, vector<4x256xf32>
    %c0_43 = arith.constant 0 : index
    %c1_44 = arith.constant 1 : index
    %70 = vector.load %arg3[%c0_43, %c1_44] : memref<16x9xf32, #tpu.memory_space<vmem>>, vector<4x1xf32>
    %71 = vector.broadcast %70 : vector<4x1xf32> to vector<4x256xf32>
    %72 = arith.mulf %71, %69 : vector<4x256xf32>
    %73 = arith.addf %68, %72 : vector<4x256xf32>
    %c0_45 = arith.constant 0 : index
    %c113_46 = arith.constant 113 : index
    %74 = vector.load %arg8[%c0_45, %c113_46] : memref<20x512xf32, #tpu.memory_space<vmem>>, vector<4x256xf32>
    %c0_47 = arith.constant 0 : index
    %c2_48 = arith.constant 2 : index
    %75 = vector.load %arg3[%c0_47, %c2_48] : memref<16x9xf32, #tpu.memory_space<vmem>>, vector<4x1xf32>
    %76 = vector.broadcast %75 : vector<4x1xf32> to vector<4x256xf32>
    %77 = arith.mulf %76, %74 : vector<4x256xf32>
    %78 = arith.addf %73, %77 : vector<4x256xf32>
    %c0_49 = arith.constant 0 : index
    %c127_50 = arith.constant 127 : index
    %79 = vector.load %arg8[%c0_49, %c127_50] : memref<20x512xf32, #tpu.memory_space<vmem>>, vector<4x256xf32>
    %c0_51 = arith.constant 0 : index
    %c3_52 = arith.constant 3 : index
    %80 = vector.load %arg3[%c0_51, %c3_52] : memref<16x9xf32, #tpu.memory_space<vmem>>, vector<4x1xf32>
    %81 = vector.broadcast %80 : vector<4x1xf32> to vector<4x256xf32>
    %82 = arith.mulf %81, %79 : vector<4x256xf32>
    %83 = arith.addf %78, %82 : vector<4x256xf32>
    %c0_53 = arith.constant 0 : index
    %c128_54 = arith.constant 128 : index
    %84 = vector.load %arg8[%c0_53, %c128_54] : memref<20x512xf32, #tpu.memory_space<vmem>>, vector<4x256xf32>
    %c0_55 = arith.constant 0 : index
    %c4_56 = arith.constant 4 : index
    %85 = vector.load %arg3[%c0_55, %c4_56] : memref<16x9xf32, #tpu.memory_space<vmem>>, vector<4x1xf32>
    %86 = vector.broadcast %85 : vector<4x1xf32> to vector<4x256xf32>
    %87 = arith.mulf %86, %84 : vector<4x256xf32>
    %88 = arith.addf %83, %87 : vector<4x256xf32>
    %c0_57 = arith.constant 0 : index
    %c129_58 = arith.constant 129 : index
    %89 = vector.load %arg8[%c0_57, %c129_58] : memref<20x512xf32, #tpu.memory_space<vmem>>, vector<4x256xf32>
    %c0_59 = arith.constant 0 : index
    %c5_60 = arith.constant 5 : index
    %90 = vector.load %arg3[%c0_59, %c5_60] : memref<16x9xf32, #tpu.memory_space<vmem>>, vector<4x1xf32>
    %91 = vector.broadcast %90 : vector<4x1xf32> to vector<4x256xf32>
    %92 = arith.mulf %91, %89 : vector<4x256xf32>
    %93 = arith.addf %88, %92 : vector<4x256xf32>
    %c0_61 = arith.constant 0 : index
    %c143_62 = arith.constant 143 : index
    %94 = vector.load %arg8[%c0_61, %c143_62] : memref<20x512xf32, #tpu.memory_space<vmem>>, vector<4x256xf32>
    %c0_63 = arith.constant 0 : index
    %c6_64 = arith.constant 6 : index
    %95 = vector.load %arg3[%c0_63, %c6_64] : memref<16x9xf32, #tpu.memory_space<vmem>>, vector<4x1xf32>
    %96 = vector.broadcast %95 : vector<4x1xf32> to vector<4x256xf32>
    %97 = arith.mulf %96, %94 : vector<4x256xf32>
    %98 = arith.addf %93, %97 : vector<4x256xf32>
    %c0_65 = arith.constant 0 : index
    %c144_66 = arith.constant 144 : index
    %99 = vector.load %arg8[%c0_65, %c144_66] : memref<20x512xf32, #tpu.memory_space<vmem>>, vector<4x256xf32>
    %c0_67 = arith.constant 0 : index
    %c7_68 = arith.constant 7 : index
    %100 = vector.load %arg3[%c0_67, %c7_68] : memref<16x9xf32, #tpu.memory_space<vmem>>, vector<4x1xf32>
    %101 = vector.broadcast %100 : vector<4x1xf32> to vector<4x256xf32>
    %102 = arith.mulf %101, %99 : vector<4x256xf32>
    %103 = arith.addf %98, %102 : vector<4x256xf32>
    %c0_69 = arith.constant 0 : index
    %c145_70 = arith.constant 145 : index
    %104 = vector.load %arg8[%c0_69, %c145_70] : memref<20x512xf32, #tpu.memory_space<vmem>>, vector<4x256xf32>
    %c0_71 = arith.constant 0 : index
    %c8_72 = arith.constant 8 : index
    %105 = vector.load %arg3[%c0_71, %c8_72] : memref<16x9xf32, #tpu.memory_space<vmem>>, vector<4x1xf32>
    %106 = vector.broadcast %105 : vector<4x1xf32> to vector<4x256xf32>
    %107 = arith.mulf %106, %104 : vector<4x256xf32>
    %108 = arith.addf %103, %107 : vector<4x256xf32>
    %cst_73 = arith.constant dense<0.000000e+00> : vector<256xf32>
    %109 = vector.multi_reduction <add>, %108, %cst_73 [0] : vector<4x256xf32> to vector<256xf32>
    %110 = vector.shape_cast %109 : vector<256xf32> to vector<1x256xf32>
    %111 = arith.negf %110 : vector<1x256xf32>
    %112 = math.exp %111 : vector<1x256xf32>
    %cst_74 = arith.constant 1.000000e+00 : f32
    %113 = vector.broadcast %cst_74 : f32 to vector<1x256xf32>
    %114 = arith.addf %113, %112 : vector<1x256xf32>
    %115 = arith.divf %113, %114 : vector<1x256xf32>
    %c16 = arith.constant 16 : index
    %c128_75 = arith.constant 128 : index
    %116 = vector.load %arg8[%c16, %c128_75] : memref<20x512xf32, #tpu.memory_space<vmem>>, vector<1x256xf32>
    tpu.vector_store %arg8[%c16, %c128_75], %115 {strides = array<i32>} : memref<20x512xf32, #tpu.memory_space<vmem>>, vector<1x256xf32>,
    %cst_76 = arith.constant 0.000000e+00 : f32
    %117 = vector.broadcast %cst_76 : f32 to vector<4x256xf32>
    %c4_77 = arith.constant 4 : index
    %c111_78 = arith.constant 111 : index
    %118 = vector.load %arg8[%c4_77, %c111_78] : memref<20x512xf32, #tpu.memory_space<vmem>>, vector<4x256xf32>
    %c4_79 = arith.constant 4 : index
    %c0_80 = arith.constant 0 : index
    %119 = vector.load %arg3[%c4_79, %c0_80] : memref<16x9xf32, #tpu.memory_space<vmem>>, vector<4x1xf32>
    %120 = vector.broadcast %119 : vector<4x1xf32> to vector<4x256xf32>
    %121 = arith.mulf %120, %118 : vector<4x256xf32>
    %122 = arith.addf %117, %121 : vector<4x256xf32>
    %c4_81 = arith.constant 4 : index
    %c112_82 = arith.constant 112 : index
    %123 = vector.load %arg8[%c4_81, %c112_82] : memref<20x512xf32, #tpu.memory_space<vmem>>, vector<4x256xf32>
    %c4_83 = arith.constant 4 : index
    %c1_84 = arith.constant 1 : index
    %124 = vector.load %arg3[%c4_83, %c1_84] : memref<16x9xf32, #tpu.memory_space<vmem>>, vector<4x1xf32>
    %125 = vector.broadcast %124 : vector<4x1xf32> to vector<4x256xf32>
    %126 = arith.mulf %125, %123 : vector<4x256xf32>
    %127 = arith.addf %122, %126 : vector<4x256xf32>
    %c4_85 = arith.constant 4 : index
    %c113_86 = arith.constant 113 : index
    %128 = vector.load %arg8[%c4_85, %c113_86] : memref<20x512xf32, #tpu.memory_space<vmem>>, vector<4x256xf32>
    %c4_87 = arith.constant 4 : index
    %c2_88 = arith.constant 2 : index
    %129 = vector.load %arg3[%c4_87, %c2_88] : memref<16x9xf32, #tpu.memory_space<vmem>>, vector<4x1xf32>
    %130 = vector.broadcast %129 : vector<4x1xf32> to vector<4x256xf32>
    %131 = arith.mulf %130, %128 : vector<4x256xf32>
    %132 = arith.addf %127, %131 : vector<4x256xf32>
    %c4_89 = arith.constant 4 : index
    %c127_90 = arith.constant 127 : index
    %133 = vector.load %arg8[%c4_89, %c127_90] : memref<20x512xf32, #tpu.memory_space<vmem>>, vector<4x256xf32>
    %c4_91 = arith.constant 4 : index
    %c3_92 = arith.constant 3 : index
    %134 = vector.load %arg3[%c4_91, %c3_92] : memref<16x9xf32, #tpu.memory_space<vmem>>, vector<4x1xf32>
    %135 = vector.broadcast %134 : vector<4x1xf32> to vector<4x256xf32>
    %136 = arith.mulf %135, %133 : vector<4x256xf32>
    %137 = arith.addf %132, %136 : vector<4x256xf32>
    %c4_93 = arith.constant 4 : index
    %c128_94 = arith.constant 128 : index
    %138 = vector.load %arg8[%c4_93, %c128_94] : memref<20x512xf32, #tpu.memory_space<vmem>>, vector<4x256xf32>
    %c4_95 = arith.constant 4 : index
    %c4_96 = arith.constant 4 : index
    %139 = vector.load %arg3[%c4_95, %c4_96] : memref<16x9xf32, #tpu.memory_space<vmem>>, vector<4x1xf32>
    %140 = vector.broadcast %139 : vector<4x1xf32> to vector<4x256xf32>
    %141 = arith.mulf %140, %138 : vector<4x256xf32>
    %142 = arith.addf %137, %141 : vector<4x256xf32>
    %c4_97 = arith.constant 4 : index
    %c129_98 = arith.constant 129 : index
    %143 = vector.load %arg8[%c4_97, %c129_98] : memref<20x512xf32, #tpu.memory_space<vmem>>, vector<4x256xf32>
    %c4_99 = arith.constant 4 : index
    %c5_100 = arith.constant 5 : index
    %144 = vector.load %arg3[%c4_99, %c5_100] : memref<16x9xf32, #tpu.memory_space<vmem>>, vector<4x1xf32>
    %145 = vector.broadcast %144 : vector<4x1xf32> to vector<4x256xf32>
    %146 = arith.mulf %145, %143 : vector<4x256xf32>
    %147 = arith.addf %142, %146 : vector<4x256xf32>
    %c4_101 = arith.constant 4 : index
    %c143_102 = arith.constant 143 : index
    %148 = vector.load %arg8[%c4_101, %c143_102] : memref<20x512xf32, #tpu.memory_space<vmem>>, vector<4x256xf32>
    %c4_103 = arith.constant 4 : index
    %c6_104 = arith.constant 6 : index
    %149 = vector.load %arg3[%c4_103, %c6_104] : memref<16x9xf32, #tpu.memory_space<vmem>>, vector<4x1xf32>
    %150 = vector.broadcast %149 : vector<4x1xf32> to vector<4x256xf32>
    %151 = arith.mulf %150, %148 : vector<4x256xf32>
    %152 = arith.addf %147, %151 : vector<4x256xf32>
    %c4_105 = arith.constant 4 : index
    %c144_106 = arith.constant 144 : index
    %153 = vector.load %arg8[%c4_105, %c144_106] : memref<20x512xf32, #tpu.memory_space<vmem>>, vector<4x256xf32>
    %c4_107 = arith.constant 4 : index
    %c7_108 = arith.constant 7 : index
    %154 = vector.load %arg3[%c4_107, %c7_108] : memref<16x9xf32, #tpu.memory_space<vmem>>, vector<4x1xf32>
    %155 = vector.broadcast %154 : vector<4x1xf32> to vector<4x256xf32>
    %156 = arith.mulf %155, %153 : vector<4x256xf32>
    %157 = arith.addf %152, %156 : vector<4x256xf32>
    %c4_109 = arith.constant 4 : index
    %c145_110 = arith.constant 145 : index
    %158 = vector.load %arg8[%c4_109, %c145_110] : memref<20x512xf32, #tpu.memory_space<vmem>>, vector<4x256xf32>
    %c4_111 = arith.constant 4 : index
    %c8_112 = arith.constant 8 : index
    %159 = vector.load %arg3[%c4_111, %c8_112] : memref<16x9xf32, #tpu.memory_space<vmem>>, vector<4x1xf32>
    %160 = vector.broadcast %159 : vector<4x1xf32> to vector<4x256xf32>
    %161 = arith.mulf %160, %158 : vector<4x256xf32>
    %162 = arith.addf %157, %161 : vector<4x256xf32>
    %cst_113 = arith.constant dense<0.000000e+00> : vector<256xf32>
    %163 = vector.multi_reduction <add>, %162, %cst_113 [0] : vector<4x256xf32> to vector<256xf32>
    %164 = vector.shape_cast %163 : vector<256xf32> to vector<1x256xf32>
    %165 = arith.negf %164 : vector<1x256xf32>
    %166 = math.exp %165 : vector<1x256xf32>
    %cst_114 = arith.constant 1.000000e+00 : f32
    %167 = vector.broadcast %cst_114 : f32 to vector<1x256xf32>
    %168 = arith.addf %167, %166 : vector<1x256xf32>
    %169 = arith.divf %167, %168 : vector<1x256xf32>
    %c17 = arith.constant 17 : index
    %c128_115 = arith.constant 128 : index
    %170 = vector.load %arg8[%c17, %c128_115] : memref<20x512xf32, #tpu.memory_space<vmem>>, vector<1x256xf32>
    tpu.vector_store %arg8[%c17, %c128_115], %169 {strides = array<i32>} : memref<20x512xf32, #tpu.memory_space<vmem>>, vector<1x256xf32>,
    %cst_116 = arith.constant 0.000000e+00 : f32
    %171 = vector.broadcast %cst_116 : f32 to vector<4x256xf32>
    %c8_117 = arith.constant 8 : index
    %c111_118 = arith.constant 111 : index
    %172 = vector.load %arg8[%c8_117, %c111_118] : memref<20x512xf32, #tpu.memory_space<vmem>>, vector<4x256xf32>
    %c8_119 = arith.constant 8 : index
    %c0_120 = arith.constant 0 : index
    %173 = vector.load %arg3[%c8_119, %c0_120] : memref<16x9xf32, #tpu.memory_space<vmem>>, vector<4x1xf32>
    %174 = vector.broadcast %173 : vector<4x1xf32> to vector<4x256xf32>
    %175 = arith.mulf %174, %172 : vector<4x256xf32>
    %176 = arith.addf %171, %175 : vector<4x256xf32>
    %c8_121 = arith.constant 8 : index
    %c112_122 = arith.constant 112 : index
    %177 = vector.load %arg8[%c8_121, %c112_122] : memref<20x512xf32, #tpu.memory_space<vmem>>, vector<4x256xf32>
    %c8_123 = arith.constant 8 : index
    %c1_124 = arith.constant 1 : index
    %178 = vector.load %arg3[%c8_123, %c1_124] : memref<16x9xf32, #tpu.memory_space<vmem>>, vector<4x1xf32>
    %179 = vector.broadcast %178 : vector<4x1xf32> to vector<4x256xf32>
    %180 = arith.mulf %179, %177 : vector<4x256xf32>
    %181 = arith.addf %176, %180 : vector<4x256xf32>
    %c8_125 = arith.constant 8 : index
    %c113_126 = arith.constant 113 : index
    %182 = vector.load %arg8[%c8_125, %c113_126] : memref<20x512xf32, #tpu.memory_space<vmem>>, vector<4x256xf32>
    %c8_127 = arith.constant 8 : index
    %c2_128 = arith.constant 2 : index
    %183 = vector.load %arg3[%c8_127, %c2_128] : memref<16x9xf32, #tpu.memory_space<vmem>>, vector<4x1xf32>
    %184 = vector.broadcast %183 : vector<4x1xf32> to vector<4x256xf32>
    %185 = arith.mulf %184, %182 : vector<4x256xf32>
    %186 = arith.addf %181, %185 : vector<4x256xf32>
    %c8_129 = arith.constant 8 : index
    %c127_130 = arith.constant 127 : index
    %187 = vector.load %arg8[%c8_129, %c127_130] : memref<20x512xf32, #tpu.memory_space<vmem>>, vector<4x256xf32>
    %c8_131 = arith.constant 8 : index
    %c3_132 = arith.constant 3 : index
    %188 = vector.load %arg3[%c8_131, %c3_132] : memref<16x9xf32, #tpu.memory_space<vmem>>, vector<4x1xf32>
    %189 = vector.broadcast %188 : vector<4x1xf32> to vector<4x256xf32>
    %190 = arith.mulf %189, %187 : vector<4x256xf32>
    %191 = arith.addf %186, %190 : vector<4x256xf32>
    %c8_133 = arith.constant 8 : index
    %c128_134 = arith.constant 128 : index
    %192 = vector.load %arg8[%c8_133, %c128_134] : memref<20x512xf32, #tpu.memory_space<vmem>>, vector<4x256xf32>
    %c8_135 = arith.constant 8 : index
    %c4_136 = arith.constant 4 : index
    %193 = vector.load %arg3[%c8_135, %c4_136] : memref<16x9xf32, #tpu.memory_space<vmem>>, vector<4x1xf32>
    %194 = vector.broadcast %193 : vector<4x1xf32> to vector<4x256xf32>
    %195 = arith.mulf %194, %192 : vector<4x256xf32>
    %196 = arith.addf %191, %195 : vector<4x256xf32>
    %c8_137 = arith.constant 8 : index
    %c129_138 = arith.constant 129 : index
    %197 = vector.load %arg8[%c8_137, %c129_138] : memref<20x512xf32, #tpu.memory_space<vmem>>, vector<4x256xf32>
    %c8_139 = arith.constant 8 : index
    %c5_140 = arith.constant 5 : index
    %198 = vector.load %arg3[%c8_139, %c5_140] : memref<16x9xf32, #tpu.memory_space<vmem>>, vector<4x1xf32>
    %199 = vector.broadcast %198 : vector<4x1xf32> to vector<4x256xf32>
    %200 = arith.mulf %199, %197 : vector<4x256xf32>
    %201 = arith.addf %196, %200 : vector<4x256xf32>
    %c8_141 = arith.constant 8 : index
    %c143_142 = arith.constant 143 : index
    %202 = vector.load %arg8[%c8_141, %c143_142] : memref<20x512xf32, #tpu.memory_space<vmem>>, vector<4x256xf32>
    %c8_143 = arith.constant 8 : index
    %c6_144 = arith.constant 6 : index
    %203 = vector.load %arg3[%c8_143, %c6_144] : memref<16x9xf32, #tpu.memory_space<vmem>>, vector<4x1xf32>
    %204 = vector.broadcast %203 : vector<4x1xf32> to vector<4x256xf32>
    %205 = arith.mulf %204, %202 : vector<4x256xf32>
    %206 = arith.addf %201, %205 : vector<4x256xf32>
    %c8_145 = arith.constant 8 : index
    %c144_146 = arith.constant 144 : index
    %207 = vector.load %arg8[%c8_145, %c144_146] : memref<20x512xf32, #tpu.memory_space<vmem>>, vector<4x256xf32>
    %c8_147 = arith.constant 8 : index
    %c7_148 = arith.constant 7 : index
    %208 = vector.load %arg3[%c8_147, %c7_148] : memref<16x9xf32, #tpu.memory_space<vmem>>, vector<4x1xf32>
    %209 = vector.broadcast %208 : vector<4x1xf32> to vector<4x256xf32>
    %210 = arith.mulf %209, %207 : vector<4x256xf32>
    %211 = arith.addf %206, %210 : vector<4x256xf32>
    %c8_149 = arith.constant 8 : index
    %c145_150 = arith.constant 145 : index
    %212 = vector.load %arg8[%c8_149, %c145_150] : memref<20x512xf32, #tpu.memory_space<vmem>>, vector<4x256xf32>
    %c8_151 = arith.constant 8 : index
    %c8_152 = arith.constant 8 : index
    %213 = vector.load %arg3[%c8_151, %c8_152] : memref<16x9xf32, #tpu.memory_space<vmem>>, vector<4x1xf32>
    %214 = vector.broadcast %213 : vector<4x1xf32> to vector<4x256xf32>
    %215 = arith.mulf %214, %212 : vector<4x256xf32>
    %216 = arith.addf %211, %215 : vector<4x256xf32>
    %cst_153 = arith.constant dense<0.000000e+00> : vector<256xf32>
    %217 = vector.multi_reduction <add>, %216, %cst_153 [0] : vector<4x256xf32> to vector<256xf32>
    %218 = vector.shape_cast %217 : vector<256xf32> to vector<1x256xf32>
    %219 = arith.negf %218 : vector<1x256xf32>
    %220 = math.exp %219 : vector<1x256xf32>
    %cst_154 = arith.constant 1.000000e+00 : f32
    %221 = vector.broadcast %cst_154 : f32 to vector<1x256xf32>
    %222 = arith.addf %221, %220 : vector<1x256xf32>
    %223 = arith.divf %221, %222 : vector<1x256xf32>
    %c18 = arith.constant 18 : index
    %c128_155 = arith.constant 128 : index
    %224 = vector.load %arg8[%c18, %c128_155] : memref<20x512xf32, #tpu.memory_space<vmem>>, vector<1x256xf32>
    tpu.vector_store %arg8[%c18, %c128_155], %223 {strides = array<i32>} : memref<20x512xf32, #tpu.memory_space<vmem>>, vector<1x256xf32>,
    %cst_156 = arith.constant 0.000000e+00 : f32
    %225 = vector.broadcast %cst_156 : f32 to vector<4x256xf32>
    %c12 = arith.constant 12 : index
    %c111_157 = arith.constant 111 : index
    %226 = vector.load %arg8[%c12, %c111_157] : memref<20x512xf32, #tpu.memory_space<vmem>>, vector<4x256xf32>
    %c12_158 = arith.constant 12 : index
    %c0_159 = arith.constant 0 : index
    %227 = vector.load %arg3[%c12_158, %c0_159] : memref<16x9xf32, #tpu.memory_space<vmem>>, vector<4x1xf32>
    %228 = vector.broadcast %227 : vector<4x1xf32> to vector<4x256xf32>
    %229 = arith.mulf %228, %226 : vector<4x256xf32>
    %230 = arith.addf %225, %229 : vector<4x256xf32>
    %c12_160 = arith.constant 12 : index
    %c112_161 = arith.constant 112 : index
    %231 = vector.load %arg8[%c12_160, %c112_161] : memref<20x512xf32, #tpu.memory_space<vmem>>, vector<4x256xf32>
    %c12_162 = arith.constant 12 : index
    %c1_163 = arith.constant 1 : index
    %232 = vector.load %arg3[%c12_162, %c1_163] : memref<16x9xf32, #tpu.memory_space<vmem>>, vector<4x1xf32>
    %233 = vector.broadcast %232 : vector<4x1xf32> to vector<4x256xf32>
    %234 = arith.mulf %233, %231 : vector<4x256xf32>
    %235 = arith.addf %230, %234 : vector<4x256xf32>
    %c12_164 = arith.constant 12 : index
    %c113_165 = arith.constant 113 : index
    %236 = vector.load %arg8[%c12_164, %c113_165] : memref<20x512xf32, #tpu.memory_space<vmem>>, vector<4x256xf32>
    %c12_166 = arith.constant 12 : index
    %c2_167 = arith.constant 2 : index
    %237 = vector.load %arg3[%c12_166, %c2_167] : memref<16x9xf32, #tpu.memory_space<vmem>>, vector<4x1xf32>
    %238 = vector.broadcast %237 : vector<4x1xf32> to vector<4x256xf32>
    %239 = arith.mulf %238, %236 : vector<4x256xf32>
    %240 = arith.addf %235, %239 : vector<4x256xf32>
    %c12_168 = arith.constant 12 : index
    %c127_169 = arith.constant 127 : index
    %241 = vector.load %arg8[%c12_168, %c127_169] : memref<20x512xf32, #tpu.memory_space<vmem>>, vector<4x256xf32>
    %c12_170 = arith.constant 12 : index
    %c3_171 = arith.constant 3 : index
    %242 = vector.load %arg3[%c12_170, %c3_171] : memref<16x9xf32, #tpu.memory_space<vmem>>, vector<4x1xf32>
    %243 = vector.broadcast %242 : vector<4x1xf32> to vector<4x256xf32>
    %244 = arith.mulf %243, %241 : vector<4x256xf32>
    %245 = arith.addf %240, %244 : vector<4x256xf32>
    %c12_172 = arith.constant 12 : index
    %c128_173 = arith.constant 128 : index
    %246 = vector.load %arg8[%c12_172, %c128_173] : memref<20x512xf32, #tpu.memory_space<vmem>>, vector<4x256xf32>
    %c12_174 = arith.constant 12 : index
    %c4_175 = arith.constant 4 : index
    %247 = vector.load %arg3[%c12_174, %c4_175] : memref<16x9xf32, #tpu.memory_space<vmem>>, vector<4x1xf32>
    %248 = vector.broadcast %247 : vector<4x1xf32> to vector<4x256xf32>
    %249 = arith.mulf %248, %246 : vector<4x256xf32>
    %250 = arith.addf %245, %249 : vector<4x256xf32>
    %c12_176 = arith.constant 12 : index
    %c129_177 = arith.constant 129 : index
    %251 = vector.load %arg8[%c12_176, %c129_177] : memref<20x512xf32, #tpu.memory_space<vmem>>, vector<4x256xf32>
    %c12_178 = arith.constant 12 : index
    %c5_179 = arith.constant 5 : index
    %252 = vector.load %arg3[%c12_178, %c5_179] : memref<16x9xf32, #tpu.memory_space<vmem>>, vector<4x1xf32>
    %253 = vector.broadcast %252 : vector<4x1xf32> to vector<4x256xf32>
    %254 = arith.mulf %253, %251 : vector<4x256xf32>
    %255 = arith.addf %250, %254 : vector<4x256xf32>
    %c12_180 = arith.constant 12 : index
    %c143_181 = arith.constant 143 : index
    %256 = vector.load %arg8[%c12_180, %c143_181] : memref<20x512xf32, #tpu.memory_space<vmem>>, vector<4x256xf32>
    %c12_182 = arith.constant 12 : index
    %c6_183 = arith.constant 6 : index
    %257 = vector.load %arg3[%c12_182, %c6_183] : memref<16x9xf32, #tpu.memory_space<vmem>>, vector<4x1xf32>
    %258 = vector.broadcast %257 : vector<4x1xf32> to vector<4x256xf32>
    %259 = arith.mulf %258, %256 : vector<4x256xf32>
    %260 = arith.addf %255, %259 : vector<4x256xf32>
    %c12_184 = arith.constant 12 : index
    %c144_185 = arith.constant 144 : index
    %261 = vector.load %arg8[%c12_184, %c144_185] : memref<20x512xf32, #tpu.memory_space<vmem>>, vector<4x256xf32>
    %c12_186 = arith.constant 12 : index
    %c7_187 = arith.constant 7 : index
    %262 = vector.load %arg3[%c12_186, %c7_187] : memref<16x9xf32, #tpu.memory_space<vmem>>, vector<4x1xf32>
    %263 = vector.broadcast %262 : vector<4x1xf32> to vector<4x256xf32>
    %264 = arith.mulf %263, %261 : vector<4x256xf32>
    %265 = arith.addf %260, %264 : vector<4x256xf32>
    %c12_188 = arith.constant 12 : index
    %c145_189 = arith.constant 145 : index
    %266 = vector.load %arg8[%c12_188, %c145_189] : memref<20x512xf32, #tpu.memory_space<vmem>>, vector<4x256xf32>
    %c12_190 = arith.constant 12 : index
    %c8_191 = arith.constant 8 : index
    %267 = vector.load %arg3[%c12_190, %c8_191] : memref<16x9xf32, #tpu.memory_space<vmem>>, vector<4x1xf32>
    %268 = vector.broadcast %267 : vector<4x1xf32> to vector<4x256xf32>
    %269 = arith.mulf %268, %266 : vector<4x256xf32>
    %270 = arith.addf %265, %269 : vector<4x256xf32>
    %cst_192 = arith.constant dense<0.000000e+00> : vector<256xf32>
    %271 = vector.multi_reduction <add>, %270, %cst_192 [0] : vector<4x256xf32> to vector<256xf32>
    %272 = vector.shape_cast %271 : vector<256xf32> to vector<1x256xf32>
    %273 = arith.negf %272 : vector<1x256xf32>
    %274 = math.exp %273 : vector<1x256xf32>
    %cst_193 = arith.constant 1.000000e+00 : f32
    %275 = vector.broadcast %cst_193 : f32 to vector<1x256xf32>
    %276 = arith.addf %275, %274 : vector<1x256xf32>
    %277 = arith.divf %275, %276 : vector<1x256xf32>
    %c19 = arith.constant 19 : index
    %c128_194 = arith.constant 128 : index
    %278 = vector.load %arg8[%c19, %c128_194] : memref<20x512xf32, #tpu.memory_space<vmem>>, vector<1x256xf32>
    tpu.vector_store %arg8[%c19, %c128_194], %277 {strides = array<i32>} : memref<20x512xf32, #tpu.memory_space<vmem>>, vector<1x256xf32>,
    %c0_195 = arith.constant 0 : index
    %c128_196 = arith.constant 128 : index
    %279 = vector.load %arg8[%c0_195, %c128_196] : memref<20x512xf32, #tpu.memory_space<vmem>>, vector<5x256xf32>
    %c0_197 = arith.constant 0 : index
    %c0_198 = arith.constant 0 : index
    %280 = vector.load %arg4[%c0_197, %c0_198] : memref<20x1xf32, #tpu.memory_space<vmem>>, vector<5x1xf32>
    %281 = vector.broadcast %280 : vector<5x1xf32> to vector<5x256xf32>
    %282 = arith.addf %279, %281 : vector<5x256xf32>
    %c0_199 = arith.constant 0 : index
    %c0_200 = arith.constant 0 : index
    %283 = vector.load %arg5[%c0_199, %c0_200] : memref<20x1xf32, #tpu.memory_space<vmem>>, vector<5x1xf32>
    %284 = vector.broadcast %283 : vector<5x1xf32> to vector<5x256xf32>
    %285 = arith.mulf %282, %284 : vector<5x256xf32>
    %286 = arith.mulf %285, %285 : vector<5x256xf32>
    %cst_201 = arith.constant 0.000000e+00 : f32
    %287 = vector.broadcast %cst_201 : f32 to vector<5x256xf32>
    %288 = arith.subf %287, %286 : vector<5x256xf32>
    %289 = math.exp %288 : vector<5x256xf32>
    %cst_202 = arith.constant dense<0.000000e+00> : vector<256xf32>
    %290 = vector.multi_reduction <add>, %289, %cst_202 [0] : vector<5x256xf32> to vector<256xf32>
    %291 = vector.shape_cast %290 : vector<256xf32> to vector<1x256xf32>
    %cst_203 = arith.constant 9.99999974E-6 : f32
    %292 = vector.broadcast %cst_203 : f32 to vector<1x256xf32>
    %293 = arith.addf %291, %292 : vector<1x256xf32>
    %294 = tpu.reciprocal %293 : vector<1x256xf32> -> vector<1x256xf32>
    %295 = arith.mulf %294, %0 : vector<1x256xf32>
    %296 = vector.broadcast %295 : vector<1x256xf32> to vector<5x256xf32>
    %297 = arith.mulf %289, %296 : vector<5x256xf32>
    %cst_204 = arith.constant dense<0.000000e+00> : vector<5xf32>
    %298 = vector.multi_reduction <add>, %297, %cst_204 [1] : vector<5x256xf32> to vector<5xf32>
    %299 = vector.shape_cast %298 : vector<5xf32> to vector<5x1xf32>
    %cst_205 = arith.constant 0.00510204071 : f32
    %300 = vector.broadcast %cst_205 : f32 to vector<5x1xf32>
    %301 = arith.mulf %299, %300 : vector<5x1xf32>
    %c0_206 = arith.constant 0 : index
    %c0_207 = arith.constant 0 : index
    %c0_208 = arith.constant 0 : index
    %302 = vector.load %arg7[%c0_206, %c0_207, %c0_208] : memref<1x5x4xf32, #tpu.memory_space<vmem>>, vector<1x5x1xf32>
    %303 = vector.shape_cast %302 : vector<1x5x1xf32> to vector<5x1xf32>
    %304 = vector.shape_cast %301 : vector<5x1xf32> to vector<1x5x1xf32>
    tpu.vector_store %arg7[%c0_206, %c0_207, %c0_208], %304 {strides = array<i32>} : memref<1x5x4xf32, #tpu.memory_space<vmem>>, vector<1x5x1xf32>,
    %c5_209 = arith.constant 5 : index
    %c128_210 = arith.constant 128 : index
    %305 = vector.load %arg8[%c5_209, %c128_210] : memref<20x512xf32, #tpu.memory_space<vmem>>, vector<5x256xf32>
    %c5_211 = arith.constant 5 : index
    %c0_212 = arith.constant 0 : index
    %306 = vector.load %arg4[%c5_211, %c0_212] : memref<20x1xf32, #tpu.memory_space<vmem>>, vector<5x1xf32>
    %307 = vector.broadcast %306 : vector<5x1xf32> to vector<5x256xf32>
    %308 = arith.addf %305, %307 : vector<5x256xf32>
    %c5_213 = arith.constant 5 : index
    %c0_214 = arith.constant 0 : index
    %309 = vector.load %arg5[%c5_213, %c0_214] : memref<20x1xf32, #tpu.memory_space<vmem>>, vector<5x1xf32>
    %310 = vector.broadcast %309 : vector<5x1xf32> to vector<5x256xf32>
    %311 = arith.mulf %308, %310 : vector<5x256xf32>
    %312 = arith.mulf %311, %311 : vector<5x256xf32>
    %cst_215 = arith.constant 0.000000e+00 : f32
    %313 = vector.broadcast %cst_215 : f32 to vector<5x256xf32>
    %314 = arith.subf %313, %312 : vector<5x256xf32>
    %315 = math.exp %314 : vector<5x256xf32>
    %cst_216 = arith.constant dense<0.000000e+00> : vector<256xf32>
    %316 = vector.multi_reduction <add>, %315, %cst_216 [0] : vector<5x256xf32> to vector<256xf32>
    %317 = vector.shape_cast %316 : vector<256xf32> to vector<1x256xf32>
    %cst_217 = arith.constant 9.99999974E-6 : f32
    %318 = vector.broadcast %cst_217 : f32 to vector<1x256xf32>
    %319 = arith.addf %317, %318 : vector<1x256xf32>
    %320 = tpu.reciprocal %319 : vector<1x256xf32> -> vector<1x256xf32>
    %321 = arith.mulf %320, %0 : vector<1x256xf32>
    %322 = vector.broadcast %321 : vector<1x256xf32> to vector<5x256xf32>
    %323 = arith.mulf %315, %322 : vector<5x256xf32>
    %cst_218 = arith.constant dense<0.000000e+00> : vector<5xf32>
    %324 = vector.multi_reduction <add>, %323, %cst_218 [1] : vector<5x256xf32> to vector<5xf32>
    %325 = vector.shape_cast %324 : vector<5xf32> to vector<5x1xf32>
    %cst_219 = arith.constant 0.00510204071 : f32
    %326 = vector.broadcast %cst_219 : f32 to vector<5x1xf32>
    %327 = arith.mulf %325, %326 : vector<5x1xf32>
    %c0_220 = arith.constant 0 : index
    %c0_221 = arith.constant 0 : index
    %c1_222 = arith.constant 1 : index
    %328 = vector.load %arg7[%c0_220, %c0_221, %c1_222] : memref<1x5x4xf32, #tpu.memory_space<vmem>>, vector<1x5x1xf32>
    %329 = vector.shape_cast %328 : vector<1x5x1xf32> to vector<5x1xf32>
    %330 = vector.shape_cast %327 : vector<5x1xf32> to vector<1x5x1xf32>
    tpu.vector_store %arg7[%c0_220, %c0_221, %c1_222], %330 {strides = array<i32>} : memref<1x5x4xf32, #tpu.memory_space<vmem>>, vector<1x5x1xf32>,
    %c10 = arith.constant 10 : index
    %c128_223 = arith.constant 128 : index
    %331 = vector.load %arg8[%c10, %c128_223] : memref<20x512xf32, #tpu.memory_space<vmem>>, vector<5x256xf32>
    %c10_224 = arith.constant 10 : index
    %c0_225 = arith.constant 0 : index
    %332 = vector.load %arg4[%c10_224, %c0_225] : memref<20x1xf32, #tpu.memory_space<vmem>>, vector<5x1xf32>
    %333 = vector.broadcast %332 : vector<5x1xf32> to vector<5x256xf32>
    %334 = arith.addf %331, %333 : vector<5x256xf32>
    %c10_226 = arith.constant 10 : index
    %c0_227 = arith.constant 0 : index
    %335 = vector.load %arg5[%c10_226, %c0_227] : memref<20x1xf32, #tpu.memory_space<vmem>>, vector<5x1xf32>
    %336 = vector.broadcast %335 : vector<5x1xf32> to vector<5x256xf32>
    %337 = arith.mulf %334, %336 : vector<5x256xf32>
    %338 = arith.mulf %337, %337 : vector<5x256xf32>
    %cst_228 = arith.constant 0.000000e+00 : f32
    %339 = vector.broadcast %cst_228 : f32 to vector<5x256xf32>
    %340 = arith.subf %339, %338 : vector<5x256xf32>
    %341 = math.exp %340 : vector<5x256xf32>
    %cst_229 = arith.constant dense<0.000000e+00> : vector<256xf32>
    %342 = vector.multi_reduction <add>, %341, %cst_229 [0] : vector<5x256xf32> to vector<256xf32>
    %343 = vector.shape_cast %342 : vector<256xf32> to vector<1x256xf32>
    %cst_230 = arith.constant 9.99999974E-6 : f32
    %344 = vector.broadcast %cst_230 : f32 to vector<1x256xf32>
    %345 = arith.addf %343, %344 : vector<1x256xf32>
    %346 = tpu.reciprocal %345 : vector<1x256xf32> -> vector<1x256xf32>
    %347 = arith.mulf %346, %0 : vector<1x256xf32>
    %348 = vector.broadcast %347 : vector<1x256xf32> to vector<5x256xf32>
    %349 = arith.mulf %341, %348 : vector<5x256xf32>
    %cst_231 = arith.constant dense<0.000000e+00> : vector<5xf32>
    %350 = vector.multi_reduction <add>, %349, %cst_231 [1] : vector<5x256xf32> to vector<5xf32>
    %351 = vector.shape_cast %350 : vector<5xf32> to vector<5x1xf32>
    %cst_232 = arith.constant 0.00510204071 : f32
    %352 = vector.broadcast %cst_232 : f32 to vector<5x1xf32>
    %353 = arith.mulf %351, %352 : vector<5x1xf32>
    %c0_233 = arith.constant 0 : index
    %c0_234 = arith.constant 0 : index
    %c2_235 = arith.constant 2 : index
    %354 = vector.load %arg7[%c0_233, %c0_234, %c2_235] : memref<1x5x4xf32, #tpu.memory_space<vmem>>, vector<1x5x1xf32>
    %355 = vector.shape_cast %354 : vector<1x5x1xf32> to vector<5x1xf32>
    %356 = vector.shape_cast %353 : vector<5x1xf32> to vector<1x5x1xf32>
    tpu.vector_store %arg7[%c0_233, %c0_234, %c2_235], %356 {strides = array<i32>} : memref<1x5x4xf32, #tpu.memory_space<vmem>>, vector<1x5x1xf32>,
    %c15 = arith.constant 15 : index
    %c128_236 = arith.constant 128 : index
    %357 = vector.load %arg8[%c15, %c128_236] : memref<20x512xf32, #tpu.memory_space<vmem>>, vector<5x256xf32>
    %c15_237 = arith.constant 15 : index
    %c0_238 = arith.constant 0 : index
    %358 = vector.load %arg4[%c15_237, %c0_238] : memref<20x1xf32, #tpu.memory_space<vmem>>, vector<5x1xf32>
    %359 = vector.broadcast %358 : vector<5x1xf32> to vector<5x256xf32>
    %360 = arith.addf %357, %359 : vector<5x256xf32>
    %c15_239 = arith.constant 15 : index
    %c0_240 = arith.constant 0 : index
    %361 = vector.load %arg5[%c15_239, %c0_240] : memref<20x1xf32, #tpu.memory_space<vmem>>, vector<5x1xf32>
    %362 = vector.broadcast %361 : vector<5x1xf32> to vector<5x256xf32>
    %363 = arith.mulf %360, %362 : vector<5x256xf32>
    %364 = arith.mulf %363, %363 : vector<5x256xf32>
    %cst_241 = arith.constant 0.000000e+00 : f32
    %365 = vector.broadcast %cst_241 : f32 to vector<5x256xf32>
    %366 = arith.subf %365, %364 : vector<5x256xf32>
    %367 = math.exp %366 : vector<5x256xf32>
    %cst_242 = arith.constant dense<0.000000e+00> : vector<256xf32>
    %368 = vector.multi_reduction <add>, %367, %cst_242 [0] : vector<5x256xf32> to vector<256xf32>
    %369 = vector.shape_cast %368 : vector<256xf32> to vector<1x256xf32>
    %cst_243 = arith.constant 9.99999974E-6 : f32
    %370 = vector.broadcast %cst_243 : f32 to vector<1x256xf32>
    %371 = arith.addf %369, %370 : vector<1x256xf32>
    %372 = tpu.reciprocal %371 : vector<1x256xf32> -> vector<1x256xf32>
    %373 = arith.mulf %372, %0 : vector<1x256xf32>
    %374 = vector.broadcast %373 : vector<1x256xf32> to vector<5x256xf32>
    %375 = arith.mulf %367, %374 : vector<5x256xf32>
    %cst_244 = arith.constant dense<0.000000e+00> : vector<5xf32>
    %376 = vector.multi_reduction <add>, %375, %cst_244 [1] : vector<5x256xf32> to vector<5xf32>
    %377 = vector.shape_cast %376 : vector<5xf32> to vector<5x1xf32>
    %cst_245 = arith.constant 0.00510204071 : f32
    %378 = vector.broadcast %cst_245 : f32 to vector<5x1xf32>
    %379 = arith.mulf %377, %378 : vector<5x1xf32>
    %c0_246 = arith.constant 0 : index
    %c0_247 = arith.constant 0 : index
    %c3_248 = arith.constant 3 : index
    %380 = vector.load %arg7[%c0_246, %c0_247, %c3_248] : memref<1x5x4xf32, #tpu.memory_space<vmem>>, vector<1x5x1xf32>
    %381 = vector.shape_cast %380 : vector<1x5x1xf32> to vector<5x1xf32>
    %382 = vector.shape_cast %379 : vector<5x1xf32> to vector<1x5x1xf32>
    tpu.vector_store %arg7[%c0_246, %c0_247, %c3_248], %382 {strides = array<i32>} : memref<1x5x4xf32, #tpu.memory_space<vmem>>, vector<1x5x1xf32>,
    return
  }
  func.func @transform_0(%arg0: i32) -> (i32, i32, i32) {
    %c0_i32 = arith.constant 0 : i32
    %c0_i32_0 = arith.constant 0 : i32
    %c0_i32_1 = arith.constant 0 : i32
    return %arg0, %c0_i32, %c0_i32_0 : i32, i32, i32
  }
  func.func @transform_1(%arg0: i32) -> (i32, i32) {
    %c0_i32 = arith.constant 0 : i32
    %c0_i32_0 = arith.constant 0 : i32
    %c0_i32_1 = arith.constant 0 : i32
    return %c0_i32, %c0_i32_0 : i32, i32
  }
  func.func @transform_2(%arg0: i32) -> (i32, i32) {
    %c0_i32 = arith.constant 0 : i32
    %c0_i32_0 = arith.constant 0 : i32
    %c0_i32_1 = arith.constant 0 : i32
    return %c0_i32, %c0_i32_0 : i32, i32
  }
  func.func @transform_3(%arg0: i32) -> (i32, i32) {
    %c0_i32 = arith.constant 0 : i32
    %c0_i32_0 = arith.constant 0 : i32
    %c0_i32_1 = arith.constant 0 : i32
    return %c0_i32, %c0_i32_0 : i32, i32
  }
  func.func @transform_4(%arg0: i32) -> (i32, i32) {
    %c0_i32 = arith.constant 0 : i32
    %c0_i32_0 = arith.constant 0 : i32
    %c0_i32_1 = arith.constant 0 : i32
    return %c0_i32, %c0_i32_0 : i32, i32
  }
  func.func @transform_5(%arg0: i32) -> (i32, i32) {
    %c0_i32 = arith.constant 0 : i32
    %c0_i32_0 = arith.constant 0 : i32
    %c0_i32_1 = arith.constant 0 : i32
    return %c0_i32, %c0_i32_0 : i32, i32
  }
  func.func @transform_6(%arg0: i32) -> (i32, i32, i32) {
    %c0_i32 = arith.constant 0 : i32
    %c0_i32_0 = arith.constant 0 : i32
    %c0_i32_1 = arith.constant 0 : i32
    return %arg0, %c0_i32, %c0_i32_0 : i32, i32, i32
  }
}

</mosaic_0001>

<bundles_post_ra>
// kernel: tpu_custom_call.1
= control target key start
LH: loop header
LB: loop body
LE: loop exit
PB: predicated region body
PF: predicated region fallthrough
CT: control target
= control target key end

     0   :  { %11 = vsyncpa [#allocation4], 0  ;;  %s3764_s0 = inlined_call_operand.hbm [shape: f32[2,16,512], index: 0, kind: input, shape index: {}]   ;;  %s3765_s1 = inlined_call_operand.vmem [shape: f32[16,9], index: 1, kind: input, shape index: {}]   ;;  %s3766_s2 = inlined_call_operand.vmem [shape: f32[16,9], index: 2, kind: input, shape index: {}]   ;;  %s3767_s3 = inlined_call_operand.vmem [shape: f32[20,1], index: 3, kind: input, shape index: {}]   ;;  %s3768_s4 = inlined_call_operand.vmem [shape: f32[20,1], index: 4, kind: input, shape index: {}]   ;;  %s3769_s5 = inlined_call_operand.vmem [shape: f32[1,256], index: 5, kind: input, shape index: {}]   ;;  %s3770_s6 = inlined_call_operand.vmem [shape: f32[2,5,4], index: 6, kind: output, shape index: {}]  }
   0x1   :  { %13 = vsyncpa [#allocation4 + $0x1], 0  ;;  %s2513_s21 = smov 0   ;;  %s2515_s22 = smov 0  }
   0x2   :  { %s2517_s23 = smov 0   ;;  %s2519_s24 = smov 0  }
   0x3 LB: > { %s2532_s25 = sadd.s32 4294967295, %s2449_s24   ;;  %s2535_s26 = sadd.s32 1, %s2449_s24   ;;  %s2449_s24 = sphi %s2519_s24, %s3946_s24   ;;  %s2445_s23 = sphi %s2517_s23, %s3945_s23   ;;  %s2441_s22 = sphi %s2515_s22, %s3944_s22   ;;  %s2437_s21 = sphi %s2513_s21, %s3943_s21  }
   0x4   : > { %s23_s27 = ssub.s32 %s2449_s24, %s2535_s26  ;;  %s26_s28 = sadd.s32 1, %s2445_s23 }
   0x5   : > { %p24_p0 = scmp.eq.s32.totalorder %s23_s27, 0  ;;  %p33_p1 = scmp.ne.s32.totalorder %s2445_s23, %s2441_s22 }
   0x6   : > { %p34_p2 = scmp.eq.s32.totalorder %s2449_s24, 0  ;;  %p39_p3 = scmp.ne.s32.totalorder %s2441_s22, %s2437_s21 }
   0x7   : > { %s2545_s29 = scalar_select %p24_p0, %s2445_s23, %s26_s28  }
   0x8   : > { %p35_p4 = por %p34_p2, %p33_p1  ;;  %p40_p5 = scmp.eq.s32.totalorder %s2532_s25, 0 }
   0x9   : > { %p2200_p6 = scmp.lt.s32.totalorder %s2449_s24, 2  ;;  %s209_s7 = sand.u32 1, %s2445_s23  }
   0xa   : > { %p2549_p7 = por %p40_p5, %p39_p3  ;;  %s2175_s8 = sshll.u32 %s209_s7, 6 }
   0xb   : > { %s2193_s9 = sshll.u32 %s2449_s24, 10  ;;  %s213_s13 = scalar_lea.vmem [#allocation3], %s2175_s8 }
   0xc   : > { %s2558_s12 = scalar_lea.hbm %s3764_s0, %s2193_s9  ;;  %s220_s14 = sshll.u32 %s213_s13, 4  ;;  %s2560_s14 = int_to_ptr.vmem [resolvable:$true] %s220_s14 }
   0xd   : > { %p2562_p8 = pnand %p2200_p6, %p35_p4  ;;  %s2567_s16 = scalar_lea.sflag [#allocation4], %s209_s7 }
   0xe   : > { %s2385_s17 = scalar_lea.hbm %s2558_s12, 1024  ;;  %s2390_s20 = scalar_lea.hbm %s3764_s0, 2048 }
   0xf   : > { %p2386_p10 = scmp.ne.s32.totalorder %s2558_s12, %s2385_s17  ;;  %p2387_p11 = pneg %p2562_p8 }
  0x10   : > { %p2391_p0 = scmp.lt.u32.totalorder %s2558_s12, %s3764_s0  ;;  %p2392_p1 = scmp.lt.u32.totalorder %s2390_s20, %s2385_s17 }
  0x11   : > { %p2388_p12 = pnand %p2387_p11, %p2386_p10  ;;  %p2394_p3 = scmp.lt.u32.totalorder %s2385_s17, %s2558_s12 }
  0x12   : > { %p2393_p2 = por %p2392_p1, %p2391_p0 }
  0x13   : > { %p2389_p13 = pneg %p2388_p12 }
  0x14   : > { %p2395_p4 = por %p2394_p3, %p2393_p2 }
  0x16   : > { %p2396_p5 = pnand %p2395_p4, %p2389_p13 }
  0x18   : > { %2399 = shalt.err (!%p2396_p5)
}
  0x19   : > { %s2400_s28 = scalar_lea.vmem %s2560_s14, 1024  ;;  %s2451_s7 = smov [#allocation3]  }
  0x1a   : > { %p2401_p6 = scmp.ne.s32.totalorder %s2560_s14, %s2400_s28  ;;  %s2405_s8 = sshll.u32 %s2451_s7, 4  ;;  %s2406_s8 = int_to_ptr.vmem [resolvable:$false] %s2405_s8 }
  0x1b   : > { %s2407_s9 = scalar_lea.vmem %s2406_s8, 2048  ;;  %p2408_p9 = scmp.lt.s32.totalorder %s2560_s14, %s2406_s8 }
  0x1c   : > { %p2403_p10 = pnand %p2401_p6, %p2387_p11  ;;  %p2409_p0 = scmp.lt.s32.totalorder %s2407_s9, %s2400_s28 }
  0x1e   : > { %p2404_p12 = pneg %p2403_p10  ;;  %p2410_p1 = por %p2409_p0, %p2408_p9 }
  0x20   : > { %p2411_p2 = pnand %p2410_p1, %p2404_p12 }
  0x22   : > { %2414 = shalt.err (!%p2411_p2)
}
  0x23   : > { %s2452_s10 = smov 512   ;;  %s2453_s11 = smov 32  }
  0x24   : > { %2199 = dma.hbm_to_vmem [thread:$0]  (!%p2562_p8), %s2558_s12, 1024, %s2560_s14, %s2567_s16, %s2452_s10, %s2452_s10, %s2453_s11  }
  0x25   : > { %p228_p11 = scmp.lt.s32.totalorder %s2449_s24, 3  ;;  %p3841_p13 = scmp.ge.s32.totalorder %s2449_s24, 1 }
  0x27   : > { %p229_p3 = pnand %p3841_p13, %p228_p11 }
  0x29   : > { %232 = sbr.rel (%p229_p3) target bundleno = 1595 (0x63b), region = 44 }
  0x30   : > { %s234_s13 = sand.u32 1, %s2441_s22  }
  0x31   : > { %s2179_s17 = sshll.u32 %s234_s13, 6  ;;  %s235_s18 = scalar_lea.sflag [#allocation4], %s234_s13 }
  0x32   : > { %s2599_s19 = scalar_lea.vmem [#allocation3], %s2179_s17 }
  0x33   : > { %2432 = dma.done.wait (%p2549_p7), %s235_s18, 1024  }
  0x34   : > { %2434 = vsyncadd (%p2549_p7), %s235_s18, 4294966272  ;;  %v3779_v0 = vmov 1   ;;  %v3772_v1 = vmov 0   ;;  %v277_v2 = vld [vmem:[%s3765_s1] sm:$0xff]  ;;  %v278_v3 = vld [vmem:[%s3765_s1 + $0x8] sm:$0xff]  ;;  %v3774_v4 = vmov 2  }
  0x35   : > { %2260 = vset.pattern.permute.xlu1 %v3779_v0  ;;  %2259 = vset.pattern.permute.xlu0 %v3772_v1  ;;  %v3786_v5 = vmov 3   ;;  %v3784_v6 = vmov 4   ;;  %v3777_v7 = vmov 5   ;;  %v3782_v8 = vmov 6   ;;  %v2630_v11 = vld [vmem:[%s2599_s19 + $0x8] sm:$0xff]  ;;  %v2633_v12 = vld [vmem:[%s2599_s19] sm:$0xff] }
  0x36   : > { %302 = vperm.xlu1 %2260, %v277_v2   ;;  %281 = vperm.xlu0 %2259, %v277_v2   ;;  %v3780_v9 = vmov 7   ;;  %v3775_v10 = vmov 8   ;;  %v2640_v17 = vld [vmem:[%s2599_s19 + $0x20] sm:$0xff]  ;;  %v2643_v18 = vld [vmem:[%s2599_s19 + $0x10] sm:$0xff]  ;;  %s2463_s30 = smov 127   ;;  %v2652_v23 = vld [vmem:[%s2599_s19 + $0x28] sm:$0xff] }
  0x37   : > { %v2655_v24 = vld [vmem:[%s2599_s19 + $0x30] sm:$0xff]  ;;  %s2464_s16 = smov 126   ;;  %s2465_s20 = smov 112   ;;  %v2689_v47 = vld [vmem:[%s2599_s19 + $0x18] sm:$0xff]  ;;  %vm333_vm0 = vcmask 1039360   ;;  %vm382_vm1 = vcmask 1031168  }
  0x38   : > { %s2466_s21 = smov 111   ;;  %s2467_s27 = smov 110   ;;  %v492_v60 = vld [vmem:[%s2599_s19 + $0x38] sm:$0xff]  ;;  %vm431_vm2 = vcmask 916480   ;;  %vm472_vm3 = vcmask 908288   ;;  %vm525_vm4 = vcmask 900096  }
  0x39   : > { %s2468_s28 = smov 96   ;;  %s2469_s7 = smov 95   ;;  %vm574_vm5 = vcmask 785408   ;;  %vm623_vm6 = vcmask 777216   ;;  %vm672_vm7 = vcmask 769024   ;;  %vm736_vm8 = vcmask 138240  }
  0x3a   : > { %306 = vperm.xlu1 %2260, %v278_v3   ;;  %286 = vperm.xlu0 %2259, %v278_v3   ;;  %s2470_s8 = smov 94   ;;  %s2472_s17 = smov 17   ;;  %vm954_vm9 = vcmask 1044344   ;;  %vm962_vm10 = vcmask 1043456   ;;  %vm970_vm11 = vcmask 904192   ;;  %vm1073_vm12 = vcmask 130048  }
  0x3b   : > { %s2473_s14 = smov 15   ;;  %s2474_s15 = smov 16   ;;  %vm1092_vm13 = vcmask 121856   ;;  %vm1111_vm14 = vcmask 7168   ;;  %vm1167_vm15 = vcmask 924672  }
  0x3c   : > { %s2475_s9 = smov 1   ;;  %p266_p7 = scmp.lt.s32.totalorder %s2532_s25, 1 }
  0x3e   : > { %2261 = vset.pattern.permute.xlu0 %v3774_v4  ;;  %2262 = vset.pattern.permute.xlu1 %v3774_v4  ;;  %s3948_s25 = smov (!%p266_p7, %s2532_s25), 1 }
  0x3f   : > { %351 = vperm.xlu0 %2261, %v277_v2   ;;  %355 = vperm.xlu1 %2262, %v278_v3  }
  0x43   : > { %2263 = vset.pattern.permute.xlu1 %v3786_v5  ;;  %2264 = vset.pattern.permute.xlu0 %v3786_v5 }
  0x44   : > { %400 = vperm.xlu1 %2263, %v277_v2   ;;  %404 = vperm.xlu0 %2264, %v278_v3  }
  0x48   : > { %2265 = vset.pattern.permute.xlu0 %v3784_v6  ;;  %2266 = vset.pattern.permute.xlu1 %v3784_v6 }
  0x49   : > { %449 = vperm.xlu0 %2265, %v277_v2   ;;  %453 = vperm.xlu1 %2266, %v278_v3  }
  0x4d   : > { %2267 = vset.pattern.permute.xlu1 %v3777_v7  ;;  %2268 = vset.pattern.permute.xlu0 %v3777_v7 }
  0x4e   : > { %494 = vperm.xlu1 %2267, %v277_v2   ;;  %498 = vperm.xlu0 %2268, %v278_v3  }
  0x52   : > { %2269 = vset.pattern.permute.xlu0 %v3782_v8  ;;  %2270 = vset.pattern.permute.xlu1 %v3782_v8 }
  0x53   : > { %543 = vperm.xlu0 %2269, %v277_v2   ;;  %547 = vperm.xlu1 %2270, %v278_v3  }
  0x57   : > { %2271 = vset.pattern.permute.xlu1 %v3780_v9  ;;  %2272 = vset.pattern.permute.xlu0 %v3780_v9 }
  0x58   : > { %592 = vperm.xlu1 %2271, %v277_v2   ;;  %596 = vperm.xlu0 %2272, %v278_v3  }
  0x5c   : > { %2273 = vset.pattern.permute.xlu0 %v3775_v10  ;;  %2274 = vset.pattern.permute.xlu1 %v3775_v10 }
  0x5d   : > { %641 = vperm.xlu0 %2273, %v277_v2   ;;  %645 = vperm.xlu1 %2274, %v278_v3  }
  0x61   : > { %2276 = vset.pattern.permute.xlu0 %v3779_v0  ;;  %2275 = vset.pattern.permute.xlu1 %v3772_v1 }
  0xb5   : > { %v303_v13 = vpop.permute.xlu1 %302  ;;  %v2635_v14 = vpop.permute.xlu0 %281 }
  0xb6   : > { %v310_v15 = vmul.f32 %v303_v13, %v2630_v11  ;;  %v309_v16 = vmul.f32 %v303_v13, %v2633_v12  ;;  %v311_v22 = vmul.f32 %v303_v13, %v2643_v18 }
  0xb8   : > { %323 = vrot.lane.b32.xlu1 %v310_v15, %s2463_s30  ;;  %321 = vrot.lane.b32.xlu0 %v309_v16, %s2463_s30 }
  0xb9   : > { %v307_v19 = vpop.permute.xlu1 %306  ;;  %v2647_v20 = vpop.permute.xlu0 %286 }
  0xba   : > { %v312_v21 = vmul.f32 %v307_v19, %v2640_v17  ;;  %v314_v25 = vmul.f32 %v307_v19, %v2655_v24  ;;  %v313_v26 = vmul.f32 %v307_v19, %v2652_v23 }
  0xbc   : > { %327 = vrot.lane.b32.xlu1 %v312_v21, %s2463_s30  ;;  %325 = vrot.lane.b32.xlu0 %v311_v22, %s2463_s30  ;;  %v3771_v22 = vlaneseq }
  0xbe   : > { %v352_v27 = vpop.permute.xlu0 %351  ;;  %v356_v30 = vpop.permute.xlu1 %355 }
  0xbf   : > { %v358_v28 = vmul.f32 %v352_v27, %v2633_v12  ;;  %v359_v29 = vmul.f32 %v352_v27, %v2630_v11  ;;  %v361_v31 = vmul.f32 %v356_v30, %v2640_v17  ;;  %v360_v32 = vmul.f32 %v352_v27, %v2643_v18 }
  0xc0   : > { %331 = vrot.lane.b32.xlu1 %v314_v25, %s2463_s30  ;;  %329 = vrot.lane.b32.xlu0 %v313_v26, %s2463_s30  ;;  %v362_v34 = vmul.f32 %v356_v30, %v2652_v23  ;;  %v363_v35 = vmul.f32 %v356_v30, %v2655_v24 }
  0xc3   : > { %v401_v33 = vpop.permute.xlu1 %400  ;;  %v405_v36 = vpop.permute.xlu0 %404 }
  0xc4   : > { %370 = vrot.lane.b32.xlu1 %v358_v28, %s2464_s16  ;;  %372 = vrot.lane.b32.xlu0 %v359_v29, %s2464_s16  ;;  %v407_v37 = vmul.f32 %v401_v33, %v2633_v12  ;;  %v409_v38 = vmul.f32 %v401_v33, %v2643_v18  ;;  %v411_v39 = vmul.f32 %v405_v36, %v2652_v23  ;;  %v2727_v28 = vshrl.u32 %v3771_v22, 7 }
  0xc5   : > { %v408_v41 = vmul.f32 %v401_v33, %v2630_v11  ;;  %v410_v44 = vmul.f32 %v405_v36, %v2640_v17  ;;  %v412_v48 = vmul.f32 %v405_v36, %v2655_v24 }
  0xc6   : > { %3842 = vst [vmem:[#allocation6_spill] sm:$0xff] %v2727_v28  ;;  %v696_v30 = vsub.s32 1, %v2727_v28 }
  0xc8   : > { %374 = vrot.lane.b32.xlu1 %v360_v32, %s2464_s16  ;;  %376 = vrot.lane.b32.xlu0 %v361_v31, %s2464_s16  ;;  %v450_v40 = vpop.permute.xlu0 %449  ;;  %v454_v42 = vpop.permute.xlu1 %453  ;;  %v270_v31 = vld [vmem:[%s3769_s5] sm:$0x3] }
  0xc9   : > { %v457_v43 = vmul.f32 %v450_v40, %v2643_v18  ;;  %v459_v45 = vmul.f32 %v454_v42, %v2655_v24  ;;  %v456_v51 = vmul.f32 %v450_v40, %v2630_v11  ;;  %v458_v54 = vmul.f32 %v454_v42, %v2652_v23 }
  0xca   : > { %v2759_v42 = vsub.s32 0, %v2727_v28 }
  0xcc   : > { %378 = vrot.lane.b32.xlu1 %v362_v34, %s2464_s16  ;;  %380 = vrot.lane.b32.xlu0 %v363_v35, %s2464_s16  ;;  %v2739_v34 = vrot.slane %v270_v31, %v696_v30  ;;  %v2471_v35 = vmov 0.0   ;;  %3844 = vst [vmem:[#allocation8_spill] sm:$0xff] %v2759_v42 }
  0xcd   : > { %v495_v46 = vpop.permute.xlu1 %494  ;;  %v499_v49 = vpop.permute.xlu0 %498  ;;  %712 = vst [vmem:[#allocation2] sm:$0xff] %v2471_v35  ;;  %713 = vst [vmem:[#allocation2 + $0x20] sm:$0xff] %v2471_v35 }
  0xce   : > { %v503_v50 = vmul.f32 %v495_v46, %v2689_v47  ;;  %v505_v52 = vmul.f32 %v499_v49, %v2655_v24  ;;  %v501_v57 = vmul.f32 %v495_v46, %v2630_v11  ;;  %v502_v59 = vmul.f32 %v495_v46, %v2643_v18  ;;  %3843 = vst [vmem:[#allocation7_spill] sm:$0xff] %v2739_v34 }
  0xcf   : > { %v504_v62 = vmul.f32 %v499_v49, %v2652_v23  ;;  %v506_v13 = vmul.f32 %v499_v49, %v492_v60  ;;  %715 = vst [vmem:[#allocation2 + $0x18] sm:$0xff] %v2471_v35  ;;  %716 = vst [vmem:[#allocation2 + $0x38] sm:$0xff] %v2471_v35 }
  0xd0   : > { %419 = vrot.lane.b32.xlu1 %v407_v37, %s2465_s20  ;;  %423 = vrot.lane.b32.xlu0 %v409_v38, %s2465_s20  ;;  %v2748_v37 = vld [vmem:[%s3766_s2] sm:$0xf] }
  0xd2   : > { %v544_v53 = vpop.permute.xlu0 %543  ;;  %v548_v56 = vpop.permute.xlu1 %547 }
  0xd3   : > { %v551_v55 = vmul.f32 %v544_v53, %v2643_v18  ;;  %v553_v58 = vmul.f32 %v548_v56, %v2652_v23  ;;  %v555_v63 = vmul.f32 %v548_v56, %v492_v60  ;;  %v550_v19 = vmul.f32 %v544_v53, %v2630_v11 }
  0xd4   : > { %421 = vrot.lane.b32.xlu1 %v408_v41, %s2465_s20  ;;  %427 = vrot.lane.b32.xlu0 %v411_v39, %s2465_s20  ;;  %v552_v26 = vmul.f32 %v544_v53, %v2689_v47  ;;  %v554_v29 = vmul.f32 %v548_v56, %v2655_v24 }
  0xd7   : > { %v593_v61 = vpop.permute.xlu1 %592  ;;  %v597_v2 = vpop.permute.xlu0 %596 }
  0xd8   : > { %425 = vrot.lane.b32.xlu1 %v410_v44, %s2465_s20  ;;  %466 = vrot.lane.b32.xlu0 %v457_v43, %s2466_s21  ;;  %v601_v3 = vmul.f32 %v593_v61, %v2689_v47  ;;  %v603_v15 = vmul.f32 %v597_v2, %v2655_v24  ;;  %v599_v32 = vmul.f32 %v593_v61, %v2630_v11 }
  0xd9   : > { %v600_v36 = vmul.f32 %v593_v61, %v2643_v18  ;;  %v602_v38 = vmul.f32 %v597_v2, %v2652_v23  ;;  %v604_v39 = vmul.f32 %v597_v2, %v492_v60  ;;  %v2765_v44 = vrot.slane %v270_v31, %v2759_v42  ;;  %v1034_v42 = vld [vmem:[#allocation2] sm:$0xf0] }
  0xdb   : > { %3845 = vst [vmem:[#allocation9_spill] sm:$0xff] %v2765_v44 }
  0xdc   : > { %429 = vrot.lane.b32.xlu1 %v412_v48, %s2465_s20  ;;  %470 = vrot.lane.b32.xlu0 %v459_v45, %s2466_s21  ;;  %v642_v16 = vpop.permute.xlu0 %641  ;;  %v646_v25 = vpop.permute.xlu1 %645 }
  0xdd   : > { %v649_v21 = vmul.f32 %v642_v16, %v2643_v18  ;;  %v651_v27 = vmul.f32 %v646_v25, %v2652_v23  ;;  %v653_v33 = vmul.f32 %v646_v25, %v492_v60  ;;  %v648_v40 = vmul.f32 %v642_v16, %v2630_v11 }
  0xde   : > { %v650_v41 = vmul.f32 %v642_v16, %v2689_v47  ;;  %v652_v43 = vmul.f32 %v646_v25, %v2655_v24 }
  0xe0   : > { %464 = vrot.lane.b32.xlu1 %v456_v51, %s2466_s21  ;;  %517 = vrot.lane.b32.xlu0 %v503_v50, %s2467_s27 }
  0xe4   : > { %468 = vrot.lane.b32.xlu1 %v458_v54, %s2466_s21  ;;  %521 = vrot.lane.b32.xlu0 %v505_v52, %s2467_s27 }
  0xe8   : > { %513 = vrot.lane.b32.xlu1 %v501_v57, %s2467_s27  ;;  %564 = vrot.lane.b32.xlu0 %v551_v55, %s2468_s28 }
  0xec   : > { %515 = vrot.lane.b32.xlu1 %v502_v59, %s2467_s27  ;;  %568 = vrot.lane.b32.xlu0 %v553_v58, %s2468_s28 }
  0xf0   : > { %519 = vrot.lane.b32.xlu1 %v504_v62, %s2467_s27  ;;  %572 = vrot.lane.b32.xlu0 %v555_v63, %s2468_s28 }
  0xf4   : > { %523 = vrot.lane.b32.xlu1 %v506_v13, %s2467_s27  ;;  %615 = vrot.lane.b32.xlu0 %v601_v3, %s2469_s7 }
  0xf8   : > { %562 = vrot.lane.b32.xlu1 %v550_v19, %s2468_s28  ;;  %619 = vrot.lane.b32.xlu0 %v603_v15, %s2469_s7 }
  0xfc   : > { %566 = vrot.lane.b32.xlu1 %v552_v26, %s2468_s28  ;;  %662 = vrot.lane.b32.xlu0 %v649_v21, %s2470_s8  ;;  %v2825_v26 = vld [vmem:[#allocation2] sm:$0xf] }
  0xfd   : > { %3849 = vst [vmem:[#allocation13_spill] sm:$0xff] %v2825_v26 }
 0x100   : > { %570 = vrot.lane.b32.xlu1 %v554_v29, %s2468_s28  ;;  %666 = vrot.lane.b32.xlu0 %v651_v27, %s2470_s8 }
 0x104   : > { %611 = vrot.lane.b32.xlu1 %v599_v32, %s2469_s7  ;;  %670 = vrot.lane.b32.xlu0 %v653_v33, %s2470_s8 }
 0x108   : > { %613 = vrot.lane.b32.xlu1 %v600_v36, %s2469_s7  ;;  %700 = vrot.lane.b32.xlu0 %v2739_v34, %s2466_s21  ;;  %v2888_v34 = vrot.slane %v1034_v42, 4  ;;  %v2907_v42 = vld [vmem:[%s3766_s2 + $0x4] sm:$0xf] }
 0x10c   : > { %617 = vrot.lane.b32.xlu1 %v602_v38, %s2469_s7  ;;  %765 = vperm.xlu0 %2276, %v2748_v37  }
 0x110   : > { %621 = vrot.lane.b32.xlu1 %v604_v39, %s2469_s7  ;;  %2280 = vset.pattern.permute.xlu0 %v3777_v7 }
 0x114   : > { %660 = vrot.lane.b32.xlu1 %v648_v40, %s2470_s8 }
 0x118   : > { %664 = vrot.lane.b32.xlu1 %v650_v41, %s2470_s8 }
 0x11c   : > { %668 = vrot.lane.b32.xlu1 %v652_v43, %s2470_s8 }
 0x120   : > { %698 = vrot.lane.b32.xlu1 %v2765_v44, %s2466_s21 }
 0x124   : > { %755 = vperm.xlu1 %2275, %v2748_v37  }
 0x128   : > { %2277 = vset.pattern.permute.xlu1 %v3774_v4 }
 0x12a   : > { %v2771_v45 = vpop.permute.xlu0 %321  ;;  %v2801_v60 = vpop.permute.xlu1 %323 }
 0x12e   : > { %v2773_v46 = vpop.permute.xlu0 %325  ;;  %v2805_v62 = vpop.permute.xlu1 %327 }
 0x132   : > { %v2775_v47 = vpop.permute.xlu0 %329  ;;  %v2809_v2 = vpop.permute.xlu1 %331 }
 0x136   : > { %v2777_v48 = vpop.permute.xlu0 %372  ;;  %v2813_v13 = vpop.permute.xlu1 %370 }
 0x13a   : > { %v2779_v49 = vpop.permute.xlu0 %376  ;;  %v2817_v16 = vpop.permute.xlu1 %374 }
 0x13e   : > { %v2781_v50 = vpop.permute.xlu0 %380  ;;  %v2821_v21 = vpop.permute.xlu1 %378 }
 0x142   : > { %v2783_v51 = vpop.permute.xlu0 %423  ;;  %v2827_v27 = vpop.permute.xlu1 %419 }
 0x146   : > { %v2785_v52 = vpop.permute.xlu0 %427  ;;  %v2834_v31 = vpop.permute.xlu1 %421 }
 0x14a   : > { %v2787_v53 = vpop.permute.xlu0 %466  ;;  %v2838_v32 = vpop.permute.xlu1 %425 }
 0x14e   : > { %v2789_v54 = vpop.permute.xlu0 %470  ;;  %v2843_v33 = vpop.permute.xlu1 %429 }
 0x152   : > { %v2791_v55 = vpop.permute.xlu0 %517  ;;  %v2847_v35 = vpop.permute.xlu1 %464 }
 0x156   : > { %v2793_v56 = vpop.permute.xlu0 %521  ;;  %v2851_v36 = vpop.permute.xlu1 %468 }
 0x157   : > { %3851 = vst [vmem:[#allocation15_spill] sm:$0xff] %v2851_v36 }
 0x15a   : > { %v2795_v57 = vpop.permute.xlu0 %564  ;;  %v2855_v38 = vpop.permute.xlu1 %513 }
 0x15e   : > { %v2797_v58 = vpop.permute.xlu0 %568  ;;  %v2858_v39 = vpop.permute.xlu1 %515 }
 0x15f   : > { %3846 = vst [vmem:[#allocation10_spill] sm:$0xff] %v2797_v58 }
 0x162   : > { %v2799_v59 = vpop.permute.xlu0 %572  ;;  %v2860_v40 = vpop.permute.xlu1 %519 }
 0x163   : > { %3852 = vst [vmem:[#allocation16_spill] sm:$0xff] %v2860_v40  ;;  %v857_v40 = vld [vmem:[#allocation2 + $0x18] sm:$0xf] }
 0x166   : > { %v2803_v61 = vpop.permute.xlu0 %615  ;;  %v2862_v41 = vpop.permute.xlu1 %523 }
 0x16a   : > { %v2807_v63 = vpop.permute.xlu0 %619  ;;  %v2864_v43 = vpop.permute.xlu1 %562 }
 0x16b   : > { %3853 = vst [vmem:[#allocation17_spill] sm:$0xff] %v2864_v43 }
 0x16e   : > { %v2811_v3 = vpop.permute.xlu0 %662 }
 0x172   : > { %v2815_v15 = vpop.permute.xlu0 %666 }
 0x173   : > { %3847 = vst [vmem:[#allocation11_spill] sm:$0xff] %v2815_v15 }
 0x176   : > { %v2819_v19 = vpop.permute.xlu0 %670 }
 0x17a   : > { %v2823_v25 = vpop.permute.xlu0 %700 }
 0x17b   : > { %3848 = vst [vmem:[#allocation12_spill] sm:$0xff] %v2823_v25 }
 0x18b   : > { %v2829_v29 = vpop.permute.xlu0 %765 }
 0x18c   : > { %3850 = vst [vmem:[#allocation14_spill] sm:$0xff] %v2829_v29  ;;  %v768_v30 = vmul.f32 %v2829_v29, %v2825_v26 }
 0x18e   : > { %774 = vrot.lane.b32.xlu1 %v768_v30, %s2463_s30  ;;  %v2866_v30 = vpop.permute.xlu1 %566 }
 0x192   : > { %789 = vperm.xlu1 %2277, %v2748_v37   ;;  %v2868_v22 = vpop.permute.xlu1 %570 }
 0x196   : > { %2278 = vset.pattern.permute.xlu1 %v3786_v5  ;;  %v2870_v1 = vpop.permute.xlu1 %611 }
 0x197   : > { %813 = vperm.xlu1 %2278, %v2748_v37   ;;  %3854 = vst [vmem:[#allocation18_spill] sm:$0xff] %v2870_v1 }
 0x19a   : > { %v2872_v4 = vpop.permute.xlu1 %613 }
 0x19b   : > { %2279 = vset.pattern.permute.xlu1 %v3784_v6 }
 0x19c   : > { %837 = vperm.xlu1 %2279, %v2748_v37  }
 0x1a0   : > { %2281 = vset.pattern.permute.xlu1 %v3782_v8 }
 0x1a1   : > { %883 = vperm.xlu1 %2281, %v2748_v37  }
 0x1a5   : > { %2282 = vset.pattern.permute.xlu1 %v3780_v9 }
 0x1a6   : > { %907 = vperm.xlu1 %2282, %v2748_v37  }
 0x1aa   : > { %2283 = vset.pattern.permute.xlu1 %v3775_v10  ;;  %v2874_v10 = vpop.permute.xlu1 %617 }
 0x1ab   : > { %931 = vperm.xlu1 %2283, %v2748_v37   ;;  %3855 = vst [vmem:[#allocation19_spill] sm:$0xff] %v2874_v10 }
 0x1ae   : > { %v2876_v7 = vpop.permute.xlu1 %621 }
 0x1af   : > { %2284 = vset.pattern.permute.xlu1 %v3779_v0 }
 0x1b0   : > { %1049 = vrot.lane.b32.xlu1 %v2888_v34, %s2472_s17 }
 0x1b2   : > { %v2878_v0 = vpop.permute.xlu1 %660 }
 0x1b3   : > { %3856 = vst [vmem:[#allocation20_spill] sm:$0xff] %v2878_v0 }
 0x1b4   : > { %1064 = vperm.xlu1 %2284, %v2907_v42  }
 0x1b6   : > { %v2880_v9 = vpop.permute.xlu1 %664 }
 0x1ba   : > { %v2882_v8 = vpop.permute.xlu1 %668 }
 0x1bb   : > { %3857 = vst [vmem:[#allocation21_spill] sm:$0xff] %v2882_v8  ;;  %v2955_v8 = vld [vmem:[#allocation2 + $0x20] sm:$0xf] }
 0x1bc   : > { %3877 = vst [vmem:[#allocation36_spill] sm:$0xff] %v2955_v8 }
 0x1be   : > { %v2884_v6 = vpop.permute.xlu1 %698 }
 0x1bf   : > { %3858 = vst [vmem:[#allocation22_spill] sm:$0xff] %v2884_v6 }
 0x1c2   : > { %v2886_v5 = vpop.permute.xlu1 %755 }
 0x1c3   : > { %3859 = vst [vmem:[#allocation23_spill] sm:$0xff] %v2886_v5 }
 0x200   : > { %v2890_v44 = vpop.permute.xlu1 %774 }
 0x201   : > { %3860 = vst [vmem:[#allocation24_spill] sm:$0xff] %v2890_v44  ;;  %v3863_v44 = vmov 3  }
 0x211   : > { %v2894_v28 = vpop.permute.xlu1 %789 }
 0x212   : > { %3861 = vst [vmem:[#allocation25_spill] sm:$0xff] %v2894_v28  ;;  %v792_v29 = vmul.f32 %v2894_v28, %v2825_v26 }
 0x214   : > { %798 = vrot.lane.b32.xlu0 %v792_v29, %s2464_s16  ;;  %v2914_v29 = vld [vmem:[%s3766_s2 + $0x8] sm:$0xf] }
 0x215   : > { %1275 = vperm.xlu1 %2284, %v2914_v29  }
 0x216   : > { %v2899_v15 = vpop.permute.xlu1 %813 }
 0x217   : > { %3862 = vst [vmem:[#allocation26_spill] sm:$0xff] %v2899_v15  ;;  %v816_v5 = vmul.f32 %v2899_v15, %v2825_v26  ;;  %v3865_v26 = vmov 6   ;;  %v3867_v15 = vmov 5  }
 0x219   : > { %822 = vrot.lane.b32.xlu0 %v816_v5, %s2465_s20  ;;  %2285 = vset.pattern.permute.xlu1 %v3863_v44  ;;  %v3864_v5 = vmov 4  }
 0x21a   : > { %1323 = vperm.xlu1 %2285, %v2914_v29  }
 0x21b   : > { %v2934_v28 = vpop.permute.xlu1 %837 }
 0x21c   : > { %3868 = vst [vmem:[#allocation27_spill] sm:$0xff] %v2934_v28 }
 0x21d   : > { %859 = vperm.xlu0 %2280, %v2748_v37   ;;  %v3866_v37 = vmov 7  }
 0x21e   : > { %2286 = vset.pattern.permute.xlu1 %v3864_v5 }
 0x21f   : > { %1347 = vperm.xlu1 %2286, %v2914_v29  }
 0x220   : > { %v2936_v6 = vpop.permute.xlu1 %883 }
 0x221   : > { %3869 = vst [vmem:[#allocation28_spill] sm:$0xff] %v2936_v6  ;;  %v888_v28 = vmul.f32 %v2936_v6, %v857_v40 }
 0x223   : > { %2287 = vset.pattern.permute.xlu1 %v3865_v26 }
 0x224   : > { %1393 = vperm.xlu1 %2287, %v2914_v29  }
 0x225   : > { %v2938_v10 = vpop.permute.xlu1 %907 }
 0x226   : > { %3870 = vst [vmem:[#allocation29_spill] sm:$0xff] %v2938_v10 }
 0x228   : > { %2288 = vset.pattern.permute.xlu1 %v3866_v37 }
 0x229   : > { %1417 = vperm.xlu1 %2288, %v2914_v29  }
 0x22a   : > { %v2942_v0 = vpop.permute.xlu1 %931 }
 0x22b   : > { %3872 = vst [vmem:[#allocation31_spill] sm:$0xff] %v2942_v0 }
 0x22d   : > { %2291 = vset.pattern.permute.xlu1 %v3863_v44 }
 0x22e   : > { %1086 = vrot.lane.b32.xlu1 %v2888_v34, %s2473_s14  ;;  %v2946_v1 = vpop.permute.xlu1 %1049 }
 0x22f   : > { %3874 = vst [vmem:[#allocation33_spill] sm:$0xff] %v2946_v1  ;;  %v912_v1 = vmul.f32 %v2938_v10, %v857_v40 }
 0x232   : > { %1102 = vperm.xlu1 %2291, %v2907_v42  }
 0x236   : > { %2292 = vset.pattern.permute.xlu1 %v3864_v5 }
 0x237   : > { %1121 = vperm.xlu1 %2292, %v2907_v42  }
 0x23b   : > { %2293 = vset.pattern.permute.xlu1 %v3867_v15 }
 0x23c   : > { %1134 = vperm.xlu1 %2293, %v2907_v42  }
 0x240   : > { %2294 = vset.pattern.permute.xlu1 %v3865_v26  ;;  %v2951_v26 = vpop.permute.xlu1 %1064 }
 0x241   : > { %3876 = vst [vmem:[#allocation35_spill] sm:$0xff] %v2951_v26  ;;  %v936_v26 = vmul.f32 %v2942_v0, %v857_v40 }
 0x286   : > { %v2940_v25 = vpop.permute.xlu0 %798 }
 0x287   : > { %3871 = vst [vmem:[#allocation30_spill] sm:$0xff] %v2940_v25 }
 0x28b   : > { %v2944_v58 = vpop.permute.xlu0 %822 }
 0x28c   : > { %3873 = vst [vmem:[#allocation32_spill] sm:$0xff] %v2944_v58 }
 0x294   : > { %v2957_v25 = vpop.permute.xlu1 %1275 }
 0x295   : > { %3878 = vst [vmem:[#allocation37_spill] sm:$0xff] %v2957_v25  ;;  %v1278_v58 = vmul.f32 %v2957_v25, %v2955_v8 }
 0x297   : > { %1284 = vrot.lane.b32.xlu1 %v1278_v58, %s2463_s30 }
 0x29c   : > { %v2948_v43 = vpop.permute.xlu0 %859 }
 0x29d   : > { %3875 = vst [vmem:[#allocation34_spill] sm:$0xff] %v2948_v43  ;;  %v864_v36 = vmul.f32 %v2948_v43, %v857_v40  ;;  %v2964_v43 = vpop.permute.xlu1 %1323 }
 0x29e   : > { %3879 = vst [vmem:[#allocation38_spill] sm:$0xff] %v2964_v43 }
 0x29f   : > { %872 = vrot.lane.b32.xlu0 %v864_v36, %s2467_s27  ;;  %v1326_v36 = vmul.f32 %v2964_v43, %v2955_v8 }
 0x2a1   : > { %1332 = vrot.lane.b32.xlu1 %v1326_v36, %s2465_s20  ;;  %v2972_v25 = vpop.permute.xlu1 %1347 }
 0x2a2   : > { %3880 = vst [vmem:[#allocation39_spill] sm:$0xff] %v2972_v25 }
 0x2a3   : > { %896 = vrot.lane.b32.xlu0 %v888_v28, %s2468_s28  ;;  %v1367_v28 = vld [vmem:[#allocation2 + $0x38] sm:$0xf] }
 0x2a5   : > { %v2976_v58 = vpop.permute.xlu1 %1393 }
 0x2a6   : > { %3881 = vst [vmem:[#allocation40_spill] sm:$0xff] %v2976_v58  ;;  %v1398_v43 = vmul.f32 %v2976_v58, %v1367_v28 }
 0x2a7   : > { %920 = vrot.lane.b32.xlu0 %v912_v1, %s2469_s7  ;;  %v3882_v1 = vmov 8  }
 0x2a8   : > { %1406 = vrot.lane.b32.xlu1 %v1398_v43, %s2468_s28 }
 0x2ab   : > { %944 = vrot.lane.b32.xlu0 %v936_v26, %s2470_s8  ;;  %v3883_v26 = vmov 2  }
 0x2af   : > { %1067 = vrot.lane.b32.xlu0 %v2888_v34, %s2474_s15 }
 0x2b3   : > { %1369 = vperm.xlu0 %2280, %v2914_v29  }
 0x2b7   : > { %2289 = vset.pattern.permute.xlu0 %v3882_v1 }
 0x2b8   : > { %1441 = vperm.xlu0 %2289, %v2914_v29  }
 0x2bc   : > { %2290 = vset.pattern.permute.xlu0 %v3883_v26 }
 0x2bd   : > { %1299 = vperm.xlu0 %2290, %v2914_v29  }
 0x2c1   : > { %1083 = vperm.xlu0 %2290, %v2907_v42  }
 0x2c5   : > { %1105 = vrot.lane.b32.xlu0 %v2888_v34, %s2475_s9 }
 0x311   : > { %v2988_v40 = vpop.permute.xlu0 %872 }
 0x312   : > { %3884 = vst [vmem:[#allocation41_spill] sm:$0xff] %v2988_v40  ;;  %v1537_v40 = vld [vmem:[#allocation2 + $0x20] sm:$0xf0] }
 0x315   : > { %v2990_v36 = vpop.permute.xlu0 %896 }
 0x316   : > { %3885 = vst [vmem:[#allocation42_spill] sm:$0xff] %v2990_v36  ;;  %v3891_v36 = vmov 1  }
 0x319   : > { %v2992_v58 = vpop.permute.xlu0 %920 }
 0x31a   : > { %3886 = vst [vmem:[#allocation43_spill] sm:$0xff] %v2992_v58 }
 0x31d   : > { %v2994_v43 = vpop.permute.xlu0 %944 }
 0x31e   : > { %3887 = vst [vmem:[#allocation44_spill] sm:$0xff] %v2994_v43  ;;  %v3015_v43 = vpop.permute.xlu1 %1417 }
 0x31f   : > { %3890 = vst [vmem:[#allocation47_spill] sm:$0xff] %v3015_v43 }
 0x321   : > { %v2996_v25 = vpop.permute.xlu0 %1067 }
 0x322   : > { %3888 = vst [vmem:[#allocation45_spill] sm:$0xff] %v2996_v25  ;;  %v3013_v25 = vld [vmem:[%s3766_s2 + $0xc] sm:$0xf] }
 0x332   : > { %v2998_v0 = vpop.permute.xlu0 %1369 }
 0x333   : > { %v1374_v58 = vmul.f32 %v2998_v0, %v1367_v28 }
 0x337   : > { %v3000_v26 = vpop.permute.xlu0 %1441 }
 0x338   : > { %3889 = vst [vmem:[#allocation46_spill] sm:$0xff] %v3000_v26  ;;  %v1446_v10 = vmul.f32 %v3000_v26, %v1367_v28 }
 0x33a   : > { %1454 = vrot.lane.b32.xlu1 %v1446_v10, %s2470_s8  ;;  %v1422_v10 = vmul.f32 %v3015_v43, %v1367_v28  ;;  %v291_v28 = vmul.f32 %v2635_v14, %v2643_v18  ;;  %v3035_v43 = vrot.slane %v1537_v40, 4 }
 0x33c   : > { %v3004_v6 = vpop.permute.xlu0 %1299 }
 0x33d   : > { %v1302_v34 = vmul.f32 %v3004_v6, %v2955_v8  ;;  %v1132_v8 = vld [vmem:[#allocation2 + $0x18] sm:$0xf0] }
 0x33e   : > { %1158 = vperm.xlu1 %2294, %v2907_v42   ;;  %v3026_v26 = vrot.slane %v1132_v8, 4  ;;  %v293_v8 = vmul.f32 %v2647_v20, %v2652_v23  ;;  %v383_v23 = vsel %vm382_vm1, %v2813_v13, %v2777_v48 }
 0x33f   : > { %1308 = vrot.lane.b32.xlu0 %v1302_v34, %s2464_s16  ;;  %v294_v34 = vmul.f32 %v2647_v20, %v2655_v24  ;;  %v292_v24 = vmul.f32 %v2647_v20, %v2640_v17  ;;  %v336_v17 = vsel %vm333_vm0, %v2805_v62, %v2775_v47  ;;  %v337_v20 = vsel %vm333_vm0, %v2775_v47, %v2809_v2 }
 0x340   : > { %v384_v47 = vsel %vm382_vm1, %v2777_v48, %v2817_v16  ;;  %v432_v48 = vsel %vm431_vm2, %v2827_v27, %v2834_v31  ;;  %v576_v27 = vsel %vm574_vm5, %v2795_v57, %v2866_v30  ;;  %v473_v30 = vsel %vm472_vm3, %v2847_v35, %v2787_v53 }
 0x341   : > { %v347_v40 = vadd.f32 %v336_v17, %v292_v24 }
 0x342   : > { %2295 = vset.pattern.permute.xlu1 %v3891_v36  ;;  %v290_v36 = vmul.f32 %v2635_v14, %v2630_v11  ;;  %v334_v11 = vsel %vm333_vm0, %v2771_v45, %v2801_v60 }
 0x343   : > { %1382 = vrot.lane.b32.xlu0 %v1374_v58, %s2467_s27  ;;  %1567 = vperm.xlu1 %2295, %v3013_v25   ;;  %v289_v58 = vmul.f32 %v2635_v14, %v2633_v12  ;;  %v335_v12 = vsel %vm333_vm0, %v2801_v60, %v2773_v46  ;;  %v346_v14 = vadd.f32 %v2773_v46, %v291_v28 }
 0x344   : > { %v345_v60 = vadd.f32 %v335_v12, %v290_v36  ;;  %v386_v36 = vsel %vm382_vm1, %v2821_v21, %v2781_v50  ;;  %v627_v12 = vsel %vm623_vm6, %v2807_v63, %v2876_v7  ;;  %v526_v7 = vsel %vm525_vm4, %v2855_v38, %v2858_v39 }
 0x345   : > { %v395_v45 = vadd.f32 %v2817_v16, %v346_v14  ;;  %v344_v46 = vadd.f32 %v334_v11, %v289_v58  ;;  %v625_v11 = vsel %vm623_vm6, %v2872_v4, %v2803_v61  ;;  %v435_v61 = vsel %vm431_vm2, %v2785_v52, %v2843_v33 }
 0x347   : > { %2296 = vset.pattern.permute.xlu1 %v3863_v44  ;;  %1430 = vrot.lane.b32.xlu0 %v1422_v10, %s2469_s7  ;;  %v349_v44 = vadd.f32 %v2809_v2, %v294_v34  ;;  %v385_v2 = vsel %vm382_vm1, %v2779_v49, %v2821_v21  ;;  %v444_v13 = vadd.f32 %v2783_v51, %v395_v45 }
 0x348   : > { %1603 = vperm.xlu1 %2296, %v3013_v25   ;;  %v348_v10 = vadd.f32 %v337_v20, %v293_v8  ;;  %v393_v34 = vadd.f32 %v383_v23, %v344_v46  ;;  %v433_v49 = vsel %vm431_vm2, %v2834_v31, %v2783_v51  ;;  %v394_v21 = vadd.f32 %v384_v47, %v345_v60 }
 0x349   : > { %v398_v18 = vadd.f32 %v2781_v50, %v349_v44  ;;  %v483_v16 = vadd.f32 %v2787_v53, %v444_v13  ;;  %v529_v50 = vsel %vm525_vm4, %v2793_v56, %v2862_v41  ;;  %v434_v51 = vsel %vm431_vm2, %v2838_v32, %v2785_v52  ;;  %v3893_v52 = vld [vmem:[#allocation15_spill] sm:$0xff] }
 0x34a   : > { %v397_v28 = vadd.f32 %v386_v36, %v348_v10  ;;  %v578_v41 = vsel %vm574_vm5, %v2868_v22, %v2799_v59  ;;  %v442_v24 = vadd.f32 %v432_v48, %v393_v34  ;;  %v443_v8 = vadd.f32 %v433_v49, %v394_v21  ;;  %v3900_v21 = vld [vmem:[#allocation12_spill] sm:$0xff] }
 0x34b   : > { %1147 = vrot.lane.b32.xlu0 %v3026_v26, %s2463_s30  ;;  %v447_v62 = vadd.f32 %v2843_v33, %v398_v18  ;;  %v674_v53 = vsel %vm672_vm7, %v2811_v3, %v2880_v9  ;;  %v3892_v18 = vld [vmem:[#allocation21_spill] sm:$0xff]  ;;  %v474_v33 = vsel %vm472_vm3, %v3893_v52, %v2789_v54  ;;  %v3896_v13 = vmov 6  }
 0x34c   : > { %1552 = vrot.lane.b32.xlu1 %v3035_v43, %s2472_s17  ;;  %v481_v17 = vadd.f32 %v2847_v35, %v442_v24  ;;  %v676_v20 = vsel %vm672_vm7, %v3892_v18, %v2819_v19  ;;  %v482_v23 = vadd.f32 %v473_v30, %v443_v8  ;;  %v446_v35 = vadd.f32 %v435_v61, %v397_v28  ;;  %v3903_v8 = vld [vmem:[#allocation11_spill] sm:$0xff] }
 0x34d   : > { %2297 = vset.pattern.permute.xlu1 %v3864_v5  ;;  %v527_v5 = vsel %vm525_vm4, %v2858_v39, %v2791_v55  ;;  %v396_v55 = vadd.f32 %v385_v2, %v347_v40  ;;  %v486_v58 = vadd.f32 %v2789_v54, %v447_v62  ;;  %v3894_v39 = vld [vmem:[#allocation17_spill] sm:$0xff]  ;;  %v3895_v40 = vld [vmem:[#allocation16_spill] sm:$0xff] }
 0x34e   : > { %v538_v31 = vadd.f32 %v527_v5, %v483_v16  ;;  %v536_v46 = vadd.f32 %v2855_v38, %v481_v17  ;;  %v575_v60 = vsel %vm574_vm5, %v3894_v39, %v2795_v57  ;;  %v537_v19 = vadd.f32 %v526_v7, %v482_v23  ;;  %v3897_v38 = vld [vmem:[#allocation18_spill] sm:$0xff]  ;;  %v3899_v16 = vld [vmem:[#allocation20_spill] sm:$0xff] }
 0x34f   : > { %1585 = vperm.xlu0 %2290, %v3013_v25   ;;  %v541_v44 = vadd.f32 %v529_v50, %v486_v58  ;;  %v445_v59 = vadd.f32 %v434_v51, %v396_v55  ;;  %v528_v47 = vsel %vm525_vm4, %v3895_v40, %v2793_v56  ;;  %v485_v10 = vadd.f32 %v474_v33, %v446_v35  ;;  %v3898_v5 = vld [vmem:[#allocation10_spill] sm:$0xff] }
 0x350   : > { %1621 = vperm.xlu1 %2297, %v3013_v25   ;;  %v587_v32 = vadd.f32 %v576_v27, %v538_v31  ;;  %v585_v34 = vadd.f32 %v3894_v39, %v536_v46  ;;  %v624_v36 = vsel %vm623_vm6, %v3897_v38, %v2872_v4  ;;  %v586_v57 = vadd.f32 %v575_v60, %v537_v19  ;;  %v3901_v27 = vld [vmem:[#allocation19_spill] sm:$0xff]  ;;  %v3902_v31 = vld [vmem:[#allocation22_spill] sm:$0xff] }
 0x351   : > { %v590_v14 = vadd.f32 %v578_v41, %v541_v44  ;;  %v484_v9 = vadd.f32 %v3893_v52, %v445_v59  ;;  %v577_v48 = vsel %vm574_vm5, %v3898_v5, %v2868_v22  ;;  %v540_v56 = vadd.f32 %v528_v47, %v485_v10 }
 0x352   : > { %v634_v49 = vadd.f32 %v3897_v38, %v585_v34  ;;  %v673_v50 = vsel %vm672_vm7, %v3899_v16, %v2811_v3  ;;  %v635_v4 = vadd.f32 %v624_v36, %v586_v57  ;;  %v626_v28 = vsel %vm623_vm6, %v3901_v27, %v2807_v63 }
 0x353   : > { %1570 = vrot.lane.b32.xlu0 %v3035_v43, %s2474_s15  ;;  %v639_v45 = vadd.f32 %v627_v12, %v590_v14  ;;  %v539_v54 = vadd.f32 %v3895_v40, %v484_v9  ;;  %v589_v51 = vadd.f32 %v577_v48, %v540_v56  ;;  %v702_v41 = vsel %vm472_vm3, %v3902_v31, %v3900_v21  ;;  %v3189_v14 = vpop.permute.xlu1 %1086 }
 0x354   : > { %2298 = vset.pattern.permute.xlu1 %v3867_v15  ;;  %2300 = vset.pattern.permute.xlu0 %v3866_v37  ;;  %v636_v15 = vadd.f32 %v625_v11, %v587_v32  ;;  %v684_v24 = vadd.f32 %v673_v50, %v635_v4  ;;  %v675_v44 = vsel %vm672_vm7, %v3903_v8, %v3892_v18 }
 0x355   : > { %1634 = vperm.xlu1 %2298, %v3013_v25   ;;  %v688_v2 = vadd.f32 %v676_v20, %v639_v45  ;;  %v588_v58 = vadd.f32 %v3898_v5, %v539_v54  ;;  %v638_v63 = vadd.f32 %v626_v28, %v589_v51  ;;  %v3906_v28 = vld [vmem:[#allocation25_spill] sm:$0xff] }
 0x356   : > { %v685_v62 = vadd.f32 %v674_v53, %v636_v15  ;;  %v707_v30 = vmul.f32 %v702_v41, %v684_v24 }
 0x357   : > { %1588 = vrot.lane.b32.xlu0 %v3035_v43, %s2473_s14  ;;  %v711_v22 = vmul.f32 %v3900_v21, %v688_v2  ;;  %v637_v3 = vadd.f32 %v3901_v27, %v588_v58  ;;  %v687_v32 = vadd.f32 %v675_v44, %v638_v63  ;;  %v3191_v53 = vpop.permute.xlu1 %1102 }
 0x358   : > { %v708_v55 = vmul.f32 %v3900_v21, %v685_v62 }
 0x359   : > { %2299 = vset.pattern.permute.xlu1 %v3896_v13  ;;  %v686_v12 = vadd.f32 %v3903_v8, %v637_v3  ;;  %v710_v59 = vmul.f32 %v702_v41, %v687_v32  ;;  %v3907_v8 = vld [vmem:[#allocation26_spill] sm:$0xff] }
 0x35a   : > { %1658 = vperm.xlu1 %2299, %v3013_v25  }
 0x35b   : > { %1606 = vrot.lane.b32.xlu0 %v3035_v43, %s2475_s9  ;;  %v683_v43 = vadd.f32 %v3899_v16, %v634_v49  ;;  %v709_v61 = vmul.f32 %v3902_v31, %v686_v12  ;;  %v3193_v17 = vpop.permute.xlu1 %1121 }
 0x35d   : > { %v706_v11 = vmul.f32 %v3902_v31, %v683_v43 }
 0x35e   : > { %728 = vrot.lane.b32.xlu1 %v708_v55, %s2472_s17  ;;  %v3905_v55 = vld [vmem:[#allocation14_spill] sm:$0xff] }
 0x35f   : > { %734 = vrot.lane.b32.xlu0 %v711_v22, %s2472_s17  ;;  %2302 = vset.pattern.permute.xlu1 %v3866_v37  ;;  %v3904_v37 = vmov 0   ;;  %v3195_v7 = vpop.permute.xlu1 %1134 }
 0x362   : > { %724 = vrot.lane.b32.xlu1 %v706_v11, %s2472_s17  ;;  %v3908_v11 = vld [vmem:[#allocation27_spill] sm:$0xff] }
 0x363   : > { %726 = vrot.lane.b32.xlu0 %v707_v30, %s2472_s17  ;;  %v3197_v15 = vpop.permute.xlu1 %1284 }
 0x366   : > { %732 = vrot.lane.b32.xlu1 %v710_v59, %s2472_s17  ;;  %v3909_v59 = vld [vmem:[#allocation28_spill] sm:$0xff] }
 0x367   : > { %730 = vrot.lane.b32.xlu0 %v709_v61, %s2472_s17  ;;  %v3201_v18 = vpop.permute.xlu1 %1332 }
 0x36a   : > { %1676 = vperm.xlu1 %2302, %v3013_v25  }
 0x36b   : > { %1177 = vperm.xlu0 %2300, %v2907_v42  }
 0x36e   : > { %2303 = vset.pattern.permute.xlu1 %v3882_v1  ;;  %v3199_v1 = vpop.permute.xlu0 %1083 }
 0x36f   : > { %2301 = vset.pattern.permute.xlu0 %v3904_v37  ;;  %1195 = vperm.xlu1 %2303, %v2907_v42  }
 0x370   : > { %1040 = vperm.xlu0 %2301, %v2907_v42   ;;  %v3205_v42 = vpop.permute.xlu1 %1406 }
 0x372   : > { %v3203_v20 = vpop.permute.xlu0 %1105 }
 0x374   : > { %1265 = vperm.xlu0 %2301, %v2914_v29  }
 0x378   : > { %1543 = vperm.xlu0 %2301, %v3013_v25  }
 0x3ac   : > { %v3209_v23 = vpop.permute.xlu1 %1454 }
 0x3b1   : > { %v3207_v29 = vpop.permute.xlu0 %1308 }
 0x3b5   : > { %v3213_v33 = vpop.permute.xlu0 %1382 }
 0x3b9   : > { %v3217_v45 = vpop.permute.xlu0 %1430 }
 0x3bd   : > { %v3211_v52 = vpop.permute.xlu1 %1158  ;;  %v3221_v46 = vpop.permute.xlu0 %1147 }
 0x3c2   : > { %v3215_v9 = vpop.permute.xlu1 %1567 }
 0x3c7   : > { %v3219_v35 = vpop.permute.xlu1 %1603 }
 0x3cb   : > { %v3223_v39 = vpop.permute.xlu1 %1552 }
 0x3ce   : > { %v3225_v60 = vpop.permute.xlu0 %1585 }
 0x3cf   : > { %v3227_v62 = vpop.permute.xlu1 %1621 }
 0x3d2   : > { %v3229_v19 = vpop.permute.xlu0 %1570 }
 0x3d4   : > { %v3231_v40 = vpop.permute.xlu1 %1634 }
 0x3d6   : > { %v3233_v47 = vpop.permute.xlu0 %1588 }
 0x3d9   : > { %v3235_v54 = vpop.permute.xlu1 %1658 }
 0x3da   : > { %v3237_v2 = vpop.permute.xlu0 %1606 }
 0x3dd   : > { %v729_v13 = vpop.permute.xlu1 %728 }
 0x3de   : > { %v735_v10 = vpop.permute.xlu0 %734 }
 0x3e1   : > { %v725_v34 = vpop.permute.xlu1 %724 }
 0x3e2   : > { %v727_v38 = vpop.permute.xlu0 %726 }
 0x3e3   : > { %v737_v36 = vsel %vm736_vm8, %v725_v34, %v727_v38  ;;  %v738_v57 = vsel %vm736_vm8, %v727_v38, %v729_v13  ;;  %v3910_v13 = vld [vmem:[#allocation34_spill] sm:$0xff]  ;;  %v3911_v38 = vld [vmem:[#allocation29_spill] sm:$0xff] }
 0x3e4   : > { %745 = vst [vmem:[#allocation2 + $0x8] sm:$0xff] %v737_v36  ;;  %746 = vst [vmem:[#allocation2 + $0x10] sm:$0xff] %v738_v57 }
 0x3e5   : > { %v733_v5 = vpop.permute.xlu1 %732 }
 0x3e6   : > { %v740_v48 = vsel %vm736_vm8, %v733_v5, %v735_v10  ;;  %v731_v56 = vpop.permute.xlu0 %730 }
 0x3e7   : > { %748 = vst [vmem:[#allocation2 + $0x30] sm:$0xff] %v740_v48  ;;  %v739_v49 = vsel %vm736_vm8, %v731_v56, %v733_v5  ;;  %v3912_v5 = vld [vmem:[#allocation31_spill] sm:$0xff] }
 0x3e8   : > { %747 = vst [vmem:[#allocation2 + $0x28] sm:$0xff] %v739_v49 }
 0x3ea   : > { %v3243_v16 = vpop.permute.xlu0 %1177 }
 0x3eb   : > { %v3245_v50 = vld [vmem:[#allocation2 + $0x10] sm:$0xf]  ;;  %v3247_v21 = vld [vmem:[#allocation2 + $0x8] sm:$0xf]  ;;  %v1036_v49 = vld [vmem:[#allocation2 + $0x10] sm:$0xf0] }
 0x3ec   : > { %v770_v4 = vmul.f32 %v3905_v55, %v3245_v50  ;;  %v769_v58 = vmul.f32 %v3905_v55, %v3247_v21  ;;  %v794_v22 = vmul.f32 %v3906_v28, %v3245_v50  ;;  %v793_v51 = vmul.f32 %v3906_v28, %v3247_v21  ;;  %v855_v12 = vld [vmem:[#allocation2 + $0x8] sm:$0xf]  ;;  %v856_v34 = vld [vmem:[#allocation2 + $0x10] sm:$0xf]  ;;  %v1035_v28 = vld [vmem:[#allocation2 + $0x8] sm:$0xf0] }
 0x3ed   : > { %v818_v44 = vmul.f32 %v3907_v8, %v3245_v50  ;;  %v817_v63 = vmul.f32 %v3907_v8, %v3247_v21  ;;  %v840_v30 = vmul.f32 %v3908_v11, %v3247_v21  ;;  %v841_v32 = vmul.f32 %v3908_v11, %v3245_v50 }
 0x3ee   : > { %778 = vrot.lane.b32.xlu0 %v770_v4, %s2463_s30  ;;  %776 = vrot.lane.b32.xlu1 %v769_v58, %s2463_s30  ;;  %v3265_v41 = vld [vmem:[#allocation2 + $0x30] sm:$0xf]  ;;  %v886_v61 = vmul.f32 %v3909_v59, %v855_v12  ;;  %v862_v10 = vmul.f32 %v3910_v13, %v855_v12  ;;  %v910_v36 = vmul.f32 %v3911_v38, %v855_v12  ;;  %v3298_v55 = vrot.slane %v1036_v49, 4 }
 0x3ef   : > { %v3255_v27 = vpop.permute.xlu0 %1040  ;;  %v1260_v31 = vld [vmem:[#allocation2 + $0x28] sm:$0xf]  ;;  %v863_v57 = vmul.f32 %v3910_v13, %v856_v34  ;;  %v934_v48 = vmul.f32 %v3912_v5, %v855_v12  ;;  %v887_v56 = vmul.f32 %v3909_v59, %v856_v34  ;;  %v911_v4 = vmul.f32 %v3911_v38, %v856_v34  ;;  %v1366_v13 = vld [vmem:[#allocation2 + $0x30] sm:$0xf] }
 0x3f0   : > { %v935_v58 = vmul.f32 %v3912_v5, %v856_v34  ;;  %v1365_v12 = vld [vmem:[#allocation2 + $0x28] sm:$0xf]  ;;  %v3916_v34 = vld [vmem:[#allocation40_spill] sm:$0xff]  ;;  %v1373_v49 = vmul.f32 %v2998_v0, %v1366_v13 }
 0x3f1   : > { %v1397_v38 = vmul.f32 %v3916_v34, %v1366_v13 }
 0x3f2   : > { %802 = vrot.lane.b32.xlu0 %v794_v22, %s2464_s16  ;;  %800 = vrot.lane.b32.xlu1 %v793_v51, %s2464_s16  ;;  %v3308_v22 = vrot.slane %v1035_v28, 4  ;;  %v3913_v51 = vld [vmem:[#allocation37_spill] sm:$0xff]  ;;  %v1396_v28 = vmul.f32 %v3916_v34, %v1365_v12 }
 0x3f3   : > { %v3263_v43 = vpop.permute.xlu0 %1265  ;;  %v1279_v8 = vmul.f32 %v3913_v51, %v1260_v31  ;;  %v1280_v59 = vmul.f32 %v3913_v51, %v3265_v41 }
 0x3f4   : > { %v3268_v3 = vmul.f32 %v3263_v43, %v1260_v31  ;;  %v3272_v24 = vmul.f32 %v3263_v43, %v3265_v41 }
 0x3f6   : > { %826 = vrot.lane.b32.xlu0 %v818_v44, %s2465_s20  ;;  %824 = vrot.lane.b32.xlu1 %v817_v63, %s2465_s20  ;;  %v1304_v44 = vmul.f32 %v3004_v6, %v3265_v41  ;;  %v3914_v63 = vld [vmem:[#allocation38_spill] sm:$0xff] }
 0x3f7   : > { %v1327_v11 = vmul.f32 %v3914_v63, %v1260_v31  ;;  %v3395_v34 = vpop.permute.xlu0 %1543 }
 0x3fa   : > { %844 = vrot.lane.b32.xlu0 %v840_v30, %s2466_s21  ;;  %846 = vrot.lane.b32.xlu1 %v841_v32, %s2466_s21  ;;  %v3915_v30 = vld [vmem:[#allocation39_spill] sm:$0xff] }
 0x3fb   : > { %v1350_v32 = vmul.f32 %v3915_v30, %v1260_v31 }
 0x3fe   : > { %892 = vrot.lane.b32.xlu0 %v886_v61, %s2468_s28  ;;  %868 = vrot.lane.b32.xlu1 %v862_v10, %s2467_s27  ;;  %v1372_v61 = vmul.f32 %v2998_v0, %v1365_v12  ;;  %v1303_v10 = vmul.f32 %v3004_v6, %v1260_v31  ;;  %v1130_v31 = vld [vmem:[#allocation2 + $0x8] sm:$0xf0] }
 0x402   : > { %916 = vrot.lane.b32.xlu0 %v910_v36, %s2469_s7  ;;  %870 = vrot.lane.b32.xlu1 %v863_v57, %s2467_s27  ;;  %v1328_v36 = vmul.f32 %v3914_v63, %v3265_v41  ;;  %v3917_v57 = vld [vmem:[#allocation47_spill] sm:$0xff]  ;;  %v1131_v63 = vld [vmem:[#allocation2 + $0x10] sm:$0xf0] }
 0x403   : > { %v1420_v5 = vmul.f32 %v3917_v57, %v1365_v12 }
 0x406   : > { %940 = vrot.lane.b32.xlu0 %v934_v48, %s2470_s8  ;;  %894 = vrot.lane.b32.xlu1 %v887_v56, %s2468_s28  ;;  %v1351_v48 = vmul.f32 %v3915_v30, %v3265_v41  ;;  %v3918_v56 = vld [vmem:[#allocation46_spill] sm:$0xff]  ;;  %v1539_v41 = vld [vmem:[#allocation2 + $0x30] sm:$0xf0]  ;;  %v1630_v30 = vld [vmem:[#allocation2 + $0x28] sm:$0xf0] }
 0x407   : > { %v1445_v6 = vmul.f32 %v3918_v56, %v1366_v13  ;;  %v1444_v0 = vmul.f32 %v3918_v56, %v1365_v12 }
 0x40a   : > { %1053 = vrot.lane.b32.xlu0 %v3298_v55, %s2472_s17  ;;  %918 = vrot.lane.b32.xlu1 %v911_v4, %s2469_s7  ;;  %v1140_v4 = vrot.slane %v1130_v31, 4  ;;  %v3923_v31 = vld [vmem:[#allocation23_spill] sm:$0xff] }
 0x40e   : > { %1090 = vrot.lane.b32.xlu0 %v3298_v55, %s2473_s14  ;;  %942 = vrot.lane.b32.xlu1 %v935_v58, %s2470_s8  ;;  %v1538_v58 = vld [vmem:[#allocation2 + $0x28] sm:$0xf0] }
 0x40f   : > { %v3354_v51 = vrot.slane %v1538_v58, 4  ;;  %v3924_v58 = vld [vmem:[#allocation30_spill] sm:$0xff] }
 0x412   : > { %1109 = vrot.lane.b32.xlu0 %v3298_v55, %s2475_s9  ;;  %1051 = vrot.lane.b32.xlu1 %v3308_v22, %s2472_s17 }
 0x416   : > { %1069 = vrot.lane.b32.xlu1 %v3308_v22, %s2474_s15  ;;  %1286 = vrot.lane.b32.xlu0 %v1279_v8, %s2463_s30  ;;  %v1421_v8 = vmul.f32 %v3917_v57, %v1366_v13  ;;  %v1631_v13 = vld [vmem:[#allocation2 + $0x30] sm:$0xf0] }
 0x41a   : > { %1071 = vrot.lane.b32.xlu1 %v3298_v55, %s2474_s15  ;;  %1312 = vrot.lane.b32.xlu0 %v1304_v44, %s2464_s16  ;;  %v3360_v44 = vrot.slane %v1539_v41, 4 }
 0x41e   : > { %1088 = vrot.lane.b32.xlu1 %v3308_v22, %s2473_s14  ;;  %1334 = vrot.lane.b32.xlu0 %v1327_v11, %s2465_s20  ;;  %v3369_v11 = vrot.slane %v1131_v63, 4  ;;  %v3925_v63 = vld [vmem:[#allocation32_spill] sm:$0xff] }
 0x422   : > { %1107 = vrot.lane.b32.xlu1 %v3308_v22, %s2475_s9  ;;  %1354 = vrot.lane.b32.xlu0 %v1350_v32, %s2466_s21  ;;  %v1632_v32 = vld [vmem:[#allocation2 + $0x38] sm:$0xf0] }
 0x423   : > { %v3381_v12 = vrot.slane %v1632_v32, 4 }
 0x426   : > { %1288 = vrot.lane.b32.xlu1 %v1280_v59, %s2463_s30  ;;  %1378 = vrot.lane.b32.xlu0 %v1372_v61, %s2467_s27  ;;  %v3375_v59 = vrot.slane %v1630_v30, 4  ;;  %v3389_v61 = vpop.permute.xlu1 %1676 }
 0x427   : > { %3919 = vst [vmem:[#allocation21_spill] sm:$0xff] %v3389_v61 }
 0x42a   : > { %1310 = vrot.lane.b32.xlu1 %v1303_v10, %s2464_s16  ;;  %1404 = vrot.lane.b32.xlu0 %v1397_v38, %s2468_s28  ;;  %s2476_s16 = smov 113   ;;  %v1641_v10 = vrot.slane %v1631_v13, 4  ;;  %v3397_v38 = vpop.permute.xlu1 %1195 }
 0x42b   : > { %3920 = vst [vmem:[#allocation15_spill] sm:$0xff] %v3397_v38 }
 0x42e   : > { %1336 = vrot.lane.b32.xlu1 %v1328_v36, %s2465_s20  ;;  %1426 = vrot.lane.b32.xlu0 %v1420_v5, %s2469_s7  ;;  %v3921_v5 = vld [vmem:[#allocation24_spill] sm:$0xff] }
 0x432   : > { %1356 = vrot.lane.b32.xlu1 %v1351_v48, %s2466_s21  ;;  %1452 = vrot.lane.b32.xlu0 %v1445_v6, %s2470_s8  ;;  %v3922_v6 = vld [vmem:[#allocation13_spill] sm:$0xff] }
 0x436   : > { %1380 = vrot.lane.b32.xlu1 %v1373_v49, %s2467_s27  ;;  %1143 = vrot.lane.b32.xlu0 %v1140_v4, %s2463_s30  ;;  %v758_v49 = vmul.f32 %v3923_v31, %v3922_v6 }
 0x43a   : > { %1402 = vrot.lane.b32.xlu1 %v1396_v28, %s2468_s28  ;;  %1554 = vrot.lane.b32.xlu0 %v3354_v51, %s2472_s17 }
 0x43e   : > { %1428 = vrot.lane.b32.xlu1 %v1421_v8, %s2469_s7  ;;  %1574 = vrot.lane.b32.xlu0 %v3360_v44, %s2474_s15 }
 0x442   : > { %1450 = vrot.lane.b32.xlu1 %v1444_v0, %s2470_s8  ;;  %1592 = vrot.lane.b32.xlu0 %v3360_v44, %s2473_s14 }
 0x446   : > { %1145 = vrot.lane.b32.xlu1 %v3369_v11, %s2463_s30  ;;  %1610 = vrot.lane.b32.xlu0 %v3360_v44, %s2475_s9 }
 0x44a   : > { %1556 = vrot.lane.b32.xlu1 %v3360_v44, %s2472_s17  ;;  %1643 = vrot.lane.b32.xlu0 %v3375_v59, %s2463_s30 }
 0x44e   : > { %1572 = vrot.lane.b32.xlu1 %v3354_v51, %s2474_s15  ;;  %1647 = vrot.lane.b32.xlu0 %v3381_v12, %s2463_s30 }
 0x452   : > { %1590 = vrot.lane.b32.xlu1 %v3354_v51, %s2473_s14  ;;  %1161 = vrot.lane.b32.xlu0 %v1140_v4, %s2476_s16 }
 0x456   : > { %1608 = vrot.lane.b32.xlu1 %v3354_v51, %s2475_s9  ;;  %1165 = vrot.lane.b32.xlu0 %v3026_v26, %s2476_s16 }
 0x45a   : > { %1694 = vperm.xlu1 %2303, %v3013_v25   ;;  %1663 = vrot.lane.b32.xlu0 %v1641_v10, %s2476_s16 }
 0x45e   : > { %1645 = vrot.lane.b32.xlu1 %v1641_v10, %s2463_s30  ;;  %1180 = vrot.lane.b32.xlu0 %v1140_v4, %s2465_s20 }
 0x45f   : > { %2304 = vset.pattern.permute.xlu1 %v3904_v37 }
 0x460   : > { %v779_v36 = vpop.permute.xlu0 %778  ;;  %v777_v57 = vpop.permute.xlu1 %776 }
 0x461   : > { %v780_v25 = vsel %vm333_vm0, %v3921_v5, %v777_v57 }
 0x462   : > { %1163 = vrot.lane.b32.xlu1 %v3369_v11, %s2476_s16  ;;  %1184 = vrot.lane.b32.xlu0 %v3026_v26, %s2465_s20  ;;  %v785_v37 = vadd.f32 %v780_v25, %v758_v49 }
 0x464   : > { %v803_v48 = vpop.permute.xlu0 %802  ;;  %v801_v56 = vpop.permute.xlu1 %800 }
 0x465   : > { %v804_v28 = vsel %vm382_vm1, %v3924_v58, %v801_v56  ;;  %v781_v58 = vsel %vm333_vm0, %v777_v57, %v779_v36 }
 0x466   : > { %1661 = vrot.lane.b32.xlu1 %v3375_v59, %s2476_s16  ;;  %1681 = vrot.lane.b32.xlu0 %v1641_v10, %s2465_s20  ;;  %v809_v0 = vadd.f32 %v804_v28, %v785_v37  ;;  %v760_v37 = vmul.f32 %v3923_v31, %v3245_v50 }
 0x468   : > { %v827_v41 = vpop.permute.xlu0 %826  ;;  %v825_v8 = vpop.permute.xlu1 %824  ;;  %v787_v57 = vadd.f32 %v779_v36, %v760_v37 }
 0x469   : > { %v828_v30 = vsel %vm431_vm2, %v3925_v63, %v825_v8  ;;  %v1840_v63 = vld [vmem:[%s3768_s4 + $0x5] sm:$0x1f]  ;;  %v829_v50 = vsel %vm431_vm2, %v825_v8, %v827_v41 }
 0x46a   : > { %1665 = vrot.lane.b32.xlu1 %v3381_v12, %s2476_s16  ;;  %1198 = vrot.lane.b32.xlu0 %v1140_v4, %s2466_s21  ;;  %v833_v32 = vadd.f32 %v828_v30, %v809_v0  ;;  %v759_v4 = vmul.f32 %v3923_v31, %v3247_v21  ;;  %v805_v0 = vsel %vm382_vm1, %v801_v56, %v803_v48  ;;  %v1760_v31 = vld [vmem:[%s3767_s3] sm:$0x1f] }
 0x46b   : > { %v811_v38 = vadd.f32 %v803_v48, %v787_v57  ;;  %v3926_v48 = vld [vmem:[#allocation41_spill] sm:$0xff] }
 0x46c   : > { %v845_v13 = vpop.permute.xlu0 %844  ;;  %v847_v5 = vpop.permute.xlu1 %846  ;;  %v786_v30 = vadd.f32 %v781_v58, %v759_v4 }
 0x46d   : > { %v852_v25 = vadd.f32 %v845_v13, %v833_v32 }
 0x46e   : > { %1182 = vrot.lane.b32.xlu1 %v3369_v11, %s2465_s20  ;;  %1202 = vrot.lane.b32.xlu0 %v3026_v26, %s2466_s21  ;;  %v810_v21 = vadd.f32 %v805_v0, %v786_v30 }
 0x470   : > { %v893_v6 = vpop.permute.xlu0 %892  ;;  %v869_v49 = vpop.permute.xlu1 %868  ;;  %v834_v36 = vadd.f32 %v829_v50, %v810_v21 }
 0x471   : > { %v879_v28 = vadd.f32 %v869_v49, %v852_v25 }
 0x472   : > { %1679 = vrot.lane.b32.xlu1 %v3375_v59, %s2465_s20  ;;  %1699 = vrot.lane.b32.xlu0 %v1641_v10, %s2466_s21  ;;  %v848_v10 = vsel %vm472_vm3, %v845_v13, %v847_v5 }
 0x473   : > { %v903_v26 = vadd.f32 %v893_v6, %v879_v28  ;;  %v835_v28 = vadd.f32 %v827_v41, %v811_v38  ;;  %v853_v57 = vadd.f32 %v848_v10, %v834_v36  ;;  %v3927_v41 = vld [vmem:[#allocation42_spill] sm:$0xff]  ;;  %v3928_v10 = vld [vmem:[#allocation43_spill] sm:$0xff] }
 0x474   : > { %v917_v32 = vpop.permute.xlu0 %916  ;;  %v871_v25 = vpop.permute.xlu1 %870 }
 0x475   : > { %v927_v56 = vadd.f32 %v917_v32, %v903_v26  ;;  %v874_v8 = vsel %vm525_vm4, %v869_v49, %v871_v25  ;;  %v875_v4 = vsel %vm525_vm4, %v871_v25, %v3926_v48 }
 0x476   : > { %1683 = vrot.lane.b32.xlu1 %v3381_v12, %s2465_s20  ;;  %1843 = vperm.xlu0 %2301, %v1840_v63   ;;  %v854_v63 = vadd.f32 %v847_v5, %v835_v28  ;;  %v880_v30 = vadd.f32 %v874_v8, %v853_v57 }
 0x478   : > { %v941_v58 = vpop.permute.xlu0 %940  ;;  %v895_v37 = vpop.permute.xlu1 %894  ;;  %v881_v50 = vadd.f32 %v875_v4, %v854_v63  ;;  %v3929_v4 = vld [vmem:[#allocation44_spill] sm:$0xff] }
 0x479   : > { %v951_v0 = vadd.f32 %v941_v58, %v927_v56  ;;  %v898_v38 = vsel %vm574_vm5, %v893_v6, %v895_v37  ;;  %v899_v26 = vsel %vm574_vm5, %v895_v37, %v3927_v41 }
 0x47a   : > { %1200 = vrot.lane.b32.xlu1 %v3369_v11, %s2466_s21  ;;  %1763 = vperm.xlu0 %2301, %v1760_v31   ;;  %v904_v11 = vadd.f32 %v898_v38, %v880_v30  ;;  %v905_v31 = vadd.f32 %v899_v26, %v881_v50 }
 0x47b   : > { %v955_v13 = vsel %vm954_vm9, %v951_v0, 0.0 }
 0x47c   : > { %v956_v49 = vrot.slane %v955_v13, 4  ;;  %v1054_v21 = vpop.permute.xlu0 %1053  ;;  %v919_v61 = vpop.permute.xlu1 %918 }
 0x47d   : > { %v922_v25 = vsel %vm623_vm6, %v917_v32, %v919_v61  ;;  %v923_v5 = vsel %vm623_vm6, %v919_v61, %v3928_v10  ;;  %v3930_v10 = vld [vmem:[#allocation33_spill] sm:$0xff] }
 0x47e   : > { %v957_v56 = vadd.f32 %v956_v49, %v955_v13  ;;  %1697 = vrot.lane.b32.xlu1 %v3375_v59, %s2466_s21  ;;  %v928_v28 = vadd.f32 %v922_v25, %v904_v11  ;;  %v929_v36 = vadd.f32 %v923_v5, %v905_v31  ;;  %v1829_v59 = vld [vmem:[%s3767_s3 + $0x5] sm:$0x1f] }
 0x480   : > { %v958_v6 = vrot.slane %v957_v56, 2  ;;  %v1091_v37 = vpop.permute.xlu0 %1090  ;;  %v943_v8 = vpop.permute.xlu1 %942 }
 0x481   : > { %v946_v48 = vsel %vm672_vm7, %v941_v58, %v943_v8  ;;  %v947_v32 = vsel %vm672_vm7, %v943_v8, %v3929_v4  ;;  %v3932_v4 = vld [vmem:[#allocation35_spill] sm:$0xff] }
 0x482   : > { %v959_v0 = vadd.f32 %v958_v6, %v957_v56  ;;  %v952_v61 = vadd.f32 %v946_v48, %v928_v28  ;;  %v953_v57 = vadd.f32 %v947_v32, %v929_v36  ;;  %1701 = vrot.lane.b32.xlu1 %v3381_v12, %s2466_s21  ;;  %v1932_v56 = vld [vmem:[%s3767_s3 + $0xa] sm:$0x1f]  ;;  %v3931_v36 = vld [vmem:[#allocation45_spill] sm:$0xff] }
 0x484   : > { %v960_v63 = vrot.slane %v959_v0, 1  ;;  %v963_v13 = vsel %vm962_vm10, %v952_v61, 0.0  ;;  %v971_v38 = vsel %vm970_vm11, %v953_v57, 0.0  ;;  %v1110_v41 = vpop.permute.xlu0 %1109  ;;  %v1052_v58 = vpop.permute.xlu1 %1051  ;;  %v2007_v57 = vld [vmem:[%s3767_s3 + $0xf] sm:$0x1f] }
 0x485   : > { %v964_v26 = vrot.slane %v963_v13, 4  ;;  %v972_v30 = vrot.slane %v971_v38, 4  ;;  %v1056_v50 = vsel %vm736_vm8, %v1052_v58, %v1054_v21  ;;  %v1055_v5 = vsel %vm736_vm8, %v3930_v10, %v1052_v58 }
 0x486   : > { %v961_v49 = vadd.f32 %v960_v63, %v959_v0  ;;  %1832 = vperm.xlu1 %2304, %v1829_v59   ;;  %v1059_v48 = vmul.f32 %v1055_v5, %v3255_v27 }
 0x487   : > { %v965_v25 = vadd.f32 %v964_v26, %v963_v13  ;;  %v973_v12 = vadd.f32 %v972_v30, %v971_v38  ;;  %v1060_v30 = vmul.f32 %v1056_v50, %v3255_v27 }
 0x488   : > { %v3470_v11 = vpop.permute.xlu0 %1286  ;;  %v1070_v31 = vpop.permute.xlu1 %1069  ;;  %v2181_v8 = vmul.f32 -1.442695, %v961_v49 }
 0x489   : > { %v966_v6 = vrot.slane %v965_v25, 2  ;;  %v974_v28 = vrot.slane %v973_v12, 2  ;;  %v1074_v21 = vsel %vm1073_vm12, %v3931_v36, %v1070_v31 }
 0x48a   : > { %v1078_v32 = vmul.f32 %v1074_v21, %v3932_v4  ;;  %1935 = vperm.xlu1 %2304, %v1932_v56   ;;  %2305 = vpow2.f32 %v2181_v8 }
 0x48b   : > { %v967_v0 = vadd.f32 %v966_v6, %v965_v25  ;;  %v975_v61 = vadd.f32 %v974_v28, %v973_v12 }
 0x48c   : > { %v1080_v59 = vadd.f32 %v1078_v32, %v1059_v48  ;;  %v3479_v63 = vpop.permute.xlu0 %1312  ;;  %v1072_v13 = vpop.permute.xlu1 %1071 }
 0x48d   : > { %v968_v38 = vrot.slane %v967_v0, 1  ;;  %v976_v58 = vrot.slane %v975_v61, 1  ;;  %v1075_v26 = vsel %vm1073_vm12, %v1070_v31, %v1072_v13 }
 0x48e   : > { %v1079_v49 = vmul.f32 %v1075_v26, %v3932_v4  ;;  %2010 = vperm.xlu1 %2304, %v2007_v57  }
 0x48f   : > { %v969_v25 = vadd.f32 %v968_v38, %v967_v0  ;;  %v977_v12 = vadd.f32 %v976_v58, %v975_v61 }
 0x490   : > { %v1081_v10 = vadd.f32 %v1079_v49, %v1060_v30  ;;  %v3484_v5 = vpop.permute.xlu0 %1334  ;;  %v1089_v56 = vpop.permute.xlu1 %1088 }
 0x491   : > { %v2182_v6 = vmul.f32 -1.442695, %v969_v25  ;;  %v2183_v28 = vmul.f32 -1.442695, %v977_v12  ;;  %v1093_v36 = vsel %vm1092_vm13, %v3189_v14, %v1089_v56  ;;  %v1094_v31 = vsel %vm1092_vm13, %v1089_v56, %v1091_v37  ;;  %v3933_v12 = vld [vmem:[#allocation36_spill] sm:$0xff] }
 0x492   : > { %v1097_v21 = vmul.f32 %v1093_v36, %v3199_v1  ;;  %v1098_v27 = vmul.f32 %v1094_v31, %v3199_v1  ;;  %v1126_v1 = vmul.f32 %v3193_v17, %v3308_v22  ;;  %v2477_v31 = vmov 1966171168  }
 0x493   : > { %2307 = vpow2.f32 %v2182_v6 }
 0x494   : > { %2309 = vpow2.f32 %v2183_v28  ;;  %v1099_v50 = vadd.f32 %v1097_v21, %v1080_v59  ;;  %v1355_v8 = vpop.permute.xlu0 %1354  ;;  %v1108_v48 = vpop.permute.xlu1 %1107  ;;  %v1100_v4 = vadd.f32 %v1098_v27, %v1081_v10  ;;  %v1127_v59 = vmul.f32 %v3193_v17, %v3298_v55 }
 0x495   : > { %v1112_v32 = vsel %vm1111_vm14, %v3203_v20, %v1108_v48  ;;  %v1113_v0 = vsel %vm1111_vm14, %v1108_v48, %v1110_v41  ;;  %v2306_v61 = vpop.eup %2305  ;;  %v1268_v10 = vmul.f32 %v3263_v43, %v3933_v12  ;;  %v1001_v21 = vunpack.c.l.s4 %v2477_v31 }
 0x496   : > { %v1116_v14 = vmul.f32 %v1112_v32, %v3191_v53  ;;  %v1117_v37 = vmul.f32 %v1113_v0, %v3191_v53  ;;  %v987_v41 = vadd.f32 1.0, %v2306_v61  ;;  %v1290_v53 = vsel %vm333_vm0, %v3197_v15, %v3470_v11 }
 0x497   : > { %v1295_v6 = vadd.f32 %v1290_v53, %v1268_v10  ;;  %v1338_v43 = vsel %vm431_vm2, %v3201_v18, %v3484_v5  ;;  %v3934_v18 = vld [vmem:[#allocation6_spill] sm:$0xff] }
 0x498   : > { %v1118_v57 = vadd.f32 %v1116_v14, %v1099_v50  ;;  %v1119_v13 = vadd.f32 %v1117_v37, %v1100_v4  ;;  %v1379_v38 = vpop.permute.xlu0 %1378  ;;  %v1289_v58 = vpop.permute.xlu1 %1288  ;;  %2311 = vrcp.f32 %v987_v41  ;;  %v1002_v4 = vunpack.c.0.s8 %v1001_v21 }
 0x499   : > { %v1297_v27 = vadd.f32 %v1289_v58, %v3272_v24 }
 0x49a   : > { %v3500_v26 = vadd.f32 %v1126_v1, %v1118_v57  ;;  %v3502_v20 = vadd.f32 %v1127_v59, %v1119_v13  ;;  %v3524_v1 = vsub.s32 %v1002_v4, %v3934_v18 }
 0x49b   : > { %v1321_v0 = vadd.f32 %v3479_v63, %v1297_v27 }
 0x49c   : > { %v1405_v30 = vpop.permute.xlu0 %1404  ;;  %v1311_v49 = vpop.permute.xlu1 %1310 }
 0x49d   : > { %v2308_v25 = vpop.eup %2307  ;;  %v1314_v17 = vsel %vm382_vm1, %v3207_v29, %v1311_v49  ;;  %v1291_v29 = vsel %vm333_vm0, %v3470_v11, %v1289_v58  ;;  %v1315_v14 = vsel %vm382_vm1, %v1311_v49, %v3479_v63  ;;  %vm1784_vm1 = vcmask 1044480  }
 0x49e   : > { %v2310_v56 = vpop.eup %2309  ;;  %v988_v22 = vadd.f32 1.0, %v2308_v25  ;;  %v1319_v15 = vadd.f32 %v1314_v17, %v1295_v6  ;;  %v1296_v37 = vadd.f32 %v1291_v29, %v3268_v3 }
 0x49f   : > { %v989_v55 = vadd.f32 1.0, %v2310_v56 }
 0x4a0   : > { %2313 = vrcp.f32 %v988_v22  ;;  %v1427_v28 = vpop.permute.xlu0 %1426  ;;  %v1337_v36 = vpop.permute.xlu1 %1336  ;;  %v1343_v32 = vadd.f32 %v1338_v43, %v1319_v15  ;;  %v1320_v53 = vadd.f32 %v1315_v14, %v1296_v37 }
 0x4a1   : > { %2315 = vrcp.f32 %v989_v55  ;;  %v1345_v61 = vadd.f32 %v1337_v36, %v1321_v0  ;;  %v1339_v59 = vsel %vm431_vm2, %v3484_v5, %v1337_v36  ;;  %v1409_v36 = vsel %vm574_vm5, %v1405_v30, %v3205_v42 }
 0x4a2   : > { %v2312_v13 = vpop.eup %2311  ;;  %v1362_v58 = vadd.f32 %v1355_v8, %v1343_v32  ;;  %v1344_v12 = vadd.f32 %v1339_v59, %v1320_v53  ;;  %v1768_v53 = vld [vmem:[%s3768_s4] sm:$0x1f] }
 0x4a4   : > { %v1453_v50 = vpop.permute.xlu0 %1452  ;;  %v1357_v48 = vpop.permute.xlu1 %1356  ;;  %v1389_v55 = vadd.f32 %v1379_v38, %v1362_v58 }
 0x4a5   : > { %v1364_v63 = vadd.f32 %v1357_v48, %v1345_v61  ;;  %v1358_v3 = vsel %vm472_vm3, %v1355_v8, %v1357_v48  ;;  %v1457_v42 = vsel %vm672_vm7, %v1453_v50, %v3209_v23 }
 0x4a6   : > { %v1363_v6 = vadd.f32 %v1358_v3, %v1344_v12 }
 0x4a8   : > { %v3521_v24 = vpop.permute.xlu0 %1143  ;;  %v1381_v57 = vpop.permute.xlu1 %1380 }
 0x4a9   : > { %v1385_v11 = vsel %vm525_vm4, %v1381_v57, %v3213_v33  ;;  %v1384_v17 = vsel %vm525_vm4, %v1379_v38, %v1381_v57  ;;  %v1941_v57 = vld [vmem:[%s3768_s4 + $0xa] sm:$0x1f]  ;;  %vm1918_vm4 = vcmask 1041408  }
 0x4aa   : > { %v2314_v41 = vpop.eup %2313  ;;  %v1391_v10 = vadd.f32 %v1385_v11, %v1364_v63  ;;  %v1390_v15 = vadd.f32 %v1384_v17, %v1363_v6 }
 0x4ab   : > { %v2316_v49 = vpop.eup %2315  ;;  %v999_v25 = vcombine.low %v2312_v13, %v2314_v41 }
 0x4ac   : > { %v3531_v56 = vpop.permute.xlu0 %1554  ;;  %v1403_v22 = vpop.permute.xlu1 %1402  ;;  %v1013_v33 = vrot.slane %v2316_v49, %v3524_v1  ;;  %v1415_v43 = vadd.f32 %v1409_v36, %v1391_v10 }
 0x4ad   : > { %v1006_v5 = vrot.slane %v999_v25, %v3524_v1  ;;  %v1408_v31 = vsel %vm574_vm5, %v1403_v22, %v1405_v30  ;;  %v1413_v8 = vadd.f32 %v1403_v22, %v1389_v55  ;;  %vm1994_vm5 = vcmask 1046530  }
 0x4ae   : > { %v1414_v32 = vadd.f32 %v1408_v31, %v1390_v15 }
 0x4af   : > { %v1014_v21 = vcombine.low %v1006_v5, %v1013_v33  ;;  %v1437_v30 = vadd.f32 %v1427_v28, %v1413_v8 }
 0x4b0   : > { %v3539_v27 = vpop.permute.xlu0 %1574  ;;  %v1429_v48 = vpop.permute.xlu1 %1428 }
 0x4b1   : > { %v1432_v4 = vsel %vm623_vm6, %v1427_v28, %v1429_v48  ;;  %v1433_v38 = vsel %vm623_vm6, %v1429_v48, %v3217_v45  ;;  %v1021_v29 = vrot.slane %v1014_v21, %v3524_v1  ;;  %vm2049_vm6 = vcmask 1040384  }
 0x4b2   : > { %v1439_v0 = vadd.f32 %v1433_v38, %v1415_v43  ;;  %v1438_v14 = vadd.f32 %v1432_v4, %v1414_v32 }
 0x4b3   : > { %1022 = vrot.lane.b32.xlu1 %v1021_v29, %s2472_s17 }
 0x4b4   : > { %v1463_v37 = vadd.f32 %v1457_v42, %v1439_v0  ;;  %v1451_v61 = vpop.permute.xlu1 %1450  ;;  %v3551_v13 = vpop.permute.xlu0 %1592 }
 0x4b5   : > { %v1456_v45 = vsel %vm672_vm7, %v1451_v61, %v1453_v50  ;;  %v1461_v18 = vadd.f32 %v1451_v61, %v1437_v30  ;;  %vm2090_vm7 = vcmask 1047559  }
 0x4b6   : > { %v1478_v59 = vsel %vm970_vm11, %v1463_v37, 0.0  ;;  %v1462_v11 = vadd.f32 %v1456_v45, %v1438_v14  ;;  %vm2001_vm11 = vcmask 22546  }
 0x4b7   : > { %v1479_v58 = vrot.slane %v1478_v59, 4  ;;  %v1464_v23 = vsel %vm954_vm9, %v1461_v18, 0.0  ;;  %1944 = vperm.xlu1 %2304, %v1941_v57   ;;  %vm1926_vm9 = vcmask 15373  }
 0x4b8   : > { %v1465_v28 = vrot.slane %v1464_v23, 4  ;;  %v1471_v41 = vsel %vm962_vm10, %v1462_v11, 0.0  ;;  %v3560_v12 = vpop.permute.xlu0 %1610  ;;  %v3562_v55 = vpop.permute.xlu1 %1145 }
 0x4b9   : > { %v1480_v63 = vadd.f32 %v1479_v58, %v1478_v59  ;;  %v1472_v49 = vrot.slane %v1471_v41, 4 }
 0x4ba   : > { %v1466_v3 = vadd.f32 %v1465_v28, %v1464_v23 }
 0x4bb   : > { %v1481_v25 = vrot.slane %v1480_v63, 2  ;;  %v1473_v50 = vadd.f32 %v1472_v49, %v1471_v41  ;;  %1771 = vperm.xlu1 %2304, %v1768_v53  }
 0x4bc   : > { %v1467_v10 = vrot.slane %v1466_v3, 2  ;;  %v3564_v21 = vpop.permute.xlu0 %1643  ;;  %v1557_v4 = vpop.permute.xlu1 %1556 }
 0x4bd   : > { %v1482_v22 = vadd.f32 %v1481_v25, %v1480_v63  ;;  %v1474_v17 = vrot.slane %v1473_v50, 2 }
 0x4be   : > { %v1468_v5 = vadd.f32 %v1467_v10, %v1466_v3 }
 0x4bf   : > { %v1483_v33 = vrot.slane %v1482_v22, 1  ;;  %v1475_v6 = vadd.f32 %v1474_v17, %v1473_v50 }
 0x4c0   : > { %v1469_v36 = vrot.slane %v1468_v5, 1  ;;  %v3566_v32 = vpop.permute.xlu0 %1647  ;;  %v1573_v0 = vpop.permute.xlu1 %1572 }
 0x4c1   : > { %v1484_v31 = vadd.f32 %v1483_v33, %v1482_v22  ;;  %v1476_v8 = vrot.slane %v1475_v6, 1 }
 0x4c2   : > { %v1470_v15 = vadd.f32 %v1469_v36, %v1468_v5  ;;  %v2018_v36 = vld [vmem:[%s3768_s4 + $0xf] sm:$0x1f] }
 0x4c3   : > { %v2188_v43 = vmul.f32 -1.442695, %v1484_v31  ;;  %v1477_v48 = vadd.f32 %v1476_v8, %v1475_v6  ;;  %v1576_v6 = vsel %vm1073_vm12, %v3229_v19, %v1573_v0  ;;  %v1558_v8 = vsel %vm736_vm8, %v3223_v39, %v3531_v56 }
 0x4c4   : > { %v2186_v38 = vmul.f32 -1.442695, %v1470_v15  ;;  %v1162_v42 = vpop.permute.xlu0 %1161  ;;  %v1591_v14 = vpop.permute.xlu1 %1590  ;;  %v1577_v39 = vsel %vm1073_vm12, %v1573_v0, %v3539_v27  ;;  %vm2105_vm12 = vcmask 27672  }
 0x4c5   : > { %2317 = vpow2.f32 %v2188_v43  ;;  %v2187_v29 = vmul.f32 -1.442695, %v1477_v48  ;;  %v1594_v15 = vsel %vm1092_vm13, %v3233_v47, %v1591_v14  ;;  %v1580_v43 = vmul.f32 %v1576_v6, %v3215_v9 }
 0x4c6   : > { %2319 = vpow2.f32 %v2186_v38  ;;  %v1562_v38 = vmul.f32 %v1558_v8, %v3395_v34  ;;  %v1581_v27 = vmul.f32 %v1577_v39, %v3215_v9 }
 0x4c7   : > { %2321 = vpow2.f32 %v2187_v29  ;;  %v1149_v29 = vsel %vm333_vm0, %v3521_v24, %v3562_v55 }
 0x4c8   : > { %v1166_v59 = vpop.permute.xlu0 %1165  ;;  %v1609_v11 = vpop.permute.xlu1 %1608  ;;  %v1153_v24 = vmul.f32 %v1149_v29, %v3195_v7 }
 0x4c9   : > { %v1612_v19 = vsel %vm1111_vm14, %v3237_v2, %v1609_v11  ;;  %v1582_v2 = vadd.f32 %v1580_v43, %v1562_v38 }
 0x4cc   : > { %v3568_v58 = vpop.permute.xlu0 %1663 }
 0x4cf   : > { %v2318_v30 = vpop.eup %2317 }
 0x4d0   : > { %v2320_v37 = vpop.eup %2319  ;;  %v1496_v61 = vadd.f32 1.0, %v2318_v30  ;;  %v1181_v49 = vpop.permute.xlu0 %1180  ;;  %v1598_v30 = vmul.f32 %v1594_v15, %v3225_v60  ;;  %v3935_v15 = vld [vmem:[#allocation21_spill] sm:$0xff] }
 0x4d1   : > { %v2322_v57 = vpop.eup %2321  ;;  %v1494_v45 = vadd.f32 1.0, %v2320_v37  ;;  %v1150_v37 = vsel %vm333_vm0, %v3562_v55, %v3221_v46  ;;  %v1613_v46 = vsel %vm1111_vm14, %v1609_v11, %v3560_v12 }
 0x4d2   : > { %2323 = vrcp.f32 %v1496_v61  ;;  %v1495_v18 = vadd.f32 1.0, %v2322_v57  ;;  %v1559_v61 = vsel %vm736_vm8, %v3531_v56, %v1557_v4  ;;  %v1595_v57 = vsel %vm1092_vm13, %v1591_v14, %v3551_v13 }
 0x4d3   : > { %2325 = vrcp.f32 %v1494_v45  ;;  %v1616_v45 = vmul.f32 %v1612_v19, %v3219_v35  ;;  %v1154_v0 = vmul.f32 %v1150_v37, %v3195_v7  ;;  %v1599_v4 = vmul.f32 %v1595_v57, %v3225_v60 }
 0x4d4   : > { %2327 = vrcp.f32 %v1495_v18  ;;  %v1185_v17 = vpop.permute.xlu0 %1184  ;;  %v1563_v18 = vmul.f32 %v1559_v61, %v3395_v34  ;;  %v1626_v7 = vmul.f32 %v3227_v62, %v3354_v51  ;;  %vm2103_vm13 = vcmask 31775  }
 0x4d5   : > { %v1156_v51 = vadd.f32 %v1154_v0, %v3502_v20 }
 0x4d6   : > { %v1583_v34 = vadd.f32 %v1581_v27, %v1563_v18 }
 0x4d8   : > { %v3587_v48 = vpop.permute.xlu0 %1681 }
 0x4d9   : > { %v3570_v23 = vpop.permute.xlu1 %1694 }
 0x4dc   : > { %v2324_v28 = vpop.eup %2323  ;;  %v1199_v56 = vpop.permute.xlu0 %1198 }
 0x4dd   : > { %v2326_v41 = vpop.eup %2325  ;;  %v1646_v53 = vpop.permute.xlu1 %1645  ;;  %v1520_v10 = vrot.slane %v2324_v28, %v3524_v1  ;;  %v1600_v28 = vadd.f32 %v1598_v30, %v1582_v2 }
 0x4de   : > { %v2328_v63 = vpop.eup %2327  ;;  %v1649_v13 = vsel %vm333_vm0, %v3564_v21, %v1646_v53 }
 0x4df   : > { %v1506_v3 = vcombine.low %v2326_v41, %v2328_v63  ;;  %v1618_v9 = vadd.f32 %v1616_v45, %v1600_v28  ;;  %v1617_v63 = vmul.f32 %v1613_v46, %v3219_v35  ;;  %v1653_v60 = vmul.f32 %v1649_v13, %v3231_v40 }
 0x4e0   : > { %v1650_v35 = vsel %vm333_vm0, %v1646_v53, %v3566_v32  ;;  %vm1871_vm0 = vcmask 1042432  }
 0x4e1   : > { %v1164_v25 = vpop.permute.xlu1 %1163  ;;  %v1513_v50 = vrot.slane %v1506_v3, %v3524_v1  ;;  %v1654_v20 = vmul.f32 %v1650_v35, %v3231_v40 }
 0x4e2   : > { %v1168_v14 = vsel %vm1167_vm15, %v1162_v42, %v1164_v25  ;;  %v1169_v41 = vsel %vm1167_vm15, %v1164_v25, %v1166_v59  ;;  %v1155_v25 = vadd.f32 %v1153_v24, %v3500_v26 }
 0x4e3   : > { %v1521_v22 = vcombine.low %v1513_v50, %v1520_v10  ;;  %v1172_v3 = vmul.f32 %v1168_v14, %v3211_v52  ;;  %v1173_v21 = vmul.f32 %v1169_v41, %v3211_v52  ;;  %v1601_v50 = vadd.f32 %v1599_v4, %v1583_v34  ;;  %v1203_v10 = vpop.permute.xlu0 %1202 }
 0x4e5   : > { %v1662_v5 = vpop.permute.xlu1 %1661  ;;  %v1528_v33 = vrot.slane %v1521_v22, %v3524_v1  ;;  %v1175_v32 = vadd.f32 %v1173_v21, %v1156_v51 }
 0x4e6   : > { %v1667_v42 = vsel %vm1167_vm15, %v1662_v5, %v3568_v58  ;;  %v1627_v5 = vmul.f32 %v3227_v62, %v3360_v44  ;;  %v3936_v62 = vld [vmem:[#allocation15_spill] sm:$0xff] }
 0x4e7   : > { %1529 = vrot.lane.b32.xlu0 %v1528_v33, %s2472_s17  ;;  %v1619_v33 = vadd.f32 %v1617_v63, %v1601_v50  ;;  %v1671_v26 = vmul.f32 %v1667_v42, %v3235_v54  ;;  %v1700_v37 = vpop.permute.xlu0 %1699  ;;  %s2180_s17 = sshll.u32 %s3948_s25, 3 }
 0x4e8   : > { %s269_s30 = scalar_lea.vmem %s3770_s6, %s2180_s17 }
 0x4e9   : > { %v1666_v31 = vpop.permute.xlu1 %1665  ;;  %v1629_v40 = vadd.f32 %v1627_v5, %v1619_v33  ;;  %v1828_v33 = vld [vmem:[#allocation2 + $0x30] sm:$0x3] }
 0x4ea   : > { %v1668_v8 = vsel %vm1167_vm15, %v3568_v58, %v1666_v31 }
 0x4eb   : > { %2021 = vperm.xlu0 %2301, %v2018_v36   ;;  %v1174_v36 = vadd.f32 %v1172_v3, %v1155_v25  ;;  %v1672_v58 = vmul.f32 %v1668_v8, %v3235_v54  ;;  %v1656_v57 = vadd.f32 %v1654_v20, %v1629_v40  ;;  %v1825_v25 = vld [vmem:[#allocation2 + $0x8] sm:$0xe0] }
 0x4ed   : > { %v1183_v47 = vpop.permute.xlu1 %1182 }
 0x4ee   : > { %v1186_v12 = vsel %vm431_vm2, %v1181_v49, %v1183_v47  ;;  %v1187_v11 = vsel %vm431_vm2, %v1183_v47, %v1185_v17  ;;  %v1628_v49 = vadd.f32 %v1626_v7, %v1618_v9 }
 0x4ef   : > { %v1190_v22 = vmul.f32 %v1186_v12, %v3243_v16  ;;  %v1191_v17 = vmul.f32 %v1187_v11, %v3243_v16 }
 0x4f0   : > { %v1655_v6 = vadd.f32 %v1653_v60, %v1628_v49  ;;  %v1826_v49 = vld [vmem:[#allocation2 + $0x10] sm:$0xe0] }
 0x4f1   : > { %v1680_v55 = vpop.permute.xlu1 %1679  ;;  %v1192_v38 = vadd.f32 %v1190_v22, %v1174_v36  ;;  %v1193_v29 = vadd.f32 %v1191_v17, %v1175_v32 }
 0x4f2   : > { %v1685_v52 = vsel %vm431_vm2, %v1680_v55, %v3587_v48  ;;  %v1673_v30 = vadd.f32 %v1671_v26, %v1655_v6 }
 0x4f3   : > { %v1689_v16 = vmul.f32 %v1685_v52, %v3935_v15 }
 0x4f5   : > { %v1684_v59 = vpop.permute.xlu1 %1683  ;;  %v1691_v45 = vadd.f32 %v1689_v16, %v1673_v30  ;;  %v1844_v34 = vpop.permute.xlu0 %1843 }
 0x4f6   : > { %v1686_v47 = vsel %vm431_vm2, %v3587_v48, %v1684_v59  ;;  %v1845_v50 = vrot.slane %v1844_v34, 3 }
 0x4f7   : > { %v1690_v27 = vmul.f32 %v1686_v47, %v3935_v15 }
 0x4f9   : > { %v1201_v53 = vpop.permute.xlu1 %1200 }
 0x4fa   : > { %v1204_v43 = vsel %vm472_vm3, %v1199_v56, %v1201_v53  ;;  %v1205_v19 = vsel %vm472_vm3, %v1201_v53, %v1203_v10  ;;  %v1674_v56 = vadd.f32 %v1672_v58, %v1656_v57  ;;  %v1827_v10 = vld [vmem:[#allocation2 + $0x28] sm:$0x3] }
 0x4fb   : > { %v1208_v44 = vmul.f32 %v1204_v43, %v3936_v62  ;;  %v1209_v39 = vmul.f32 %v1205_v19, %v3936_v62 }
 0x4fc   : > { %v1692_v41 = vadd.f32 %v1690_v27, %v1674_v56 }
 0x4fd   : > { %v1210_v31 = vadd.f32 %v1208_v44, %v1192_v38  ;;  %v1211_v61 = vadd.f32 %v1209_v39, %v1193_v29  ;;  %v1698_v2 = vpop.permute.xlu1 %1697 }
 0x4fe   : > { %v1703_v24 = vsel %vm472_vm3, %v1698_v2, %v1700_v37 }
 0x4ff   : > { %v1212_v0 = vsel %vm962_vm10, %v1210_v31, 0.0  ;;  %v1219_v18 = vsel %vm962_vm10, %v1211_v61, 0.0  ;;  %v1707_v28 = vmul.f32 %v1703_v24, %v3570_v23 }
 0x500   : > { %v1213_v46 = vrot.slane %v1212_v0, 4  ;;  %v1220_v48 = vrot.slane %v1219_v18, 4 }
 0x501   : > { %v1709_v55 = vadd.f32 %v1707_v28, %v1691_v45  ;;  %v1702_v54 = vpop.permute.xlu1 %1701 }
 0x502   : > { %v1214_v4 = vadd.f32 %v1213_v46, %v1212_v0  ;;  %v1221_v13 = vadd.f32 %v1220_v48, %v1219_v18  ;;  %v1704_v14 = vsel %vm472_vm3, %v1700_v37, %v1702_v54  ;;  %vm1912_vm3 = vcmask 1047557  }
 0x503   : > { %v1711_v9 = vsel %vm962_vm10, %v1709_v55, 0.0  ;;  %v1708_v7 = vmul.f32 %v1704_v14, %v3570_v23 }
 0x504   : > { %v1215_v63 = vrot.slane %v1214_v4, 2  ;;  %v1222_v12 = vrot.slane %v1221_v13, 2  ;;  %v1712_v11 = vrot.slane %v1711_v9, 4 }
 0x505   : > { %v1710_v60 = vadd.f32 %v1708_v7, %v1692_v41  ;;  %v1833_v3 = vpop.permute.xlu1 %1832 }
 0x506   : > { %v1216_v21 = vadd.f32 %v1215_v63, %v1214_v4  ;;  %v1223_v42 = vadd.f32 %v1222_v12, %v1221_v13  ;;  %v1713_v59 = vadd.f32 %v1712_v11, %v1711_v9  ;;  %v1834_v51 = vrot.slane %v1833_v3, 3 }
 0x507   : > { %v1718_v35 = vsel %vm962_vm10, %v1710_v60, 0.0 }
 0x508   : > { %v1217_v22 = vrot.slane %v1216_v21, 1  ;;  %v1224_v17 = vrot.slane %v1223_v42, 1  ;;  %v1714_v52 = vrot.slane %v1713_v59, 2  ;;  %v1719_v23 = vrot.slane %v1718_v35, 4 }
 0x509   : > { %v1836_v5 = vadd.f32 %v1834_v51, %v1825_v25  ;;  %v1837_v26 = vadd.f32 %v1834_v51, %v1826_v49  ;;  %v1838_v20 = vadd.f32 %v1834_v51, %v1827_v10  ;;  %v1839_v6 = vadd.f32 %v1834_v51, %v1828_v33  ;;  %v3658_v13 = vpop.permute.xlu1 %1935 }
 0x50a   : > { %v1218_v36 = vadd.f32 %v1217_v22, %v1216_v21  ;;  %v1225_v32 = vadd.f32 %v1224_v17, %v1223_v42  ;;  %v1715_v53 = vadd.f32 %v1714_v52, %v1713_v59  ;;  %v1720_v8 = vadd.f32 %v1719_v23, %v1718_v35 }
 0x50b   : > { %v1847_v15 = vmul.f32 %v1845_v50, %v1836_v5  ;;  %v1848_v16 = vmul.f32 %v1845_v50, %v1837_v26  ;;  %v1849_v43 = vmul.f32 %v1845_v50, %v1838_v20  ;;  %v1850_v19 = vmul.f32 %v1845_v50, %v1839_v6 }
 0x50c   : > { %v2184_v38 = vmul.f32 -1.442695, %v1218_v36  ;;  %v2185_v29 = vmul.f32 -1.442695, %v1225_v32  ;;  %v1716_v62 = vrot.slane %v1715_v53, 1  ;;  %v1721_v44 = vrot.slane %v1720_v8, 2 }
 0x50d   : > { %v1851_v39 = vmul.f32 %v1847_v15, %v1847_v15  ;;  %v1852_v40 = vmul.f32 %v1848_v16, %v1848_v16  ;;  %v1853_v30 = vmul.f32 %v1849_v43, %v1849_v43  ;;  %v1854_v47 = vmul.f32 %v1850_v19, %v1850_v19  ;;  %v3671_v42 = vpop.permute.xlu1 %2010 }
 0x50e   : > { %2329 = vpow2.f32 %v2184_v38  ;;  %v1717_v37 = vadd.f32 %v1716_v62, %v1715_v53  ;;  %v1722_v58 = vadd.f32 %v1721_v44, %v1720_v8  ;;  %v3937_v52 = vlaneseq }
 0x50f   : > { %2331 = vpow2.f32 %v2185_v29  ;;  %v1855_v31 = vsub.f32 0.0, %v1851_v39  ;;  %v1856_v61 = vsub.f32 0.0, %v1852_v40  ;;  %v1857_v2 = vsub.f32 0.0, %v1853_v30 }
 0x510   : > { %v2189_v57 = vmul.f32 -1.442695, %v1717_v37  ;;  %v1723_v45 = vrot.slane %v1722_v58, 1  ;;  %v1858_v24 = vsub.f32 0.0, %v1854_v47  ;;  %vm3677_vm2 = vcmp.lt.s32.totalorder %v3937_v52, 256 }
 0x511   : > { %v1859_v27 = vmul.f32 1.442695, %v1855_v31  ;;  %v1861_v0 = vmul.f32 1.442695, %v1856_v61  ;;  %v1863_v18 = vmul.f32 1.442695, %v1857_v2  ;;  %v1764_v61 = vpop.permute.xlu0 %1763 }
 0x512   : > { %2333 = vpow2.f32 %v2189_v57  ;;  %v1724_v28 = vadd.f32 %v1723_v45, %v1722_v58  ;;  %v1865_v46 = vmul.f32 1.442695, %v1858_v24  ;;  %v1937_v31 = vrot.slane %v3658_v13, 6  ;;  %v1930_v2 = vld [vmem:[#allocation2 + $0x28] sm:$0x7c] }
 0x513   : > { %2335 = vpow2.f32 %v1859_v27  ;;  %v1931_v57 = vld [vmem:[#allocation2 + $0x30] sm:$0x7c] }
 0x514   : > { %v2190_v48 = vmul.f32 -1.442695, %v1724_v28  ;;  %2337 = vpow2.f32 %v1861_v0  ;;  %v1939_v24 = vadd.f32 %v1937_v31, %v1930_v2  ;;  %v1940_v27 = vadd.f32 %v1937_v31, %v1931_v57  ;;  %v1759_v28 = vld [vmem:[#allocation2 + $0x10] sm:$0x1f] }
 0x515   : > { %2339 = vpow2.f32 %v1863_v18  ;;  %v1758_v18 = vld [vmem:[#allocation2 + $0x8] sm:$0x1f] }
 0x516   : > { %2341 = vpow2.f32 %v2190_v48  ;;  %v1767_v48 = vadd.f32 %v1764_v61, %v1759_v28 }
 0x517   : > { %2343 = vpow2.f32 %v1865_v46  ;;  %v1766_v46 = vadd.f32 %v1764_v61, %v1758_v18 }
 0x518   : > { %v2330_v56 = vpop.eup %2329 }
 0x519   : > { %v2332_v55 = vpop.eup %2331  ;;  %v1232_v54 = vadd.f32 1.0, %v2330_v56 }
 0x51a   : > { %v1233_v4 = vadd.f32 1.0, %v2332_v55 }
 0x51b   : > { %2345 = vrcp.f32 %v1232_v54 }
 0x51c   : > { %v2334_v14 = vpop.eup %2333  ;;  %2347 = vrcp.f32 %v1233_v4 }
 0x51d   : > { %v3660_v41 = vpop.eup %2335  ;;  %v1731_v7 = vadd.f32 1.0, %v2334_v14 }
 0x51e   : > { %v3662_v9 = vpop.eup %2337  ;;  %v1872_v34 = vrot.slane %v3660_v41, 5 }
 0x51f   : > { %v3665_v63 = vpop.eup %2339  ;;  %v1875_v60 = vrot.slane %v3662_v9, 5  ;;  %2349 = vrcp.f32 %v1731_v7 }
 0x520   : > { %v2342_v12 = vpop.eup %2341  ;;  %v1873_v11 = vrot.slane %v3665_v63, 5 }
 0x521   : > { %v3669_v3 = vpop.eup %2343  ;;  %v1732_v21 = vadd.f32 1.0, %v2342_v12 }
 0x522   : > { %v1874_v59 = vsel %vm1871_vm0, %v1872_v34, %v1873_v11  ;;  %v1876_v25 = vrot.slane %v3669_v3, 5 }
 0x523   : > { %2351 = vrcp.f32 %v1732_v21  ;;  %v1880_v51 = vsel %vm1784_vm1, %v1874_v59, 0.0  ;;  %v3940_v59 = vld [vmem:[#allocation9_spill] sm:$0xff] }
 0x524   : > { %v1877_v50 = vsel %vm1871_vm0, %v1875_v60, %v1876_v25  ;;  %v1881_v35 = vrot.slane %v1880_v51, 4 }
 0x525   : > { %v2346_v49 = vpop.eup %2345  ;;  %v1023_v10 = vpop.permute.xlu1 %1022  ;;  %v1887_v22 = vsel %vm1784_vm1, %v1877_v50, 0.0 }
 0x526   : > { %v2348_v17 = vpop.eup %2347  ;;  %v1024_v33 = vrot.slane %v1023_v10, 1  ;;  %v1882_v5 = vadd.f32 %v1881_v35, %v1880_v51  ;;  %v1888_v26 = vrot.slane %v1887_v22, 4 }
 0x527   : > { %v1240_v20 = vcombine.low %v2346_v49, %v2348_v17  ;;  %v3942_v17 = vld [vmem:[#allocation8_spill] sm:$0xff] }
 0x528   : > { %v1025_v6 = vsel %vm736_vm8, %v1023_v10, %v1024_v33  ;;  %v1883_v36 = vrot.slane %v1882_v5, 2  ;;  %v1889_v32 = vadd.f32 %v1888_v26, %v1887_v22  ;;  %v3941_v10 = vld [vmem:[#allocation7_spill] sm:$0xff] }
 0x529   : > { %v1247_v53 = vrot.slane %v1240_v20, %v3524_v1  ;;  %1032 = vst.msk [vmem:[#allocation2 + $0x48] ss:$8 sm:$0x3] %vm3677_vm2, %v1025_v6  ;;  %v2350_v43 = vpop.eup %2349 }
 0x52a   : > { %v1884_v8 = vadd.f32 %v1883_v36, %v1882_v5  ;;  %v1890_v15 = vrot.slane %v1889_v32, 2 }
 0x52b   : > { %v1254_v16 = vrot.slane %v1247_v53, %v3524_v1 }
 0x52c   : > { %v1885_v19 = vrot.slane %v1884_v8, 1  ;;  %v1891_v38 = vadd.f32 %v1890_v15, %v1889_v32 }
 0x52d   : > { %v2352_v29 = vpop.eup %2351  ;;  %1257 = vst.msk [vmem:[#allocation2 + $0x49] ss:$8 sm:$0x3] %vm3677_vm2, %v1254_v16 }
 0x52e   : > { %v1739_v62 = vcombine.low %v2350_v43, %v2352_v29  ;;  %v1886_v44 = vadd.f32 %v1885_v19, %v1884_v8  ;;  %v1892_v39 = vrot.slane %v1891_v38, 1 }
 0x530   : > { %v1746_v40 = vrot.slane %v1739_v62, %v3524_v1  ;;  %v1893_v30 = vadd.f32 %v1892_v39, %v1891_v38  ;;  %v1894_v47 = vadd.f32 1e-05, %v1886_v44 }
 0x532   : > { %v1753_v37 = vrot.slane %v1746_v40, %v3524_v1  ;;  %v1895_v58 = vadd.f32 1e-05, %v1893_v30  ;;  %2353 = vrcp.f32 %v1894_v47 }
 0x534   : > { %1756 = vst.msk [vmem:[#allocation2 + $0x4b] ss:$8 sm:$0x3] %vm3677_vm2, %v1753_v37  ;;  %2355 = vrcp.f32 %v1895_v58 }
 0x536   : > { %v1945_v45 = vpop.permute.xlu1 %1944 }
 0x537   : > { %v1946_v0 = vrot.slane %v1945_v45, 6 }
 0x539   : > { %v1948_v1 = vmul.f32 %v1946_v0, %v1939_v24  ;;  %v1949_v56 = vmul.f32 %v1946_v0, %v1940_v27 }
 0x53a   : > { %v1772_v55 = vpop.permute.xlu1 %1771 }
 0x53b   : > { %v1950_v54 = vmul.f32 %v1948_v1, %v1948_v1  ;;  %v1951_v4 = vmul.f32 %v1949_v56, %v1949_v56  ;;  %v1774_v13 = vmul.f32 %v1772_v55, %v1766_v46  ;;  %v1775_v14 = vmul.f32 %v1772_v55, %v1767_v48 }
 0x53c   : > { %v2354_v7 = vpop.eup %2353 }
 0x53d   : > { %v1952_v34 = vsub.f32 0.0, %v1950_v54  ;;  %v1953_v12 = vsub.f32 0.0, %v1951_v4  ;;  %v1776_v11 = vmul.f32 %v1774_v13, %v1774_v13  ;;  %v1777_v60 = vmul.f32 %v1775_v14, %v1775_v14 }
 0x53e   : > { %v2356_v21 = vpop.eup %2355  ;;  %v1898_v25 = vmul.f32 %v2354_v7, %v3940_v59 }
 0x53f   : > { %v1954_v51 = vmul.f32 1.442695, %v1952_v34  ;;  %v1956_v50 = vmul.f32 1.442695, %v1953_v12  ;;  %v1778_v35 = vsub.f32 0.0, %v1776_v11  ;;  %v1779_v49 = vsub.f32 0.0, %v1777_v60 }
 0x540   : > { %v1899_v22 = vmul.f32 %v2356_v21, %v3941_v10  ;;  %v1903_v52 = vrot.slane %v1898_v25, %v3942_v17 }
 0x541   : > { %2357 = vpow2.f32 %v1954_v51  ;;  %v1780_v33 = vmul.f32 1.442695, %v1778_v35  ;;  %v1782_v5 = vmul.f32 1.442695, %v1779_v49 }
 0x542   : > { %2359 = vpow2.f32 %v1956_v50  ;;  %v1907_v26 = vrot.slane %v1899_v22, %v3942_v17  ;;  %v1908_v20 = vmul.f32 %v3660_v41, %v1903_v52  ;;  %v1910_v6 = vmul.f32 %v3665_v63, %v1903_v52  ;;  %v2003_v52 = vld [vmem:[#allocation2 + $0x28] sm:$0x80] }
 0x543   : > { %2361 = vpow2.f32 %v1780_v33  ;;  %v2012_v50 = vrot.slane %v3671_v42, 1 }
 0x544   : > { %2363 = vpow2.f32 %v1782_v5  ;;  %v1909_v36 = vmul.f32 %v3662_v9, %v1907_v26  ;;  %v1913_v32 = vsel %vm1912_vm3, %v1908_v20, 0.0  ;;  %v1911_v53 = vmul.f32 %v3669_v3, %v1907_v26  ;;  %v2004_v20 = vld [vmem:[#allocation2 + $0x30] sm:$0x80] }
 0x545   : > { %v1919_v8 = vsel %vm1918_vm4, %v1910_v6, 0.0  ;;  %v2014_v6 = vadd.f32 %v2012_v50, %v2003_v52  ;;  %v2015_v23 = vadd.f32 %v2012_v50, %v2004_v20 }
 0x546   : > { %v1914_v15 = vsel %vm1912_vm3, %v1909_v36, 0.0  ;;  %v1920_v16 = vsel %vm1918_vm4, %v1911_v53, 0.0 }
 0x547   : > { %v1915_v43 = vadd.f32 %v1914_v15, %v1913_v32  ;;  %v3701_v19 = vadd.f32 %v1920_v16, %v1919_v8 }
 0x549   : > { %1916 = vadd.xlane.f32.xlu1 %v1915_v43 }
 0x54b   : > { %v3703_v38 = vpop.eup %2357 }
 0x54c   : > { %v3705_v29 = vpop.eup %2359  ;;  %v1960_v41 = vrot.slane %v3703_v38, 2 }
 0x54d   : > { %v3708_v63 = vpop.eup %2361  ;;  %v1961_v9 = vrot.slane %v3705_v29, 2 }
 0x54e   : > { %v3711_v62 = vpop.eup %2363  ;;  %v1964_v3 = vsel %vm1784_vm1, %v1960_v41, 0.0  ;;  %v1785_v44 = vsel %vm1784_vm1, %v3708_v63, 0.0 }
 0x54f   : > { %v1965_v39 = vrot.slane %v1964_v3, 4  ;;  %v1971_v40 = vsel %vm1784_vm1, %v1961_v9, 0.0  ;;  %v1786_v30 = vrot.slane %v1785_v44, 4  ;;  %v1792_v47 = vsel %vm1784_vm1, %v3711_v62, 0.0 }
 0x550   : > { %v1972_v37 = vrot.slane %v1971_v40, 4  ;;  %v1793_v58 = vrot.slane %v1792_v47, 4 }
 0x551   : > { %v1966_v31 = vadd.f32 %v1965_v39, %v1964_v3  ;;  %v1787_v61 = vadd.f32 %v1786_v30, %v1785_v44 }
 0x552   : > { %v1973_v2 = vadd.f32 %v1972_v37, %v1971_v40  ;;  %v1794_v57 = vadd.f32 %v1793_v58, %v1792_v47 }
 0x553   : > { %v1967_v45 = vrot.slane %v1966_v31, 2  ;;  %v1788_v24 = vrot.slane %v1787_v61, 2 }
 0x554   : > { %v1974_v27 = vrot.slane %v1973_v2, 2  ;;  %v1795_v0 = vrot.slane %v1794_v57, 2 }
 0x555   : > { %v1968_v18 = vadd.f32 %v1967_v45, %v1966_v31  ;;  %v1789_v28 = vadd.f32 %v1788_v24, %v1787_v61 }
 0x556   : > { %v1975_v46 = vadd.f32 %v1974_v27, %v1973_v2  ;;  %v1796_v48 = vadd.f32 %v1795_v0, %v1794_v57 }
 0x557   : > { %v1969_v1 = vrot.slane %v1968_v18, 1  ;;  %v1790_v56 = vrot.slane %v1789_v28, 1 }
 0x558   : > { %v1976_v55 = vrot.slane %v1975_v46, 1  ;;  %v1797_v54 = vrot.slane %v1796_v48, 1 }
 0x559   : > { %v1970_v4 = vadd.f32 %v1969_v1, %v1968_v18  ;;  %v1791_v13 = vadd.f32 %v1790_v56, %v1789_v28  ;;  %v1530_v14 = vpop.permute.xlu0 %1529 }
 0x55a   : > { %v1977_v7 = vadd.f32 %v1976_v55, %v1975_v46  ;;  %v1798_v34 = vadd.f32 %v1797_v54, %v1796_v48  ;;  %v1531_v12 = vrot.slane %v1530_v14, 1 }
 0x55b   : > { %v1799_v11 = vadd.f32 1e-05, %v1791_v13  ;;  %v1978_v60 = vadd.f32 1e-05, %v1970_v4 }
 0x55c   : > { %v1800_v21 = vadd.f32 1e-05, %v1798_v34  ;;  %v1532_v25 = vsel %vm736_vm8, %v1530_v14, %v1531_v12  ;;  %v1979_v51 = vadd.f32 1e-05, %v1977_v7  ;;  %vm1823_vm8 = vcmask 4096  }
 0x55d   : > { %2365 = vrcp.f32 %v1799_v11  ;;  %1535 = vst.msk [vmem:[#allocation2 + $0x4a] ss:$8 sm:$0x3] %vm3677_vm2, %v1532_v25 }
 0x55e   : > { %2367 = vrcp.f32 %v1800_v21 }
 0x55f   : > { %2369 = vrcp.f32 %v1978_v60 }
 0x560   : > { %2371 = vrcp.f32 %v1979_v51 }
 0x564   : > { %v2005_v49 = vld [vmem:[#allocation2 + $0x48] sm:$0xf]  ;;  %v2006_v33 = vld [vmem:[#allocation2 + $0x50] sm:$0xf] }
 0x565   : > { %v2016_v8 = vadd.f32 %v2012_v50, %v2005_v49  ;;  %v2017_v16 = vadd.f32 %v2012_v50, %v2006_v33 }
 0x567   : > { %v2366_v35 = vpop.eup %2365 }
 0x568   : > { %v2368_v22 = vpop.eup %2367  ;;  %v1805_v5 = vmul.f32 %v2366_v35, %v3940_v59 }
 0x569   : > { %v2370_v26 = vpop.eup %2369  ;;  %v1806_v36 = vmul.f32 %v2368_v22, %v3941_v10 }
 0x56a   : > { %v2372_v32 = vpop.eup %2371  ;;  %v2022_v53 = vpop.permute.xlu0 %2021  ;;  %v1810_v15 = vrot.slane %v1805_v5, %v3942_v17  ;;  %v1982_v42 = vmul.f32 %v2370_v26, %v3940_v59 }
 0x56b   : > { %v2023_v43 = vrot.slane %v2022_v53, 1  ;;  %v1814_v41 = vrot.slane %v1806_v36, %v3942_v17  ;;  %v1983_v9 = vmul.f32 %v2372_v32, %v3941_v10 }
 0x56c   : > { %v1815_v3 = vmul.f32 %v3708_v63, %v1810_v15  ;;  %v1987_v58 = vrot.slane %v1982_v42, %v3942_v17 }
 0x56d   : > { %v2025_v44 = vmul.f32 %v2023_v43, %v2014_v6  ;;  %v2026_v39 = vmul.f32 %v2023_v43, %v2015_v23  ;;  %v2027_v40 = vmul.f32 %v2023_v43, %v2016_v8  ;;  %v2028_v30 = vmul.f32 %v2023_v43, %v2017_v16 }
 0x56e   : > { %v1816_v47 = vmul.f32 %v3711_v62, %v1814_v41  ;;  %v1817_v37 = vsel %vm1784_vm1, %v1815_v3, 0.0  ;;  %v1991_v31 = vrot.slane %v1983_v9, %v3942_v17  ;;  %v1992_v46 = vmul.f32 %v3703_v38, %v1987_v58 }
 0x56f   : > { %v2029_v61 = vmul.f32 %v2025_v44, %v2025_v44  ;;  %v2030_v2 = vmul.f32 %v2026_v39, %v2026_v39  ;;  %v2031_v57 = vmul.f32 %v2027_v40, %v2027_v40  ;;  %v2032_v45 = vmul.f32 %v2028_v30, %v2028_v30 }
 0x570   : > { %v1818_v24 = vsel %vm1784_vm1, %v1816_v47, 0.0  ;;  %v1993_v56 = vmul.f32 %v3705_v29, %v1991_v31  ;;  %v1995_v54 = vsel %vm1994_vm5, %v1992_v46, 0.0 }
 0x571   : > { %v2033_v27 = vsub.f32 0.0, %v2029_v61  ;;  %v2034_v63 = vsub.f32 0.0, %v2030_v2  ;;  %v2035_v0 = vsub.f32 0.0, %v2031_v57  ;;  %v2036_v18 = vsub.f32 0.0, %v2032_v45 }
 0x572   : > { %v1819_v28 = vadd.f32 %v1818_v24, %v1817_v37  ;;  %v1996_v4 = vsel %vm1994_vm5, %v1993_v56, 0.0 }
 0x573   : > { %v2037_v62 = vmul.f32 1.442695, %v2033_v27  ;;  %v2039_v48 = vmul.f32 1.442695, %v2034_v63  ;;  %v2041_v1 = vmul.f32 1.442695, %v2035_v0  ;;  %v1997_v13 = vadd.f32 %v1996_v4, %v1995_v54 }
 0x574   : > { %v2043_v55 = vmul.f32 1.442695, %v2036_v18  ;;  %1820 = vadd.xlane.f32.xlu0 %v1819_v28 }
 0x575   : > { %2373 = vpow2.f32 %v2037_v62 }
 0x576   : > { %2375 = vpow2.f32 %v2039_v48 }
 0x577   : > { %2377 = vpow2.f32 %v2041_v1 }
 0x578   : > { %2379 = vpow2.f32 %v2043_v55  ;;  %1922 = vadd.xlane.f32.xlu0 %v3701_v19 }
 0x57c   : > { %1998 = vadd.xlane.f32.xlu0 %v1997_v13 }
 0x57f   : > { %v2374_v14 = vpop.eup %2373 }
 0x580   : > { %v2376_v38 = vpop.eup %2375  ;;  %v2050_v7 = vrot.slane %v2374_v14, 7 }
 0x581   : > { %v2378_v34 = vpop.eup %2377  ;;  %v2053_v12 = vrot.slane %v2376_v38, 7 }
 0x582   : > { %v2380_v29 = vpop.eup %2379  ;;  %v2051_v11 = vrot.slane %v2378_v34, 7 }
 0x583   : > { %v2054_v60 = vrot.slane %v2380_v29, 7 }
 0x584   : > { %v2052_v21 = vsel %vm2049_vm6, %v2050_v7, %v2051_v11 }
 0x585   : > { %v2055_v25 = vsel %vm2049_vm6, %v2053_v12, %v2054_v60  ;;  %v2058_v51 = vsel %vm1784_vm1, %v2052_v21, 0.0 }
 0x586   : > { %v2059_v50 = vrot.slane %v2058_v51, 4  ;;  %v2065_v35 = vsel %vm1784_vm1, %v2055_v25, 0.0 }
 0x587   : > { %v2066_v49 = vrot.slane %v2065_v35, 4 }
 0x588   : > { %v2060_v19 = vadd.f32 %v2059_v50, %v2058_v51 }
 0x589   : > { %v2067_v22 = vadd.f32 %v2066_v49, %v2065_v35 }
 0x58a   : > { %v2061_v52 = vrot.slane %v2060_v19, 2 }
 0x58b   : > { %v2068_v33 = vrot.slane %v2067_v22, 2 }
 0x58c   : > { %v2062_v5 = vadd.f32 %v2061_v52, %v2060_v19 }
 0x58d   : > { %v2069_v26 = vadd.f32 %v2068_v33, %v2067_v22 }
 0x58e   : > { %v2063_v20 = vrot.slane %v2062_v5, 1 }
 0x58f   : > { %v2070_v6 = vrot.slane %v2069_v26, 1 }
 0x590   : > { %v2064_v36 = vadd.f32 %v2063_v20, %v2062_v5 }
 0x591   : > { %v2071_v32 = vadd.f32 %v2070_v6, %v2069_v26 }
 0x592   : > { %v2072_v23 = vadd.f32 1e-05, %v2064_v36 }
 0x593   : > { %v2073_v53 = vadd.f32 1e-05, %v2071_v32 }
 0x594   : > { %2381 = vrcp.f32 %v2072_v23 }
 0x595   : > { %2383 = vrcp.f32 %v2073_v53 }
 0x59e   : > { %v2382_v8 = vpop.eup %2381 }
 0x59f   : > { %v2384_v15 = vpop.eup %2383  ;;  %v2076_v42 = vmul.f32 %v2382_v8, %v3940_v59 }
 0x5a0   : > { %v2077_v16 = vmul.f32 %v2384_v15, %v3941_v10 }
 0x5a1   : > { %v2081_v43 = vrot.slane %v2076_v42, %v3942_v17 }
 0x5a2   : > { %v2085_v41 = vrot.slane %v2077_v16, %v3942_v17 }
 0x5a3   : > { %v2086_v9 = vmul.f32 %v2374_v14, %v2081_v43  ;;  %v2088_v3 = vmul.f32 %v2378_v34, %v2081_v43 }
 0x5a4   : > { %v2087_v44 = vmul.f32 %v2376_v38, %v2085_v41  ;;  %v2089_v39 = vmul.f32 %v2380_v29, %v2085_v41 }
 0x5a5   : > { %v2091_v40 = vsel %vm2090_vm7, %v2086_v9, 0.0  ;;  %v2096_v30 = vsel %vm962_vm10, %v2088_v3, 0.0 }
 0x5a6   : > { %v2092_v47 = vsel %vm2090_vm7, %v2087_v44, 0.0  ;;  %v2097_v37 = vsel %vm962_vm10, %v2089_v39, 0.0  ;;  %vm1928_vm10 = vcmask 9224  }
 0x5a7   : > { %v2093_v59 = vadd.f32 %v2092_v47, %v2091_v40  ;;  %v2098_v58 = vadd.f32 %v2097_v37, %v2096_v30 }
 0x5a9   : > { %2094 = vadd.xlane.f32.xlu1 %v2093_v59  ;;  %2099 = vadd.xlane.f32.xlu0 %v2098_v58 }
 0x5d6   : > { %v1917_v10 = vpop.xlane.xlu1 %1916 }
 0x5d7   : > { %v1924_v61 = vmul.f32 0.0051020407, %v1917_v10 }
 0x601   : > { %v1821_v17 = vpop.xlane.xlu0 %1820 }
 0x602   : > { %v1822_v31 = vmul.f32 0.0051020407, %v1821_v17 }
 0x604   : > { %1824 = vst.msk [vmem:[%s269_s30] sm:$0x1f] %vm1823_vm8, %v1822_v31 }
 0x605   : > { %1927 = vst.msk [vmem:[%s269_s30 - $0x5] sm:$0xe0] %vm1926_vm9, %v1924_v61  ;;  %v1923_v2 = vpop.xlane.xlu0 %1922 }
 0x606   : > { %v1925_v57 = vmul.f32 0.0051020407, %v1923_v2 }
 0x608   : > { %1929 = vst.msk [vmem:[%s269_s30 + $0x3] sm:$0x3] %vm1928_vm10, %v1925_v57 }
 0x609   : > { %v1999_v45 = vpop.xlane.xlu0 %1998 }
 0x60a   : > { %v2000_v24 = vmul.f32 0.0051020407, %v1999_v45 }
 0x60c   : > { %2002 = vst.msk [vmem:[%s269_s30 - $0x2] sm:$0x7c] %vm2001_vm11, %v2000_v24 }
 0x636   : > { %v2100_v27 = vpop.xlane.xlu0 %2099  ;;  %v2095_v63 = vpop.xlane.xlu1 %2094 }
 0x637   : > { %v2102_v0 = vmul.f32 0.0051020407, %v2100_v27  ;;  %v2101_v18 = vmul.f32 0.0051020407, %v2095_v63 }
 0x639   : > { %2106 = vst.msk [vmem:[%s269_s30 + $0x1] sm:$0xf] %vm2105_vm12, %v2102_v0 }
 0x63a   : > { %2104 = vst.msk [vmem:[%s269_s30 - $0x7] sm:$0x80] %vm2103_vm13, %v2101_v18 }
 0x63b PF: > { %p16_p8 = scmp.ge.s32.totalorder %s2535_s26, 4   ;;  %s3943_s21 = smov %s2441_s22 }
 0x63c   : > { %s3944_s22 = smov %s2445_s23  ;;  %s3945_s23 = smov %s2545_s29 }
 0x63d   : > { %s3946_s24 = smov %s2535_s26  ;;  %18 = sbr.rel (!%p16_p8) target bundleno = 3 (0x3), region = 88 }
 0x644   :  { %2126 = vsyncpa [#allocation4], 1 }
 0x645   :  { %2128 = vsyncpa [#allocation4 + $0x1], 1 }

</bundles_post_ra>
